<compile_context>
chip_gen: v6e
topology: v6e:2x2x1
jax: 0.10.0
libtpu: 0.0.40
codegen_flags: <defaults>
</compile_context>

<pallas_src>
import functools

import jax
import jax.numpy as jnp
from jax.experimental import pallas as pl
from jax.experimental.pallas import tpu as pltpu


# ----------------------------------------------------------------------------
# Kernel
# ----------------------------------------------------------------------------
def _conv3x3(pad_ref, w_ref, bt, ho, wo, cout, stride):
    """3x3 conv over a zero-padded NHWC VMEM scratch. Returns (bt*ho*wo, cout) f32.

    pad_ref: (bt, h+2, w+2, cin) zero-padded input staging buffer.
    w_ref:   (9, cin, cout) with k = kh*3 + kw.
    """
    _, hp, _, cin = pad_ref.shape
    acc = jnp.zeros((bt * ho * wo, cout), jnp.float32)
    if stride == 1:
        for kh in range(3):
            for kw in range(3):
                patch = pad_ref[:, kh:kh + ho, kw:kw + wo, :]          # (bt,ho,wo,cin)
                acc = acc + jnp.dot(patch.reshape(bt * ho * wo, cin),
                                    w_ref[kh * 3 + kw],
                                    preferred_element_type=jnp.float32)
    else:  # stride == 2 (even H/W enforced by the wrapper)
        for kw in range(3):
            # Lane-preserving, sublane-strided load: every other column from kw.
            cols = pad_ref[:, :, pl.ds(kw, wo, 2), :]                  # (bt,hp,wo,cin)
            # Free reshape (splits a leading dim only): rows -> (row/2, phase).
            cols = cols.reshape(bt, hp // 2, 2, wo, cin)
            for kh in range(3):
                patch = cols[:, kh // 2:kh // 2 + ho, kh % 2, :, :]    # rows kh, kh+2, ...
                acc = acc + jnp.dot(patch.reshape(bt * ho * wo, cin),
                                    w_ref[kh * 3 + kw],
                                    preferred_element_type=jnp.float32)
    return acc


def _bottleneck_ir_kernel(stride, use_conv_shortcut,
                          x_ref, bn1_ref, w1_ref, bn2_ref, alpha_ref,
                          w2_ref, bn3_ref, *rest):
    if use_conv_shortcut:
        wsc_ref, bnsc_ref, o_ref, pad1_ref, pad2_ref = rest
    else:
        o_ref, pad1_ref, pad2_ref = rest

    bt, h, w, cin = x_ref.shape
    _, ho, wo, d = o_ref.shape

    x = x_ref[...].astype(jnp.float32)                                 # (bt,h,w,cin)

    # ---------------- residual branch ----------------
    # BN1 (folded eval-mode scale/bias).
    t1 = x * bn1_ref[0:1, :] + bn1_ref[1:2, :]

    # conv1: 3x3, stride 1, pad 1.  (Zero the border every step: with a
    # "parallel" grid the scratch is per-core, so no program_id==0 trick.)
    pad1_ref[...] = jnp.zeros_like(pad1_ref)
    pad1_ref[:, 1:h + 1, 1:w + 1, :] = t1
    r = _conv3x3(pad1_ref, w1_ref, bt, h, w, d, 1)                     # (bt*h*w, d)

    # BN2 + PReLU (per-channel alpha).
    r = r * bn2_ref[0:1, :] + bn2_ref[1:2, :]
    r = jnp.where(r >= 0, r, r * alpha_ref[...])

    # conv2: 3x3, stride `stride`, pad 1.
    pad2_ref[...] = jnp.zeros_like(pad2_ref)
    pad2_ref[:, 1:h + 1, 1:w + 1, :] = r.reshape(bt, h, w, d)
    r = _conv3x3(pad2_ref, w2_ref, bt, ho, wo, d, stride)              # (bt*ho*wo, d)

    # BN3.
    r = r * bn3_ref[0:1, :] + bn3_ref[1:2, :]

    # ---------------- shortcut branch ----------------
    if stride == 1:
        x_s = x                                   # MaxPool2d(1, 1) == identity
    else:
        xc = x_ref[:, :, pl.ds(0, wo, stride), :].astype(jnp.float32)  # cols 0,2,...
        x_s = xc.reshape(bt, h // stride, stride, wo, cin)[:, :, 0, :, :]  # rows 0,2,...
    sc = x_s.reshape(bt * ho * wo, cin)
    if use_conv_shortcut:                         # Conv2d(1x1, stride) + BN
        sc = jnp.dot(sc, wsc_ref[...], preferred_element_type=jnp.float32)
        sc = sc * bnsc_ref[0:1, :] + bnsc_ref[1:2, :]

    o_ref[...] = (r + sc).reshape(bt, ho, wo, d).astype(o_ref.dtype)


# ----------------------------------------------------------------------------
# Wrapper
# ----------------------------------------------------------------------------
def _fold_bn(gamma, beta, mean, var, eps=1e-5):
    scale = gamma / jnp.sqrt(var + eps)
    return jnp.stack([scale, beta - mean * scale]).astype(jnp.float32)   # (2, C)


def bottleneck_ir_forward(x_nchw, params, *, stride):
    """Fused Pallas forward of bottleneck_IR.  x_nchw: (B, Cin, H, W)."""
    B, Cin, H, W = x_nchw.shape
    D = params["w1"].shape[0]
    assert stride in (1, 2)
    if stride == 2:
        assert H % 2 == 0 and W % 2 == 0, "stride-2 path assumes even spatial dims"
    Ho = (H - 1) // stride + 1
    Wo = (W - 1) // stride + 1
    use_conv_shortcut = "w_sc" in params
    if not use_conv_shortcut:
        assert Cin == D, "identity (MaxPool) shortcut requires in_channel == depth"

    # NHWC: channels on the lane axis -> lane-dense loads/stores/matmuls.
    x_nhwc = jnp.transpose(x_nchw, (0, 2, 3, 1))

    # Torch (O, I, kh, kw) -> (kh, kw, I, O) -> (9, I, O).
    w1 = jnp.transpose(params["w1"], (2, 3, 1, 0)).reshape(9, Cin, D).astype(jnp.float32)
    w2 = jnp.transpose(params["w2"], (2, 3, 1, 0)).reshape(9, D, D).astype(jnp.float32)
    bn1 = _fold_bn(*params["bn1"])
    bn2 = _fold_bn(*params["bn2"])
    bn3 = _fold_bn(*params["bn3"])
    alpha = params["prelu"].reshape(1, D).astype(jnp.float32)

    # Batch tile: as many elements per grid step as fit a ~20 MiB working-set
    # budget (double-buffered in/out + padded staging scratch + intermediates),
    # but keep >= 2 grid steps when possible so "parallel" can shard across
    # TensorCores (megacore / v7x).
    per_elem = 4 * (2 * H * W * Cin + 2 * Ho * Wo * D
                    + (H + 2) * (W + 2) * (Cin + D)
                    + 2 * H * W * D)
    bt = max(1, min(B, (20 * 1024 * 1024) // max(per_elem, 1)))
    while B % bt:
        bt -= 1
    if B // bt < 2 and bt > 1:
        bt = max(1, bt // 2)
        while B % bt:
            bt -= 1

    inputs = [x_nhwc, bn1, w1, bn2, alpha, w2, bn3]
    in_specs = [
        pl.BlockSpec((bt, H, W, Cin), lambda b: (b, 0, 0, 0)),
        pl.BlockSpec((2, Cin), lambda b: (0, 0)),
        pl.BlockSpec((9, Cin, D), lambda b: (0, 0, 0)),
        pl.BlockSpec((2, D), lambda b: (0, 0)),
        pl.BlockSpec((1, D), lambda b: (0, 0)),
        pl.BlockSpec((9, D, D), lambda b: (0, 0, 0)),
        pl.BlockSpec((2, D), lambda b: (0, 0)),
    ]
    if use_conv_shortcut:
        wsc = jnp.transpose(params["w_sc"], (2, 3, 1, 0)).reshape(Cin, D).astype(jnp.float32)
        bnsc = _fold_bn(*params["bn_sc"])
        inputs += [wsc, bnsc]
        in_specs += [pl.BlockSpec((Cin, D), lambda b: (0, 0)),
                     pl.BlockSpec((2, D), lambda b: (0, 0))]

    flops = 2 * B * 9 * (H * W * Cin * D + Ho * Wo * D * D)
    if use_conv_shortcut:
        flops += 2 * B * Ho * Wo * Cin * D
    bytes_accessed = (sum(int(a.size) * a.dtype.itemsize for a in inputs)
                      + B * Ho * Wo * D * x_nchw.dtype.itemsize)

    out_nhwc = pl.pallas_call(
        functools.partial(_bottleneck_ir_kernel, stride, use_conv_shortcut),
        out_shape=jax.ShapeDtypeStruct((B, Ho, Wo, D), x_nchw.dtype),
        grid_spec=pltpu.PrefetchScalarGridSpec(
            num_scalar_prefetch=0,
            grid=(B // bt,),
            in_specs=in_specs,
            out_specs=pl.BlockSpec((bt, Ho, Wo, D), lambda b: (b, 0, 0, 0)),
            scratch_shapes=[
                pltpu.VMEM((bt, H + 2, W + 2, Cin), jnp.float32),   # conv1 staging
                pltpu.VMEM((bt, H + 2, W + 2, D), jnp.float32),     # conv2 staging
            ],
        ),
        compiler_params=pltpu.CompilerParams(
            dimension_semantics=("parallel",),
            vmem_limit_bytes=64 * 1024 * 1024),
        cost_estimate=pl.CostEstimate(
            flops=flops, transcendentals=0, bytes_accessed=bytes_accessed),
    )(*inputs)

    return jnp.transpose(out_nhwc, (0, 3, 1, 2))


# ----------------------------------------------------------------------------
# Pure-JAX reference (eval-mode PyTorch forward) and self-test
# ----------------------------------------------------------------------------
def bottleneck_ir_reference(x, params, *, stride, eps=1e-5):
    def bn(y, p):
        g, b, m, v = p
        s = g / jnp.sqrt(v + eps)
        return y * s[None, :, None, None] + (b - m * s)[None, :, None, None]

    dn = ("NCHW", "OIHW", "NCHW")
    hi = jax.lax.Precision.HIGHEST
    t = bn(x, params["bn1"])
    t = jax.lax.conv_general_dilated(t, params["w1"], (1, 1), [(1, 1), (1, 1)],
                                     dimension_numbers=dn, precision=hi)
    t = bn(t, params["bn2"])
    a = params["prelu"][None, :, None, None]
    t = jnp.where(t >= 0, t, a * t)
    t = jax.lax.conv_general_dilated(t, params["w2"], (stride, stride), [(1, 1), (1, 1)],
                                     dimension_numbers=dn, precision=hi)
    t = bn(t, params["bn3"])
    if "w_sc" in params:
        sc = jax.lax.conv_general_dilated(x, params["w_sc"], (stride, stride),
                                          [(0, 0), (0, 0)],
                                          dimension_numbers=dn, precision=hi)
        sc = bn(sc, params["bn_sc"])
    else:
        sc = x[:, :, ::stride, ::stride]          # MaxPool2d(kernel=1, stride)
    return t + sc


if __name__ == "__main__":
    key = jax.random.PRNGKey(0)

    def bn_init(k, c):
        k1, k2, k3, k4 = jax.random.split(k, 4)
        return (1.0 + 0.1 * jax.random.normal(k1, (c,), jnp.float32),   # gamma
                0.1 * jax.random.normal(k2, (c,), jnp.float32),          # beta
                0.1 * jax.random.normal(k3, (c,), jnp.float32),          # running_mean
                jax.random.uniform(k4, (c,), jnp.float32, 0.5, 1.5))     # running_var

    def make_params(k, cin, depth, conv_shortcut):
        ks = jax.random.split(k, 8)
        p = {
            "bn1": bn_init(ks[0], cin),
            "w1": 0.1 * jax.random.normal(ks[1], (depth, cin, 3, 3), jnp.float32),
            "bn2": bn_init(ks[2], depth),
            "prelu": 0.25 + 0.05 * jax.random.normal(ks[3], (depth,), jnp.float32),
            "w2": 0.1 * jax.random.normal(ks[4], (depth, depth, 3, 3), jnp.float32),
            "bn3": bn_init(ks[5], depth),
        }
        if conv_shortcut:
            p["w_sc"] = 0.1 * jax.random.normal(ks[6], (depth, cin, 1, 1), jnp.float32)
            p["bn_sc"] = bn_init(ks[7], depth)
        return p

    fwd = jax.jit(bottleneck_ir_forward, static_argnames="stride")
    kx1, kp1, kx2, kp2 = jax.random.split(key, 4)

    # Case A: in_channel == depth, stride 1 -> MaxPool2d(1, 1) identity shortcut.
    B, C, H, W = 2, 16, 16, 16
    xA = jax.random.normal(kx1, (B, C, H, W), jnp.float32)
    pA = make_params(kp1, C, C, conv_shortcut=False)
    outA = jax.block_until_ready(fwd(xA, pA, stride=1))
    refA = bottleneck_ir_reference(xA, pA, stride=1)
    assert outA.shape == refA.shape == (B, C, H, W)
    assert jnp.allclose(outA, refA, atol=1e-2, rtol=1e-2), "case A mismatch vs reference"

    # Case B: in_channel != depth, stride 2 -> Conv2d(1x1, stride=2) + BN shortcut.
    Cin, D = 16, 32
    xB = jax.random.normal(kx2, (B, Cin, H, W), jnp.float32)
    pB = make_params(kp2, Cin, D, conv_shortcut=True)
    outB = jax.block_until_ready(fwd(xB, pB, stride=2))
    refB = bottleneck_ir_reference(xB, pB, stride=2)
    assert outB.shape == refB.shape == (B, D, H // 2, W // 2)
    assert jnp.allclose(outB, refB, atol=1e-2, rtol=1e-2), "case B mismatch vs reference"

    print("KERNEL_OK")
</pallas_src>

<mosaic_0001>
module attributes {stable_mosaic.version = 11 : i64} {
  func.func @_bottleneck_ir_kernel(%arg0: i32, %arg1: memref<1x16x16x16xf32, #tpu.memory_space<vmem>>, %arg2: memref<2x16xf32, #tpu.memory_space<vmem>>, %arg3: memref<9x16x16xf32, #tpu.memory_space<vmem>>, %arg4: memref<2x16xf32, #tpu.memory_space<vmem>>, %arg5: memref<1x16xf32, #tpu.memory_space<vmem>>, %arg6: memref<9x16x16xf32, #tpu.memory_space<vmem>>, %arg7: memref<2x16xf32, #tpu.memory_space<vmem>>, %arg8: memref<1x16x16x16xf32, #tpu.memory_space<vmem>>, %arg9: memref<1x18x18x16xf32, #tpu.memory_space<vmem>>, %arg10: memref<1x18x18x16xf32, #tpu.memory_space<vmem>>) attributes {dimension_semantics = [#tpu.dimension_semantics<parallel>], iteration_bounds = array<i64: 2>, scalar_prefetch = 0 : i64, scratch_operands = 2 : i64, tpu.core_type = #tpu.core_type<tc>, window_params = [{transform_indices = @transform_0, window_bounds = array<i64: 1, 16, 16, 16>}, {pipeline_mode = #tpu.pipeline_mode<synchronous>, transform_indices = @transform_1, window_bounds = array<i64: 2, 16>}, {pipeline_mode = #tpu.pipeline_mode<synchronous>, transform_indices = @transform_2, window_bounds = array<i64: 9, 16, 16>}, {pipeline_mode = #tpu.pipeline_mode<synchronous>, transform_indices = @transform_3, window_bounds = array<i64: 2, 16>}, {pipeline_mode = #tpu.pipeline_mode<synchronous>, transform_indices = @transform_4, window_bounds = array<i64: 1, 16>}, {pipeline_mode = #tpu.pipeline_mode<synchronous>, transform_indices = @transform_5, window_bounds = array<i64: 9, 16, 16>}, {pipeline_mode = #tpu.pipeline_mode<synchronous>, transform_indices = @transform_6, window_bounds = array<i64: 2, 16>}, {transform_indices = @transform_7, window_bounds = array<i64: 1, 16, 16, 16>}]} {
    %c0 = arith.constant 0 : index
    %c0_0 = arith.constant 0 : index
    %c0_1 = arith.constant 0 : index
    %c0_2 = arith.constant 0 : index
    %0 = vector.load %arg1[%c0, %c0_0, %c0_1, %c0_2] : memref<1x16x16x16xf32, #tpu.memory_space<vmem>>, vector<1x16x16x16xf32>
    %c0_3 = arith.constant 0 : index
    %c0_4 = arith.constant 0 : index
    %1 = vector.load %arg2[%c0_3, %c0_4] : memref<2x16xf32, #tpu.memory_space<vmem>>, vector<1x16xf32>
    %2 = vector.shape_cast %1 : vector<1x16xf32> to vector<1x1x1x16xf32>
    %3 = vector.broadcast %2 : vector<1x1x1x16xf32> to vector<1x16x16x16xf32>
    %4 = arith.mulf %0, %3 : vector<1x16x16x16xf32>
    %c1 = arith.constant 1 : index
    %c0_5 = arith.constant 0 : index
    %5 = vector.load %arg2[%c1, %c0_5] : memref<2x16xf32, #tpu.memory_space<vmem>>, vector<1x16xf32>
    %6 = vector.shape_cast %5 : vector<1x16xf32> to vector<1x1x1x16xf32>
    %7 = vector.broadcast %6 : vector<1x1x1x16xf32> to vector<1x16x16x16xf32>
    %8 = arith.addf %4, %7 : vector<1x16x16x16xf32>
    %cst = arith.constant 0.000000e+00 : f32
    %9 = vector.broadcast %cst : f32 to vector<1x18x18x16xf32>
    %c0_6 = arith.constant 0 : index
    %c0_7 = arith.constant 0 : index
    %c0_8 = arith.constant 0 : index
    %c0_9 = arith.constant 0 : index
    %10 = vector.load %arg9[%c0_6, %c0_7, %c0_8, %c0_9] : memref<1x18x18x16xf32, #tpu.memory_space<vmem>>, vector<1x18x18x16xf32>
    tpu.vector_store %arg9[%c0_6, %c0_7, %c0_8, %c0_9], %9 {strides = array<i32>} : memref<1x18x18x16xf32, #tpu.memory_space<vmem>>, vector<1x18x18x16xf32>,
    %c0_10 = arith.constant 0 : index
    %c1_11 = arith.constant 1 : index
    %c1_12 = arith.constant 1 : index
    %c0_13 = arith.constant 0 : index
    %11 = vector.load %arg9[%c0_10, %c1_11, %c1_12, %c0_13] : memref<1x18x18x16xf32, #tpu.memory_space<vmem>>, vector<1x16x16x16xf32>
    tpu.vector_store %arg9[%c0_10, %c1_11, %c1_12, %c0_13], %8 {strides = array<i32>} : memref<1x18x18x16xf32, #tpu.memory_space<vmem>>, vector<1x16x16x16xf32>,
    %cst_14 = arith.constant 0.000000e+00 : f32
    %12 = vector.broadcast %cst_14 : f32 to vector<256x16xf32>
    %c0_15 = arith.constant 0 : index
    %c0_16 = arith.constant 0 : index
    %c0_17 = arith.constant 0 : index
    %c0_18 = arith.constant 0 : index
    %13 = vector.load %arg9[%c0_15, %c0_16, %c0_17, %c0_18] : memref<1x18x18x16xf32, #tpu.memory_space<vmem>>, vector<1x16x16x16xf32>
    %14 = vector.shape_cast %13 : vector<1x16x16x16xf32> to vector<256x16xf32>
    %c0_19 = arith.constant 0 : index
    %c0_20 = arith.constant 0 : index
    %c0_21 = arith.constant 0 : index
    %15 = vector.load %arg3[%c0_19, %c0_20, %c0_21] : memref<9x16x16xf32, #tpu.memory_space<vmem>>, vector<1x16x16xf32>
    %16 = vector.shape_cast %15 : vector<1x16x16xf32> to vector<16x16xf32>
    %cst_22 = arith.constant dense<0.000000e+00> : vector<256x16xf32>
    %17 = tpu.matmul %14, %16, %cst_22 {dimension_numbers = #tpu.dot_dimension_numbers<[1], [0], [0], [1], [0, 0, 1, 1], [], []>} : vector<256x16xf32>, vector<16x16xf32>, vector<256x16xf32> -> vector<256x16xf32>
    %18 = arith.addf %12, %17 : vector<256x16xf32>
    %c0_23 = arith.constant 0 : index
    %c0_24 = arith.constant 0 : index
    %c1_25 = arith.constant 1 : index
    %c0_26 = arith.constant 0 : index
    %19 = vector.load %arg9[%c0_23, %c0_24, %c1_25, %c0_26] : memref<1x18x18x16xf32, #tpu.memory_space<vmem>>, vector<1x16x16x16xf32>
    %20 = vector.shape_cast %19 : vector<1x16x16x16xf32> to vector<256x16xf32>
    %c1_27 = arith.constant 1 : index
    %c0_28 = arith.constant 0 : index
    %c0_29 = arith.constant 0 : index
    %21 = vector.load %arg3[%c1_27, %c0_28, %c0_29] : memref<9x16x16xf32, #tpu.memory_space<vmem>>, vector<1x16x16xf32>
    %22 = vector.shape_cast %21 : vector<1x16x16xf32> to vector<16x16xf32>
    %cst_30 = arith.constant dense<0.000000e+00> : vector<256x16xf32>
    %23 = tpu.matmul %20, %22, %cst_30 {dimension_numbers = #tpu.dot_dimension_numbers<[1], [0], [0], [1], [0, 0, 1, 1], [], []>} : vector<256x16xf32>, vector<16x16xf32>, vector<256x16xf32> -> vector<256x16xf32>
    %24 = arith.addf %18, %23 : vector<256x16xf32>
    %c0_31 = arith.constant 0 : index
    %c0_32 = arith.constant 0 : index
    %c2 = arith.constant 2 : index
    %c0_33 = arith.constant 0 : index
    %25 = vector.load %arg9[%c0_31, %c0_32, %c2, %c0_33] : memref<1x18x18x16xf32, #tpu.memory_space<vmem>>, vector<1x16x16x16xf32>
    %26 = vector.shape_cast %25 : vector<1x16x16x16xf32> to vector<256x16xf32>
    %c2_34 = arith.constant 2 : index
    %c0_35 = arith.constant 0 : index
    %c0_36 = arith.constant 0 : index
    %27 = vector.load %arg3[%c2_34, %c0_35, %c0_36] : memref<9x16x16xf32, #tpu.memory_space<vmem>>, vector<1x16x16xf32>
    %28 = vector.shape_cast %27 : vector<1x16x16xf32> to vector<16x16xf32>
    %cst_37 = arith.constant dense<0.000000e+00> : vector<256x16xf32>
    %29 = tpu.matmul %26, %28, %cst_37 {dimension_numbers = #tpu.dot_dimension_numbers<[1], [0], [0], [1], [0, 0, 1, 1], [], []>} : vector<256x16xf32>, vector<16x16xf32>, vector<256x16xf32> -> vector<256x16xf32>
    %30 = arith.addf %24, %29 : vector<256x16xf32>
    %c0_38 = arith.constant 0 : index
    %c1_39 = arith.constant 1 : index
    %c0_40 = arith.constant 0 : index
    %c0_41 = arith.constant 0 : index
    %31 = vector.load %arg9[%c0_38, %c1_39, %c0_40, %c0_41] : memref<1x18x18x16xf32, #tpu.memory_space<vmem>>, vector<1x16x16x16xf32>
    %32 = vector.shape_cast %31 : vector<1x16x16x16xf32> to vector<256x16xf32>
    %c3 = arith.constant 3 : index
    %c0_42 = arith.constant 0 : index
    %c0_43 = arith.constant 0 : index
    %33 = vector.load %arg3[%c3, %c0_42, %c0_43] : memref<9x16x16xf32, #tpu.memory_space<vmem>>, vector<1x16x16xf32>
    %34 = vector.shape_cast %33 : vector<1x16x16xf32> to vector<16x16xf32>
    %cst_44 = arith.constant dense<0.000000e+00> : vector<256x16xf32>
    %35 = tpu.matmul %32, %34, %cst_44 {dimension_numbers = #tpu.dot_dimension_numbers<[1], [0], [0], [1], [0, 0, 1, 1], [], []>} : vector<256x16xf32>, vector<16x16xf32>, vector<256x16xf32> -> vector<256x16xf32>
    %36 = arith.addf %30, %35 : vector<256x16xf32>
    %c0_45 = arith.constant 0 : index
    %c1_46 = arith.constant 1 : index
    %c1_47 = arith.constant 1 : index
    %c0_48 = arith.constant 0 : index
    %37 = vector.load %arg9[%c0_45, %c1_46, %c1_47, %c0_48] : memref<1x18x18x16xf32, #tpu.memory_space<vmem>>, vector<1x16x16x16xf32>
    %38 = vector.shape_cast %37 : vector<1x16x16x16xf32> to vector<256x16xf32>
    %c4 = arith.constant 4 : index
    %c0_49 = arith.constant 0 : index
    %c0_50 = arith.constant 0 : index
    %39 = vector.load %arg3[%c4, %c0_49, %c0_50] : memref<9x16x16xf32, #tpu.memory_space<vmem>>, vector<1x16x16xf32>
    %40 = vector.shape_cast %39 : vector<1x16x16xf32> to vector<16x16xf32>
    %cst_51 = arith.constant dense<0.000000e+00> : vector<256x16xf32>
    %41 = tpu.matmul %38, %40, %cst_51 {dimension_numbers = #tpu.dot_dimension_numbers<[1], [0], [0], [1], [0, 0, 1, 1], [], []>} : vector<256x16xf32>, vector<16x16xf32>, vector<256x16xf32> -> vector<256x16xf32>
    %42 = arith.addf %36, %41 : vector<256x16xf32>
    %c0_52 = arith.constant 0 : index
    %c1_53 = arith.constant 1 : index
    %c2_54 = arith.constant 2 : index
    %c0_55 = arith.constant 0 : index
    %43 = vector.load %arg9[%c0_52, %c1_53, %c2_54, %c0_55] : memref<1x18x18x16xf32, #tpu.memory_space<vmem>>, vector<1x16x16x16xf32>
    %44 = vector.shape_cast %43 : vector<1x16x16x16xf32> to vector<256x16xf32>
    %c5 = arith.constant 5 : index
    %c0_56 = arith.constant 0 : index
    %c0_57 = arith.constant 0 : index
    %45 = vector.load %arg3[%c5, %c0_56, %c0_57] : memref<9x16x16xf32, #tpu.memory_space<vmem>>, vector<1x16x16xf32>
    %46 = vector.shape_cast %45 : vector<1x16x16xf32> to vector<16x16xf32>
    %cst_58 = arith.constant dense<0.000000e+00> : vector<256x16xf32>
    %47 = tpu.matmul %44, %46, %cst_58 {dimension_numbers = #tpu.dot_dimension_numbers<[1], [0], [0], [1], [0, 0, 1, 1], [], []>} : vector<256x16xf32>, vector<16x16xf32>, vector<256x16xf32> -> vector<256x16xf32>
    %48 = arith.addf %42, %47 : vector<256x16xf32>
    %c0_59 = arith.constant 0 : index
    %c2_60 = arith.constant 2 : index
    %c0_61 = arith.constant 0 : index
    %c0_62 = arith.constant 0 : index
    %49 = vector.load %arg9[%c0_59, %c2_60, %c0_61, %c0_62] : memref<1x18x18x16xf32, #tpu.memory_space<vmem>>, vector<1x16x16x16xf32>
    %50 = vector.shape_cast %49 : vector<1x16x16x16xf32> to vector<256x16xf32>
    %c6 = arith.constant 6 : index
    %c0_63 = arith.constant 0 : index
    %c0_64 = arith.constant 0 : index
    %51 = vector.load %arg3[%c6, %c0_63, %c0_64] : memref<9x16x16xf32, #tpu.memory_space<vmem>>, vector<1x16x16xf32>
    %52 = vector.shape_cast %51 : vector<1x16x16xf32> to vector<16x16xf32>
    %cst_65 = arith.constant dense<0.000000e+00> : vector<256x16xf32>
    %53 = tpu.matmul %50, %52, %cst_65 {dimension_numbers = #tpu.dot_dimension_numbers<[1], [0], [0], [1], [0, 0, 1, 1], [], []>} : vector<256x16xf32>, vector<16x16xf32>, vector<256x16xf32> -> vector<256x16xf32>
    %54 = arith.addf %48, %53 : vector<256x16xf32>
    %c0_66 = arith.constant 0 : index
    %c2_67 = arith.constant 2 : index
    %c1_68 = arith.constant 1 : index
    %c0_69 = arith.constant 0 : index
    %55 = vector.load %arg9[%c0_66, %c2_67, %c1_68, %c0_69] : memref<1x18x18x16xf32, #tpu.memory_space<vmem>>, vector<1x16x16x16xf32>
    %56 = vector.shape_cast %55 : vector<1x16x16x16xf32> to vector<256x16xf32>
    %c7 = arith.constant 7 : index
    %c0_70 = arith.constant 0 : index
    %c0_71 = arith.constant 0 : index
    %57 = vector.load %arg3[%c7, %c0_70, %c0_71] : memref<9x16x16xf32, #tpu.memory_space<vmem>>, vector<1x16x16xf32>
    %58 = vector.shape_cast %57 : vector<1x16x16xf32> to vector<16x16xf32>
    %cst_72 = arith.constant dense<0.000000e+00> : vector<256x16xf32>
    %59 = tpu.matmul %56, %58, %cst_72 {dimension_numbers = #tpu.dot_dimension_numbers<[1], [0], [0], [1], [0, 0, 1, 1], [], []>} : vector<256x16xf32>, vector<16x16xf32>, vector<256x16xf32> -> vector<256x16xf32>
    %60 = arith.addf %54, %59 : vector<256x16xf32>
    %c0_73 = arith.constant 0 : index
    %c2_74 = arith.constant 2 : index
    %c2_75 = arith.constant 2 : index
    %c0_76 = arith.constant 0 : index
    %61 = vector.load %arg9[%c0_73, %c2_74, %c2_75, %c0_76] : memref<1x18x18x16xf32, #tpu.memory_space<vmem>>, vector<1x16x16x16xf32>
    %62 = vector.shape_cast %61 : vector<1x16x16x16xf32> to vector<256x16xf32>
    %c8 = arith.constant 8 : index
    %c0_77 = arith.constant 0 : index
    %c0_78 = arith.constant 0 : index
    %63 = vector.load %arg3[%c8, %c0_77, %c0_78] : memref<9x16x16xf32, #tpu.memory_space<vmem>>, vector<1x16x16xf32>
    %64 = vector.shape_cast %63 : vector<1x16x16xf32> to vector<16x16xf32>
    %cst_79 = arith.constant dense<0.000000e+00> : vector<256x16xf32>
    %65 = tpu.matmul %62, %64, %cst_79 {dimension_numbers = #tpu.dot_dimension_numbers<[1], [0], [0], [1], [0, 0, 1, 1], [], []>} : vector<256x16xf32>, vector<16x16xf32>, vector<256x16xf32> -> vector<256x16xf32>
    %66 = arith.addf %60, %65 : vector<256x16xf32>
    %c0_80 = arith.constant 0 : index
    %c0_81 = arith.constant 0 : index
    %67 = vector.load %arg4[%c0_80, %c0_81] : memref<2x16xf32, #tpu.memory_space<vmem>>, vector<1x16xf32>
    %68 = vector.broadcast %67 : vector<1x16xf32> to vector<256x16xf32>
    %69 = arith.mulf %66, %68 : vector<256x16xf32>
    %c1_82 = arith.constant 1 : index
    %c0_83 = arith.constant 0 : index
    %70 = vector.load %arg4[%c1_82, %c0_83] : memref<2x16xf32, #tpu.memory_space<vmem>>, vector<1x16xf32>
    %71 = vector.broadcast %70 : vector<1x16xf32> to vector<256x16xf32>
    %72 = arith.addf %69, %71 : vector<256x16xf32>
    %cst_84 = arith.constant 0.000000e+00 : f32
    %73 = vector.broadcast %cst_84 : f32 to vector<256x16xf32>
    %74 = arith.cmpf oge, %72, %73 : vector<256x16xf32>
    %c0_85 = arith.constant 0 : index
    %c0_86 = arith.constant 0 : index
    %75 = vector.load %arg5[%c0_85, %c0_86] : memref<1x16xf32, #tpu.memory_space<vmem>>, vector<1x16xf32>
    %76 = vector.broadcast %75 : vector<1x16xf32> to vector<256x16xf32>
    %77 = arith.mulf %72, %76 : vector<256x16xf32>
    %78 = arith.select %74, %72, %77 : vector<256x16xi1>, vector<256x16xf32>
    %cst_87 = arith.constant 0.000000e+00 : f32
    %79 = vector.broadcast %cst_87 : f32 to vector<1x18x18x16xf32>
    %c0_88 = arith.constant 0 : index
    %c0_89 = arith.constant 0 : index
    %c0_90 = arith.constant 0 : index
    %c0_91 = arith.constant 0 : index
    %80 = vector.load %arg10[%c0_88, %c0_89, %c0_90, %c0_91] : memref<1x18x18x16xf32, #tpu.memory_space<vmem>>, vector<1x18x18x16xf32>
    tpu.vector_store %arg10[%c0_88, %c0_89, %c0_90, %c0_91], %79 {strides = array<i32>} : memref<1x18x18x16xf32, #tpu.memory_space<vmem>>, vector<1x18x18x16xf32>,
    %81 = vector.shape_cast %78 : vector<256x16xf32> to vector<1x16x16x16xf32>
    %c0_92 = arith.constant 0 : index
    %c1_93 = arith.constant 1 : index
    %c1_94 = arith.constant 1 : index
    %c0_95 = arith.constant 0 : index
    %82 = vector.load %arg10[%c0_92, %c1_93, %c1_94, %c0_95] : memref<1x18x18x16xf32, #tpu.memory_space<vmem>>, vector<1x16x16x16xf32>
    tpu.vector_store %arg10[%c0_92, %c1_93, %c1_94, %c0_95], %81 {strides = array<i32>} : memref<1x18x18x16xf32, #tpu.memory_space<vmem>>, vector<1x16x16x16xf32>,
    %cst_96 = arith.constant 0.000000e+00 : f32
    %83 = vector.broadcast %cst_96 : f32 to vector<256x16xf32>
    %c0_97 = arith.constant 0 : index
    %c0_98 = arith.constant 0 : index
    %c0_99 = arith.constant 0 : index
    %c0_100 = arith.constant 0 : index
    %84 = vector.load %arg10[%c0_97, %c0_98, %c0_99, %c0_100] : memref<1x18x18x16xf32, #tpu.memory_space<vmem>>, vector<1x16x16x16xf32>
    %85 = vector.shape_cast %84 : vector<1x16x16x16xf32> to vector<256x16xf32>
    %c0_101 = arith.constant 0 : index
    %c0_102 = arith.constant 0 : index
    %c0_103 = arith.constant 0 : index
    %86 = vector.load %arg6[%c0_101, %c0_102, %c0_103] : memref<9x16x16xf32, #tpu.memory_space<vmem>>, vector<1x16x16xf32>
    %87 = vector.shape_cast %86 : vector<1x16x16xf32> to vector<16x16xf32>
    %cst_104 = arith.constant dense<0.000000e+00> : vector<256x16xf32>
    %88 = tpu.matmul %85, %87, %cst_104 {dimension_numbers = #tpu.dot_dimension_numbers<[1], [0], [0], [1], [0, 0, 1, 1], [], []>} : vector<256x16xf32>, vector<16x16xf32>, vector<256x16xf32> -> vector<256x16xf32>
    %89 = arith.addf %83, %88 : vector<256x16xf32>
    %c0_105 = arith.constant 0 : index
    %c0_106 = arith.constant 0 : index
    %c1_107 = arith.constant 1 : index
    %c0_108 = arith.constant 0 : index
    %90 = vector.load %arg10[%c0_105, %c0_106, %c1_107, %c0_108] : memref<1x18x18x16xf32, #tpu.memory_space<vmem>>, vector<1x16x16x16xf32>
    %91 = vector.shape_cast %90 : vector<1x16x16x16xf32> to vector<256x16xf32>
    %c1_109 = arith.constant 1 : index
    %c0_110 = arith.constant 0 : index
    %c0_111 = arith.constant 0 : index
    %92 = vector.load %arg6[%c1_109, %c0_110, %c0_111] : memref<9x16x16xf32, #tpu.memory_space<vmem>>, vector<1x16x16xf32>
    %93 = vector.shape_cast %92 : vector<1x16x16xf32> to vector<16x16xf32>
    %cst_112 = arith.constant dense<0.000000e+00> : vector<256x16xf32>
    %94 = tpu.matmul %91, %93, %cst_112 {dimension_numbers = #tpu.dot_dimension_numbers<[1], [0], [0], [1], [0, 0, 1, 1], [], []>} : vector<256x16xf32>, vector<16x16xf32>, vector<256x16xf32> -> vector<256x16xf32>
    %95 = arith.addf %89, %94 : vector<256x16xf32>
    %c0_113 = arith.constant 0 : index
    %c0_114 = arith.constant 0 : index
    %c2_115 = arith.constant 2 : index
    %c0_116 = arith.constant 0 : index
    %96 = vector.load %arg10[%c0_113, %c0_114, %c2_115, %c0_116] : memref<1x18x18x16xf32, #tpu.memory_space<vmem>>, vector<1x16x16x16xf32>
    %97 = vector.shape_cast %96 : vector<1x16x16x16xf32> to vector<256x16xf32>
    %c2_117 = arith.constant 2 : index
    %c0_118 = arith.constant 0 : index
    %c0_119 = arith.constant 0 : index
    %98 = vector.load %arg6[%c2_117, %c0_118, %c0_119] : memref<9x16x16xf32, #tpu.memory_space<vmem>>, vector<1x16x16xf32>
    %99 = vector.shape_cast %98 : vector<1x16x16xf32> to vector<16x16xf32>
    %cst_120 = arith.constant dense<0.000000e+00> : vector<256x16xf32>
    %100 = tpu.matmul %97, %99, %cst_120 {dimension_numbers = #tpu.dot_dimension_numbers<[1], [0], [0], [1], [0, 0, 1, 1], [], []>} : vector<256x16xf32>, vector<16x16xf32>, vector<256x16xf32> -> vector<256x16xf32>
    %101 = arith.addf %95, %100 : vector<256x16xf32>
    %c0_121 = arith.constant 0 : index
    %c1_122 = arith.constant 1 : index
    %c0_123 = arith.constant 0 : index
    %c0_124 = arith.constant 0 : index
    %102 = vector.load %arg10[%c0_121, %c1_122, %c0_123, %c0_124] : memref<1x18x18x16xf32, #tpu.memory_space<vmem>>, vector<1x16x16x16xf32>
    %103 = vector.shape_cast %102 : vector<1x16x16x16xf32> to vector<256x16xf32>
    %c3_125 = arith.constant 3 : index
    %c0_126 = arith.constant 0 : index
    %c0_127 = arith.constant 0 : index
    %104 = vector.load %arg6[%c3_125, %c0_126, %c0_127] : memref<9x16x16xf32, #tpu.memory_space<vmem>>, vector<1x16x16xf32>
    %105 = vector.shape_cast %104 : vector<1x16x16xf32> to vector<16x16xf32>
    %cst_128 = arith.constant dense<0.000000e+00> : vector<256x16xf32>
    %106 = tpu.matmul %103, %105, %cst_128 {dimension_numbers = #tpu.dot_dimension_numbers<[1], [0], [0], [1], [0, 0, 1, 1], [], []>} : vector<256x16xf32>, vector<16x16xf32>, vector<256x16xf32> -> vector<256x16xf32>
    %107 = arith.addf %101, %106 : vector<256x16xf32>
    %c0_129 = arith.constant 0 : index
    %c1_130 = arith.constant 1 : index
    %c1_131 = arith.constant 1 : index
    %c0_132 = arith.constant 0 : index
    %108 = vector.load %arg10[%c0_129, %c1_130, %c1_131, %c0_132] : memref<1x18x18x16xf32, #tpu.memory_space<vmem>>, vector<1x16x16x16xf32>
    %109 = vector.shape_cast %108 : vector<1x16x16x16xf32> to vector<256x16xf32>
    %c4_133 = arith.constant 4 : index
    %c0_134 = arith.constant 0 : index
    %c0_135 = arith.constant 0 : index
    %110 = vector.load %arg6[%c4_133, %c0_134, %c0_135] : memref<9x16x16xf32, #tpu.memory_space<vmem>>, vector<1x16x16xf32>
    %111 = vector.shape_cast %110 : vector<1x16x16xf32> to vector<16x16xf32>
    %cst_136 = arith.constant dense<0.000000e+00> : vector<256x16xf32>
    %112 = tpu.matmul %109, %111, %cst_136 {dimension_numbers = #tpu.dot_dimension_numbers<[1], [0], [0], [1], [0, 0, 1, 1], [], []>} : vector<256x16xf32>, vector<16x16xf32>, vector<256x16xf32> -> vector<256x16xf32>
    %113 = arith.addf %107, %112 : vector<256x16xf32>
    %c0_137 = arith.constant 0 : index
    %c1_138 = arith.constant 1 : index
    %c2_139 = arith.constant 2 : index
    %c0_140 = arith.constant 0 : index
    %114 = vector.load %arg10[%c0_137, %c1_138, %c2_139, %c0_140] : memref<1x18x18x16xf32, #tpu.memory_space<vmem>>, vector<1x16x16x16xf32>
    %115 = vector.shape_cast %114 : vector<1x16x16x16xf32> to vector<256x16xf32>
    %c5_141 = arith.constant 5 : index
    %c0_142 = arith.constant 0 : index
    %c0_143 = arith.constant 0 : index
    %116 = vector.load %arg6[%c5_141, %c0_142, %c0_143] : memref<9x16x16xf32, #tpu.memory_space<vmem>>, vector<1x16x16xf32>
    %117 = vector.shape_cast %116 : vector<1x16x16xf32> to vector<16x16xf32>
    %cst_144 = arith.constant dense<0.000000e+00> : vector<256x16xf32>
    %118 = tpu.matmul %115, %117, %cst_144 {dimension_numbers = #tpu.dot_dimension_numbers<[1], [0], [0], [1], [0, 0, 1, 1], [], []>} : vector<256x16xf32>, vector<16x16xf32>, vector<256x16xf32> -> vector<256x16xf32>
    %119 = arith.addf %113, %118 : vector<256x16xf32>
    %c0_145 = arith.constant 0 : index
    %c2_146 = arith.constant 2 : index
    %c0_147 = arith.constant 0 : index
    %c0_148 = arith.constant 0 : index
    %120 = vector.load %arg10[%c0_145, %c2_146, %c0_147, %c0_148] : memref<1x18x18x16xf32, #tpu.memory_space<vmem>>, vector<1x16x16x16xf32>
    %121 = vector.shape_cast %120 : vector<1x16x16x16xf32> to vector<256x16xf32>
    %c6_149 = arith.constant 6 : index
    %c0_150 = arith.constant 0 : index
    %c0_151 = arith.constant 0 : index
    %122 = vector.load %arg6[%c6_149, %c0_150, %c0_151] : memref<9x16x16xf32, #tpu.memory_space<vmem>>, vector<1x16x16xf32>
    %123 = vector.shape_cast %122 : vector<1x16x16xf32> to vector<16x16xf32>
    %cst_152 = arith.constant dense<0.000000e+00> : vector<256x16xf32>
    %124 = tpu.matmul %121, %123, %cst_152 {dimension_numbers = #tpu.dot_dimension_numbers<[1], [0], [0], [1], [0, 0, 1, 1], [], []>} : vector<256x16xf32>, vector<16x16xf32>, vector<256x16xf32> -> vector<256x16xf32>
    %125 = arith.addf %119, %124 : vector<256x16xf32>
    %c0_153 = arith.constant 0 : index
    %c2_154 = arith.constant 2 : index
    %c1_155 = arith.constant 1 : index
    %c0_156 = arith.constant 0 : index
    %126 = vector.load %arg10[%c0_153, %c2_154, %c1_155, %c0_156] : memref<1x18x18x16xf32, #tpu.memory_space<vmem>>, vector<1x16x16x16xf32>
    %127 = vector.shape_cast %126 : vector<1x16x16x16xf32> to vector<256x16xf32>
    %c7_157 = arith.constant 7 : index
    %c0_158 = arith.constant 0 : index
    %c0_159 = arith.constant 0 : index
    %128 = vector.load %arg6[%c7_157, %c0_158, %c0_159] : memref<9x16x16xf32, #tpu.memory_space<vmem>>, vector<1x16x16xf32>
    %129 = vector.shape_cast %128 : vector<1x16x16xf32> to vector<16x16xf32>
    %cst_160 = arith.constant dense<0.000000e+00> : vector<256x16xf32>
    %130 = tpu.matmul %127, %129, %cst_160 {dimension_numbers = #tpu.dot_dimension_numbers<[1], [0], [0], [1], [0, 0, 1, 1], [], []>} : vector<256x16xf32>, vector<16x16xf32>, vector<256x16xf32> -> vector<256x16xf32>
    %131 = arith.addf %125, %130 : vector<256x16xf32>
    %c0_161 = arith.constant 0 : index
    %c2_162 = arith.constant 2 : index
    %c2_163 = arith.constant 2 : index
    %c0_164 = arith.constant 0 : index
    %132 = vector.load %arg10[%c0_161, %c2_162, %c2_163, %c0_164] : memref<1x18x18x16xf32, #tpu.memory_space<vmem>>, vector<1x16x16x16xf32>
    %133 = vector.shape_cast %132 : vector<1x16x16x16xf32> to vector<256x16xf32>
    %c8_165 = arith.constant 8 : index
    %c0_166 = arith.constant 0 : index
    %c0_167 = arith.constant 0 : index
    %134 = vector.load %arg6[%c8_165, %c0_166, %c0_167] : memref<9x16x16xf32, #tpu.memory_space<vmem>>, vector<1x16x16xf32>
    %135 = vector.shape_cast %134 : vector<1x16x16xf32> to vector<16x16xf32>
    %cst_168 = arith.constant dense<0.000000e+00> : vector<256x16xf32>
    %136 = tpu.matmul %133, %135, %cst_168 {dimension_numbers = #tpu.dot_dimension_numbers<[1], [0], [0], [1], [0, 0, 1, 1], [], []>} : vector<256x16xf32>, vector<16x16xf32>, vector<256x16xf32> -> vector<256x16xf32>
    %137 = arith.addf %131, %136 : vector<256x16xf32>
    %c0_169 = arith.constant 0 : index
    %c0_170 = arith.constant 0 : index
    %138 = vector.load %arg7[%c0_169, %c0_170] : memref<2x16xf32, #tpu.memory_space<vmem>>, vector<1x16xf32>
    %139 = vector.broadcast %138 : vector<1x16xf32> to vector<256x16xf32>
    %140 = arith.mulf %137, %139 : vector<256x16xf32>
    %c1_171 = arith.constant 1 : index
    %c0_172 = arith.constant 0 : index
    %141 = vector.load %arg7[%c1_171, %c0_172] : memref<2x16xf32, #tpu.memory_space<vmem>>, vector<1x16xf32>
    %142 = vector.broadcast %141 : vector<1x16xf32> to vector<256x16xf32>
    %143 = arith.addf %140, %142 : vector<256x16xf32>
    %144 = vector.shape_cast %0 : vector<1x16x16x16xf32> to vector<256x16xf32>
    %145 = arith.addf %143, %144 : vector<256x16xf32>
    %146 = vector.shape_cast %145 : vector<256x16xf32> to vector<1x16x16x16xf32>
    %c0_173 = arith.constant 0 : index
    %c0_174 = arith.constant 0 : index
    %c0_175 = arith.constant 0 : index
    %c0_176 = arith.constant 0 : index
    %147 = vector.load %arg8[%c0_173, %c0_174, %c0_175, %c0_176] : memref<1x16x16x16xf32, #tpu.memory_space<vmem>>, vector<1x16x16x16xf32>
    tpu.vector_store %arg8[%c0_173, %c0_174, %c0_175, %c0_176], %146 {strides = array<i32>} : memref<1x16x16x16xf32, #tpu.memory_space<vmem>>, vector<1x16x16x16xf32>,
    return
  }
  func.func @transform_0(%arg0: i32) -> (i32, i32, i32, i32) {
    %c0_i32 = arith.constant 0 : i32
    %c0_i32_0 = arith.constant 0 : i32
    %c0_i32_1 = arith.constant 0 : i32
    %c0_i32_2 = arith.constant 0 : i32
    return %arg0, %c0_i32, %c0_i32_0, %c0_i32_1 : i32, i32, i32, i32
  }
  func.func @transform_1(%arg0: i32) -> (i32, i32) {
    %c0_i32 = arith.constant 0 : i32
    %c0_i32_0 = arith.constant 0 : i32
    %c0_i32_1 = arith.constant 0 : i32
    return %c0_i32, %c0_i32_0 : i32, i32
  }
  func.func @transform_2(%arg0: i32) -> (i32, i32, i32) {
    %c0_i32 = arith.constant 0 : i32
    %c0_i32_0 = arith.constant 0 : i32
    %c0_i32_1 = arith.constant 0 : i32
    %c0_i32_2 = arith.constant 0 : i32
    return %c0_i32, %c0_i32_0, %c0_i32_1 : i32, i32, i32
  }
  func.func @transform_3(%arg0: i32) -> (i32, i32) {
    %c0_i32 = arith.constant 0 : i32
    %c0_i32_0 = arith.constant 0 : i32
    %c0_i32_1 = arith.constant 0 : i32
    return %c0_i32, %c0_i32_0 : i32, i32
  }
  func.func @transform_4(%arg0: i32) -> (i32, i32) {
    %c0_i32 = arith.constant 0 : i32
    %c0_i32_0 = arith.constant 0 : i32
    %c0_i32_1 = arith.constant 0 : i32
    return %c0_i32, %c0_i32_0 : i32, i32
  }
  func.func @transform_5(%arg0: i32) -> (i32, i32, i32) {
    %c0_i32 = arith.constant 0 : i32
    %c0_i32_0 = arith.constant 0 : i32
    %c0_i32_1 = arith.constant 0 : i32
    %c0_i32_2 = arith.constant 0 : i32
    return %c0_i32, %c0_i32_0, %c0_i32_1 : i32, i32, i32
  }
  func.func @transform_6(%arg0: i32) -> (i32, i32) {
    %c0_i32 = arith.constant 0 : i32
    %c0_i32_0 = arith.constant 0 : i32
    %c0_i32_1 = arith.constant 0 : i32
    return %c0_i32, %c0_i32_0 : i32, i32
  }
  func.func @transform_7(%arg0: i32) -> (i32, i32, i32, i32) {
    %c0_i32 = arith.constant 0 : i32
    %c0_i32_0 = arith.constant 0 : i32
    %c0_i32_1 = arith.constant 0 : i32
    %c0_i32_2 = arith.constant 0 : i32
    return %arg0, %c0_i32, %c0_i32_0, %c0_i32_1 : i32, i32, i32, i32
  }
}

</mosaic_0001>

<bundles_post_ra>
// kernel: bottleneck_ir_forward.1
= control target key start
LH: loop header
LB: loop body
LE: loop exit
PB: predicated region body
PF: predicated region fallthrough
CT: control target
= control target key end

     0   :  { %s10054_s24 = smov 0   ;;  %s13648_s0 = inlined_call_operand.vmem [shape: f32[2,16,16,16], index: 0, kind: input, shape index: {}]   ;;  %s13649_s1 = inlined_call_operand.vmem [shape: f32[2,16], index: 1, kind: input, shape index: {}]   ;;  %s13650_s2 = inlined_call_operand.vmem [shape: f32[9,16,16], index: 2, kind: input, shape index: {}]   ;;  %s13651_s3 = inlined_call_operand.vmem [shape: f32[2,16], index: 3, kind: input, shape index: {}]   ;;  %s13652_s4 = inlined_call_operand.vmem [shape: f32[1,16], index: 4, kind: input, shape index: {}]   ;;  %s13653_s5 = inlined_call_operand.vmem [shape: f32[9,16,16], index: 5, kind: input, shape index: {}]   ;;  %s13654_s6 = inlined_call_operand.vmem [shape: f32[2,16], index: 6, kind: input, shape index: {}]   ;;  %s13655_s7 = inlined_call_operand.vmem [shape: f32[2,16,16,16], index: 7, kind: output, shape index: {}]  }
   0x1 LB: > { %s7787_s25 = sadd.s32 4294967295, %s10011_s24   ;;  %p7791_p0 = scmp.ge.s32.totalorder %s10011_s24, 1  ;;  %s10011_s24 = sphi %s10054_s24, %s17_s24  }
   0x2   : > { %p237_p1 = scmp.lt.s32.totalorder %s10011_s24, 3 }
   0x4   : > { %p238_p2 = pnand %p7791_p0, %p237_p1 }
   0x6   : > { %241 = sbr.rel (%p238_p2) target bundleno = 1060 (0x424), region = 48 }
   0xb   : > { %v10065_v0 = vld [vmem:[%s13650_s2 + $0x18] sm:$0xff]  ;;  %v10070_v1 = vld [vmem:[%s13650_s2 + $0x8] sm:$0xff]  ;;  %v10075_v2 = vld [vmem:[%s13650_s2 + $0x10] sm:$0xff]  ;;  %vm385_vm0 = vcmask 130048   ;;  %vm388_vm1 = vcmask 123904   ;;  %v10013_v4 = vmov 0.0  }
   0xc   : > { %9027 = vmatprep.subr.mxu0 %v10065_v0  ;;  %9079 = vmatprep.subr.mxu1 %v10070_v1  ;;  %v10082_v3 = vld [vmem:[%s13650_s2] sm:$0xff]  ;;  %386 = vst.msk [vmem:[#allocation2] sm:$0xff] %vm385_vm0, %v10013_v4  ;;  %387 = vst.msk [vmem:[#allocation2 + $0x8] sm:$0xff] %vm385_vm0, %v10013_v4  ;;  %p269_p3 = scmp.lt.s32.totalorder %s7787_s25, 1  ;;  %v7865_v5 = vld [vmem:[%s13650_s2 + $0x28] sm:$0xff] }
   0xd   : > { %390 = vst.msk [vmem:[#allocation2 + $0x18] sm:$0xff] %vm385_vm0, %v10013_v4  ;;  %391 = vst.msk [vmem:[#allocation2 + $0x20] sm:$0xff] %vm385_vm0, %v10013_v4  ;;  %9028 = vmatpush3.msra.mxu0 %v10065_v0  ;;  %9080 = vmatpush3.msra.mxu1 %v10070_v1  ;;  %v10310_v6 = vld [vmem:[%s13650_s2 + $0x38] sm:$0xff]  ;;  %v10324_v7 = vld [vmem:[%s13649_s1] ss:$0 sm:$0xff] }
   0xe   : > { %393 = vst.msk [vmem:[#allocation2 + $0x30] sm:$0xff] %vm385_vm0, %v10013_v4  ;;  %394 = vst.msk [vmem:[#allocation2 + $0x38] sm:$0xff] %vm385_vm0, %v10013_v4  ;;  %9029 = vmatprep.subr.mxu0 %v10075_v2  ;;  %9081 = vmatprep.subr.mxu1 %v10082_v3  ;;  %s14095_s25 = smov (!%p269_p3, %s7787_s25), 1  ;;  %v10337_v8 = vld [vmem:[%s13649_s1 + $0x1] ss:$0 sm:$0xff]  ;;  %v10363_v28 = vld [vmem:[%s13650_s2 + $0x48] sm:$0xff] }
   0xf   : > { %396 = vst.msk [vmem:[#allocation2 + $0x48] sm:$0xff] %vm385_vm0, %v10013_v4  ;;  %397 = vst.msk [vmem:[#allocation2 + $0x50] sm:$0xff] %vm385_vm0, %v10013_v4  ;;  %9030 = vmatpush3.msra.mxu0 %v10075_v2  ;;  %9082 = vmatpush3.msra.mxu1 %v10082_v3  ;;  %s8413_s15 = sshll.u32 %s14095_s25, 8  ;;  %v7864_v12 = vld [vmem:[%s13650_s2 + $0x20] sm:$0xff]  ;;  %v7898_v36 = vld [vmem:[%s13650_s2 + $0x30] sm:$0xff] }
  0x10   : > { %399 = vst.msk [vmem:[#allocation2 + $0x60] sm:$0xff] %vm385_vm0, %v10013_v4  ;;  %400 = vst.msk [vmem:[#allocation2 + $0x68] sm:$0xff] %vm385_vm0, %v10013_v4  ;;  %9131 = vmatprep.subr.mxu0 %v7865_v5  ;;  %9183 = vmatprep.subr.mxu1 %v10310_v6  ;;  %s10332_s20 = scalar_lea.vmem %s13648_s0, %s8413_s15  ;;  %s13376_s21 = scalar_lea.vmem %s13655_s7, %s8413_s15 }
  0x11   : > { %402 = vst.msk [vmem:[#allocation2 + $0x78] sm:$0xff] %vm385_vm0, %v10013_v4  ;;  %403 = vst.msk [vmem:[#allocation2 + $0x80] sm:$0xff] %vm385_vm0, %v10013_v4  ;;  %v279_v9 = vld [vmem:[%s10332_s20] sm:$0xff]  ;;  %v280_v10 = vld [vmem:[%s10332_s20 + $0x8] sm:$0xff] }
  0x12   : > { %405 = vst.msk [vmem:[#allocation2 + $0x90] sm:$0xff] %vm385_vm0, %v10013_v4  ;;  %406 = vst.msk [vmem:[#allocation2 + $0x98] sm:$0xff] %vm385_vm0, %v10013_v4  ;;  %v281_v11 = vld [vmem:[%s10332_s20 + $0x10] sm:$0xff]  ;;  %v316_v16 = vmul.f32 %v10324_v7, %v279_v9  ;;  %v317_v17 = vmul.f32 %v10324_v7, %v280_v10  ;;  %v282_v20 = vld [vmem:[%s10332_s20 + $0x18] sm:$0xff] }
  0x13   : > { %408 = vst.msk [vmem:[#allocation2 + $0xa8] sm:$0xff] %vm385_vm0, %v10013_v4  ;;  %409 = vst.msk [vmem:[#allocation2 + $0xb0] sm:$0xff] %vm385_vm0, %v10013_v4  ;;  %v508_v13 = vld [vmem:[#allocation2 + $0x1] sm:$0xff]  ;;  %v318_v18 = vmul.f32 %v10324_v7, %v281_v11  ;;  %v285_v26 = vld [vmem:[%s10332_s20 + $0x30] sm:$0xff]  ;;  %v319_v29 = vmul.f32 %v10324_v7, %v282_v20 }
  0x14   : > { %411 = vst.msk [vmem:[#allocation2 + $0xc0] sm:$0xff] %vm385_vm0, %v10013_v4  ;;  %412 = vst.msk [vmem:[#allocation2 + $0xc8] sm:$0xff] %vm385_vm0, %v10013_v4  ;;  %v474_v14 = vld [vmem:[#allocation2] sm:$0xff]  ;;  %9031 = vmatprep.mubr.msk.f32.mxu0 %vm385_vm0, %v508_v13  ;;  %v475_v19 = vld [vmem:[#allocation2 + $0x8] sm:$0xff]  ;;  %v353_v22 = vadd.f32 %v10337_v8, %v316_v16  ;;  %v354_v23 = vadd.f32 %v10337_v8, %v317_v17  ;;  %v322_v32 = vmul.f32 %v10324_v7, %v285_v26 }
  0x15   : > { %414 = vst.msk [vmem:[#allocation2 + $0xd8] sm:$0xff] %vm385_vm0, %v10013_v4  ;;  %415 = vst.msk [vmem:[#allocation2 + $0xe0] sm:$0xff] %vm385_vm0, %v10013_v4  ;;  %9083 = vmatprep.mubr.msk.f32.mxu1 %vm385_vm0, %v474_v14  ;;  %v283_v21 = vld [vmem:[%s10332_s20 + $0x20] sm:$0xff]  ;;  %v355_v24 = vadd.f32 %v10337_v8, %v318_v18  ;;  %v284_v25 = vld [vmem:[%s10332_s20 + $0x28] sm:$0xff]  ;;  %v356_v44 = vadd.f32 %v10337_v8, %v319_v29 }
  0x16   : > { %417 = vst.msk [vmem:[#allocation2 + $0xf0] sm:$0xff] %vm385_vm0, %v10013_v4  ;;  %418 = vst.msk [vmem:[#allocation2 + $0xf8] sm:$0xff] %vm385_vm0, %v10013_v4  ;;  %9084 = vmatmul.mubr.msk.f32.vlgmr.msra.gmra.mxu1 %vm385_vm0, %v475_v19  ;;  %v286_v27 = vld [vmem:[%s10332_s20 + $0x38] sm:$0xff]  ;;  %v320_v30 = vmul.f32 %v10324_v7, %v283_v21  ;;  %v321_v31 = vmul.f32 %v10324_v7, %v284_v25  ;;  %v287_v33 = vld [vmem:[%s10332_s20 + $0x40] sm:$0xff]  ;;  %v359_v47 = vadd.f32 %v10337_v8, %v322_v32 }
  0x17   : > { %420 = vst.msk [vmem:[#allocation2 + $0x108] sm:$0xff] %vm385_vm0, %v10013_v4  ;;  %421 = vst.msk [vmem:[#allocation2 + $0x110] sm:$0xff] %vm385_vm0, %v10013_v4  ;;  %v288_v34 = vld [vmem:[%s10332_s20 + $0x48] sm:$0xff]  ;;  %v289_v35 = vld [vmem:[%s10332_s20 + $0x50] sm:$0xff]  ;;  %v323_v37 = vmul.f32 %v10324_v7, %v286_v27  ;;  %v324_v38 = vmul.f32 %v10324_v7, %v287_v33  ;;  %9184 = vmatpush3.msra.mxu1 %v10310_v6 }
  0x18   : > { %423 = vst.msk [vmem:[#allocation2 + $0x120] sm:$0xff] %vm385_vm0, %v10013_v4  ;;  %424 = vst.msk [vmem:[#allocation2 + $0x128] sm:$0xff] %vm385_vm0, %v10013_v4  ;;  %v325_v39 = vmul.f32 %v10324_v7, %v288_v34  ;;  %v326_v40 = vmul.f32 %v10324_v7, %v289_v35  ;;  %v290_v41 = vld [vmem:[%s10332_s20 + $0x58] sm:$0xff]  ;;  %v291_v42 = vld [vmem:[%s10332_s20 + $0x60] sm:$0xff]  ;;  %v357_v45 = vadd.f32 %v10337_v8, %v320_v30  ;;  %9185 = vmatprep.subr.mxu1 %v7898_v36 }
  0x19   : > { %426 = vst.msk [vmem:[#allocation2 + $0x138] sm:$0xff] %vm385_vm0, %v10013_v4  ;;  %427 = vst.msk [vmem:[#allocation2 + $0x140] sm:$0xff] %vm385_vm0, %v10013_v4  ;;  %v292_v43 = vld [vmem:[%s10332_s20 + $0x68] sm:$0xff]  ;;  %v358_v46 = vadd.f32 %v10337_v8, %v321_v31  ;;  %v293_v48 = vld [vmem:[%s10332_s20 + $0x70] sm:$0xff]  ;;  %v360_v51 = vadd.f32 %v10337_v8, %v323_v37  ;;  %v361_v52 = vadd.f32 %v10337_v8, %v324_v38  ;;  %9186 = vmatpush3.msra.mxu1 %v7898_v36 }
  0x1a   : > { %429 = vst.msk [vmem:[#allocation2 + $0x150] sm:$0xff] %vm385_vm0, %v10013_v4  ;;  %430 = vst.msk [vmem:[#allocation2 + $0x158] sm:$0xff] %vm385_vm0, %v10013_v4  ;;  %v294_v49 = vld [vmem:[%s10332_s20 + $0x78] sm:$0xff]  ;;  %v295_v50 = vld [vmem:[%s10332_s20 + $0x80] sm:$0xff]  ;;  %v362_v53 = vadd.f32 %v10337_v8, %v325_v39  ;;  %v363_v54 = vadd.f32 %v10337_v8, %v326_v40  ;;  %v327_v57 = vmul.f32 %v10324_v7, %v290_v41 }
  0x1b   : > { %432 = vst.msk [vmem:[#allocation2 + $0x168] sm:$0xff] %vm385_vm0, %v10013_v4  ;;  %433 = vst.msk [vmem:[#allocation2 + $0x170] sm:$0xff] %vm385_vm0, %v10013_v4  ;;  %v296_v55 = vld [vmem:[%s10332_s20 + $0x88] sm:$0xff]  ;;  %v297_v56 = vld [vmem:[%s10332_s20 + $0x90] sm:$0xff]  ;;  %v328_v58 = vmul.f32 %v10324_v7, %v291_v42  ;;  %v329_v59 = vmul.f32 %v10324_v7, %v292_v43  ;;  %v330_v60 = vmul.f32 %v10324_v7, %v293_v48 }
  0x1c   : > { %435 = vst.msk [vmem:[#allocation2 + $0x180] sm:$0xff] %vm385_vm0, %v10013_v4  ;;  %436 = vst.msk [vmem:[#allocation2 + $0x188] sm:$0xff] %vm385_vm0, %v10013_v4  ;;  %v298_v61 = vld [vmem:[%s10332_s20 + $0x98] sm:$0xff]  ;;  %v331_v62 = vmul.f32 %v10324_v7, %v294_v49  ;;  %v332_v63 = vmul.f32 %v10324_v7, %v295_v50  ;;  %v333_v0 = vmul.f32 %v10324_v7, %v296_v55  ;;  %v299_v2 = vld [vmem:[%s10332_s20 + $0xa0] sm:$0xff] }
  0x1d   : > { %438 = vst.msk [vmem:[#allocation2 + $0x198] sm:$0xff] %vm385_vm0, %v10013_v4  ;;  %439 = vst.msk [vmem:[#allocation2 + $0x1a0] sm:$0xff] %vm385_vm0, %v10013_v4  ;;  %v334_v1 = vmul.f32 %v10324_v7, %v297_v56  ;;  %v300_v3 = vld [vmem:[%s10332_s20 + $0xa8] sm:$0xff]  ;;  %v365_v6 = vadd.f32 %v10337_v8, %v328_v58  ;;  %v366_v9 = vadd.f32 %v10337_v8, %v329_v59  ;;  %v302_v11 = vld [vmem:[%s10332_s20 + $0xb8] sm:$0xff] }
  0x1e   : > { %4079 = vst.msk [vmem:[#allocation3] sm:$0xff] %vm385_vm0, %v10013_v4  ;;  %4080 = vst.msk [vmem:[#allocation3 + $0x8] sm:$0xff] %vm385_vm0, %v10013_v4  ;;  %v367_v10 = vadd.f32 %v10337_v8, %v330_v60  ;;  %v304_v13 = vld [vmem:[%s10332_s20 + $0xc8] sm:$0xff]  ;;  %v368_v14 = vadd.f32 %v10337_v8, %v331_v62  ;;  %v370_v16 = vadd.f32 %v10337_v8, %v333_v0  ;;  %v305_v18 = vld [vmem:[%s10332_s20 + $0xd0] sm:$0xff] }
  0x1f   : > { %4082 = vst.msk [vmem:[#allocation3 + $0x18] sm:$0xff] %vm385_vm0, %v10013_v4  ;;  %4083 = vst.msk [vmem:[#allocation3 + $0x20] sm:$0xff] %vm385_vm0, %v10013_v4  ;;  %v371_v17 = vadd.f32 %v10337_v8, %v334_v1  ;;  %v306_v19 = vld [vmem:[%s10332_s20 + $0xd8] sm:$0xff]  ;;  %v307_v20 = vld [vmem:[%s10332_s20 + $0xe0] sm:$0xff]  ;;  %v336_v25 = vmul.f32 %v10324_v7, %v299_v2  ;;  %v337_v26 = vmul.f32 %v10324_v7, %v300_v3 }
  0x20   : > { %4085 = vst.msk [vmem:[#allocation3 + $0x30] sm:$0xff] %vm385_vm0, %v10013_v4  ;;  %4086 = vst.msk [vmem:[#allocation3 + $0x38] sm:$0xff] %vm385_vm0, %v10013_v4  ;;  %v339_v32 = vmul.f32 %v10324_v7, %v302_v11  ;;  %v341_v34 = vmul.f32 %v10324_v7, %v304_v13  ;;  %v308_v38 = vld [vmem:[%s10332_s20 + $0xe8] sm:$0xff]  ;;  %v309_v39 = vld [vmem:[%s10332_s20 + $0xf0] sm:$0xff]  ;;  %v342_v48 = vmul.f32 %v10324_v7, %v305_v18 }
  0x21   : > { %4088 = vst.msk [vmem:[#allocation3 + $0x48] sm:$0xff] %vm385_vm0, %v10013_v4  ;;  %4089 = vst.msk [vmem:[#allocation3 + $0x50] sm:$0xff] %vm385_vm0, %v10013_v4  ;;  %v373_v36 = vadd.f32 %v10337_v8, %v336_v25  ;;  %v374_v37 = vadd.f32 %v10337_v8, %v337_v26  ;;  %v343_v49 = vmul.f32 %v10324_v7, %v306_v19  ;;  %v310_v26 = vld [vmem:[%s10332_s20 + $0xf8] sm:$0xff] }
  0x22   : > { %4091 = vst.msk [vmem:[#allocation3 + $0x60] sm:$0xff] %vm385_vm0, %v10013_v4  ;;  %4092 = vst.msk [vmem:[#allocation3 + $0x68] sm:$0xff] %vm385_vm0, %v10013_v4  ;;  %v376_v43 = vadd.f32 %v10337_v8, %v339_v32  ;;  %v344_v50 = vmul.f32 %v10324_v7, %v307_v20  ;;  %v10615_v20 = vld [vmem:[%s13650_s2 + $0x58] sm:$0xff] }
  0x23   : > { %4094 = vst.msk [vmem:[#allocation3 + $0x78] sm:$0xff] %vm385_vm0, %v10013_v4  ;;  %4095 = vst.msk [vmem:[#allocation3 + $0x80] sm:$0xff] %vm385_vm0, %v10013_v4  ;;  %9287 = vmatprep.subr.mxu1 %v10615_v20 }
  0x24   : > { %4097 = vst.msk [vmem:[#allocation3 + $0x90] sm:$0xff] %vm385_vm0, %v10013_v4  ;;  %4098 = vst.msk [vmem:[#allocation3 + $0x98] sm:$0xff] %vm385_vm0, %v10013_v4  ;;  %v381_v55 = vadd.f32 %v10337_v8, %v344_v50 }
  0x25   : > { %4100 = vst.msk [vmem:[#allocation3 + $0xa8] sm:$0xff] %vm385_vm0, %v10013_v4  ;;  %4101 = vst.msk [vmem:[#allocation3 + $0xb0] sm:$0xff] %vm385_vm0, %v10013_v4 }
  0x26   : > { %4103 = vst.msk [vmem:[#allocation3 + $0xc0] sm:$0xff] %vm385_vm0, %v10013_v4  ;;  %4104 = vst.msk [vmem:[#allocation3 + $0xc8] sm:$0xff] %vm385_vm0, %v10013_v4 }
  0x27   : > { %4106 = vst.msk [vmem:[#allocation3 + $0xd8] sm:$0xff] %vm385_vm0, %v10013_v4  ;;  %4107 = vst.msk [vmem:[#allocation3 + $0xe0] sm:$0xff] %vm385_vm0, %v10013_v4 }
  0x28   : > { %4109 = vst.msk [vmem:[#allocation3 + $0xf0] sm:$0xff] %vm385_vm0, %v10013_v4  ;;  %4110 = vst.msk [vmem:[#allocation3 + $0xf8] sm:$0xff] %vm385_vm0, %v10013_v4 }
  0x29   : > { %4112 = vst.msk [vmem:[#allocation3 + $0x108] sm:$0xff] %vm385_vm0, %v10013_v4  ;;  %4113 = vst.msk [vmem:[#allocation3 + $0x110] sm:$0xff] %vm385_vm0, %v10013_v4 }
  0x2a   : > { %4115 = vst.msk [vmem:[#allocation3 + $0x120] sm:$0xff] %vm385_vm0, %v10013_v4  ;;  %4116 = vst.msk [vmem:[#allocation3 + $0x128] sm:$0xff] %vm385_vm0, %v10013_v4 }
  0x2b   : > { %4118 = vst.msk [vmem:[#allocation3 + $0x138] sm:$0xff] %vm385_vm0, %v10013_v4  ;;  %4119 = vst.msk [vmem:[#allocation3 + $0x140] sm:$0xff] %vm385_vm0, %v10013_v4 }
  0x2c   : > { %4121 = vst.msk [vmem:[#allocation3 + $0x150] sm:$0xff] %vm385_vm0, %v10013_v4  ;;  %4122 = vst.msk [vmem:[#allocation3 + $0x158] sm:$0xff] %vm385_vm0, %v10013_v4 }
  0x2d   : > { %4124 = vst.msk [vmem:[#allocation3 + $0x168] sm:$0xff] %vm385_vm0, %v10013_v4  ;;  %4125 = vst.msk [vmem:[#allocation3 + $0x170] sm:$0xff] %vm385_vm0, %v10013_v4 }
  0x2e   : > { %4127 = vst.msk [vmem:[#allocation3 + $0x180] sm:$0xff] %vm385_vm0, %v10013_v4  ;;  %4128 = vst.msk [vmem:[#allocation3 + $0x188] sm:$0xff] %vm385_vm0, %v10013_v4 }
  0x2f   : > { %4130 = vst.msk [vmem:[#allocation3 + $0x198] sm:$0xff] %vm385_vm0, %v10013_v4  ;;  %4131 = vst.msk [vmem:[#allocation3 + $0x1a0] sm:$0xff] %vm385_vm0, %v10013_v4 }
  0x30   : > { %389 = vst.msk [vmem:[#allocation2 + $0x10] sm:$0x3] %vm388_vm1, %v10013_v4  ;;  %392 = vst.msk [vmem:[#allocation2 + $0x28] sm:$0x3] %vm388_vm1, %v10013_v4 }
  0x31   : > { %395 = vst.msk [vmem:[#allocation2 + $0x40] sm:$0x3] %vm388_vm1, %v10013_v4  ;;  %398 = vst.msk [vmem:[#allocation2 + $0x58] sm:$0x3] %vm388_vm1, %v10013_v4 }
  0x32   : > { %401 = vst.msk [vmem:[#allocation2 + $0x70] sm:$0x3] %vm388_vm1, %v10013_v4  ;;  %404 = vst.msk [vmem:[#allocation2 + $0x88] sm:$0x3] %vm388_vm1, %v10013_v4 }
  0x33   : > { %407 = vst.msk [vmem:[#allocation2 + $0xa0] sm:$0x3] %vm388_vm1, %v10013_v4  ;;  %410 = vst.msk [vmem:[#allocation2 + $0xb8] sm:$0x3] %vm388_vm1, %v10013_v4 }
  0x34   : > { %413 = vst.msk [vmem:[#allocation2 + $0xd0] sm:$0x3] %vm388_vm1, %v10013_v4  ;;  %416 = vst.msk [vmem:[#allocation2 + $0xe8] sm:$0x3] %vm388_vm1, %v10013_v4 }
  0x35   : > { %419 = vst.msk [vmem:[#allocation2 + $0x100] sm:$0x3] %vm388_vm1, %v10013_v4  ;;  %422 = vst.msk [vmem:[#allocation2 + $0x118] sm:$0x3] %vm388_vm1, %v10013_v4 }
  0x36   : > { %425 = vst.msk [vmem:[#allocation2 + $0x130] sm:$0x3] %vm388_vm1, %v10013_v4  ;;  %428 = vst.msk [vmem:[#allocation2 + $0x148] sm:$0x3] %vm388_vm1, %v10013_v4 }
  0x37   : > { %431 = vst.msk [vmem:[#allocation2 + $0x160] sm:$0x3] %vm388_vm1, %v10013_v4  ;;  %434 = vst.msk [vmem:[#allocation2 + $0x178] sm:$0x3] %vm388_vm1, %v10013_v4  ;;  %v509_v15 = vld [vmem:[#allocation2 + $0x9] sm:$0xff] }
  0x38   : > { %437 = vst.msk [vmem:[#allocation2 + $0x190] sm:$0x3] %vm388_vm1, %v10013_v4  ;;  %440 = vst.msk [vmem:[#allocation2 + $0x1a8] sm:$0x3] %vm388_vm1, %v10013_v4  ;;  %9032 = vmatmul.mubr.msk.f32.vlgmr.msra.gmra.mxu0 %vm385_vm0, %v509_v15  ;;  %v369_v15 = vadd.f32 %v10337_v8, %v332_v63 }
  0x39   : > { %4081 = vst.msk [vmem:[#allocation3 + $0x10] sm:$0x3] %vm388_vm1, %v10013_v4  ;;  %4084 = vst.msk [vmem:[#allocation3 + $0x28] sm:$0x3] %vm388_vm1, %v10013_v4  ;;  %9132 = vmatpush3.msra.mxu0 %v7865_v5  ;;  %v364_v5 = vadd.f32 %v10337_v8, %v327_v57 }
  0x3a   : > { %4087 = vst.msk [vmem:[#allocation3 + $0x40] sm:$0x3] %vm388_vm1, %v10013_v4  ;;  %4090 = vst.msk [vmem:[#allocation3 + $0x58] sm:$0x3] %vm388_vm1, %v10013_v4  ;;  %9133 = vmatprep.subr.mxu0 %v7864_v12 }
  0x3b   : > { %4093 = vst.msk [vmem:[#allocation3 + $0x70] sm:$0x3] %vm388_vm1, %v10013_v4  ;;  %4096 = vst.msk [vmem:[#allocation3 + $0x88] sm:$0x3] %vm388_vm1, %v10013_v4  ;;  %9134 = vmatpush3.msra.mxu0 %v7864_v12  ;;  %v303_v12 = vld [vmem:[%s10332_s20 + $0xc0] sm:$0xff] }
  0x3c   : > { %4099 = vst.msk [vmem:[#allocation3 + $0xa0] sm:$0x3] %vm388_vm1, %v10013_v4  ;;  %4102 = vst.msk [vmem:[#allocation3 + $0xb8] sm:$0x3] %vm388_vm1, %v10013_v4  ;;  %9235 = vmatprep.subr.mxu0 %v10363_v28  ;;  %v340_v33 = vmul.f32 %v10324_v7, %v303_v12 }
  0x3d   : > { %4105 = vst.msk [vmem:[#allocation3 + $0xd0] sm:$0x3] %vm388_vm1, %v10013_v4  ;;  %4108 = vst.msk [vmem:[#allocation3 + $0xe8] sm:$0x3] %vm388_vm1, %v10013_v4 }
  0x3e   : > { %4111 = vst.msk [vmem:[#allocation3 + $0x100] sm:$0x3] %vm388_vm1, %v10013_v4  ;;  %4114 = vst.msk [vmem:[#allocation3 + $0x118] sm:$0x3] %vm388_vm1, %v10013_v4 }
  0x3f   : > { %4117 = vst.msk [vmem:[#allocation3 + $0x130] sm:$0x3] %vm388_vm1, %v10013_v4  ;;  %4120 = vst.msk [vmem:[#allocation3 + $0x148] sm:$0x3] %vm388_vm1, %v10013_v4 }
  0x40   : > { %4123 = vst.msk [vmem:[#allocation3 + $0x160] sm:$0x3] %vm388_vm1, %v10013_v4  ;;  %4126 = vst.msk [vmem:[#allocation3 + $0x178] sm:$0x3] %vm388_vm1, %v10013_v4 }
  0x41   : > { %4129 = vst.msk [vmem:[#allocation3 + $0x190] sm:$0x3] %vm388_vm1, %v10013_v4  ;;  %4132 = vst.msk [vmem:[#allocation3 + $0x1a8] sm:$0x3] %vm388_vm1, %v10013_v4  ;;  %v301_v4 = vld [vmem:[%s10332_s20 + $0xb0] sm:$0xff] }
  0x42   : > { %442 = vst.msk [vmem:[#allocation2 + $0x19] sm:$0xff] %vm385_vm0, %v353_v22  ;;  %443 = vst.msk [vmem:[#allocation2 + $0x21] sm:$0xff] %vm385_vm0, %v354_v23  ;;  %v338_v27 = vmul.f32 %v10324_v7, %v301_v4 }
  0x43   : > { %444 = vst.msk [vmem:[#allocation2 + $0x31] sm:$0xff] %vm385_vm0, %v355_v24  ;;  %445 = vst.msk [vmem:[#allocation2 + $0x39] sm:$0xff] %vm385_vm0, %v356_v44  ;;  %v335_v24 = vmul.f32 %v10324_v7, %v298_v61  ;;  %v377_v44 = vadd.f32 %v10337_v8, %v340_v33  ;;  %v347_v33 = vmul.f32 %v10324_v7, %v310_v26 }
  0x44   : > { %446 = vst.msk [vmem:[#allocation2 + $0x49] sm:$0xff] %vm385_vm0, %v357_v45  ;;  %447 = vst.msk [vmem:[#allocation2 + $0x51] sm:$0xff] %vm385_vm0, %v358_v46  ;;  %v375_v42 = vadd.f32 %v10337_v8, %v338_v27 }
  0x45   : > { %448 = vst.msk [vmem:[#allocation2 + $0x61] sm:$0xff] %vm385_vm0, %v359_v47  ;;  %449 = vst.msk [vmem:[#allocation2 + $0x69] sm:$0xff] %vm385_vm0, %v360_v51  ;;  %v372_v35 = vadd.f32 %v10337_v8, %v335_v24  ;;  %v378_v47 = vadd.f32 %v10337_v8, %v341_v34  ;;  %v345_v51 = vmul.f32 %v10324_v7, %v308_v38 }
  0x46   : > { %450 = vst.msk [vmem:[#allocation2 + $0x79] sm:$0xff] %vm385_vm0, %v361_v52  ;;  %451 = vst.msk [vmem:[#allocation2 + $0x81] sm:$0xff] %vm385_vm0, %v362_v53  ;;  %v346_v52 = vmul.f32 %v10324_v7, %v309_v39  ;;  %v379_v53 = vadd.f32 %v10337_v8, %v342_v48  ;;  %v384_v34 = vadd.f32 %v10337_v8, %v347_v33  ;;  %v1185_v33 = vld [vmem:[#allocation2 + $0x2] sm:$0xff] }
  0x47   : > { %452 = vst.msk [vmem:[#allocation2 + $0x91] sm:$0xff] %vm385_vm0, %v363_v54  ;;  %453 = vst.msk [vmem:[#allocation2 + $0x99] sm:$0xff] %vm385_vm0, %v364_v5  ;;  %v380_v54 = vadd.f32 %v10337_v8, %v343_v49  ;;  %v382_v58 = vadd.f32 %v10337_v8, %v345_v51 }
  0x48   : > { %454 = vst.msk [vmem:[#allocation2 + $0xa9] sm:$0xff] %vm385_vm0, %v365_v6  ;;  %455 = vst.msk [vmem:[#allocation2 + $0xb1] sm:$0xff] %vm385_vm0, %v366_v9  ;;  %v383_v59 = vadd.f32 %v10337_v8, %v346_v52 }
  0x49   : > { %v10434_v21 = vld [vmem:[#allocation2 + $0x19] sm:$0xff]  ;;  %v10438_v23 = vld [vmem:[#allocation2 + $0x21] sm:$0xff]  ;;  %456 = vst.msk [vmem:[#allocation2 + $0xc1] sm:$0xff] %vm385_vm0, %v367_v10  ;;  %457 = vst.msk [vmem:[#allocation2 + $0xc9] sm:$0xff] %vm385_vm0, %v368_v14 }
  0x4a   : > { %v10436_v22 = vld [vmem:[#allocation2 + $0x18] sm:$0xff]  ;;  %9034 = vmatprep.mubr.msk.f32.mxu0 %vm385_vm0, %v10434_v21  ;;  %v10452_v29 = vld [vmem:[#allocation2 + $0x20] sm:$0xff]  ;;  %v10456_v31 = vld [vmem:[#allocation2 + $0x30] sm:$0xff]  ;;  %458 = vst.msk [vmem:[#allocation2 + $0xd9] sm:$0xff] %vm385_vm0, %v369_v15 }
  0x4b   : > { %9086 = vmatprep.mubr.msk.f32.mxu1 %vm385_vm0, %v10436_v22  ;;  %v10454_v30 = vld [vmem:[#allocation2 + $0x31] sm:$0xff]  ;;  %459 = vst.msk [vmem:[#allocation2 + $0xe1] sm:$0xff] %vm385_vm0, %v370_v16  ;;  %460 = vst.msk [vmem:[#allocation2 + $0xf1] sm:$0xff] %vm385_vm0, %v371_v17  ;;  %9035 = vmatmul.mubr.msk.f32.gmra.mxu0 %vm385_vm0, %v10438_v23  ;;  %v10478_v40 = vld [vmem:[#allocation2 + $0x39] sm:$0xff] }
  0x4c   : > { %9087 = vmatmul.mubr.msk.f32.gmra.mxu1 %vm385_vm0, %v10452_v29  ;;  %9037 = vmatprep.mubr.msk.f32.mxu0 %vm385_vm0, %v10454_v30  ;;  %v10480_v41 = vld [vmem:[#allocation2 + $0x38] sm:$0xff]  ;;  %v10485_v45 = vld [vmem:[#allocation2 + $0x49] sm:$0xff]  ;;  %461 = vst.msk [vmem:[#allocation2 + $0xf9] sm:$0xff] %vm385_vm0, %v372_v35  ;;  %462 = vst.msk [vmem:[#allocation2 + $0x109] sm:$0xff] %vm385_vm0, %v373_v36 }
  0x4d   : > { %9089 = vmatprep.mubr.msk.f32.mxu1 %vm385_vm0, %v10456_v31  ;;  %v10487_v46 = vld [vmem:[#allocation2 + $0x48] sm:$0xff]  ;;  %463 = vst.msk [vmem:[#allocation2 + $0x111] sm:$0xff] %vm385_vm0, %v374_v37  ;;  %464 = vst.msk [vmem:[#allocation2 + $0x121] sm:$0xff] %vm385_vm0, %v375_v42  ;;  %v10513_v56 = vld [vmem:[#allocation2 + $0x51] sm:$0xff] }
  0x4e   : > { %465 = vst.msk [vmem:[#allocation2 + $0x129] sm:$0xff] %vm385_vm0, %v376_v43  ;;  %466 = vst.msk [vmem:[#allocation2 + $0x139] sm:$0xff] %vm385_vm0, %v377_v44  ;;  %v10515_v57 = vld [vmem:[#allocation2 + $0x50] sm:$0xff]  ;;  %v10519_v60 = vld [vmem:[#allocation2 + $0x61] sm:$0xff] }
  0x4f   : > { %9038 = vmatmul.mubr.msk.f32.gmra.mxu0 %vm385_vm0, %v10478_v40  ;;  %467 = vst.msk [vmem:[#allocation2 + $0x141] sm:$0xff] %vm385_vm0, %v378_v47  ;;  %v10521_v61 = vld [vmem:[#allocation2 + $0x60] sm:$0xff]  ;;  %468 = vst.msk [vmem:[#allocation2 + $0x151] sm:$0xff] %vm385_vm0, %v379_v53  ;;  %v10536_v62 = vld [vmem:[#allocation2 + $0x69] sm:$0xff] }
  0x50   : > { %9090 = vmatmul.mubr.msk.f32.gmra.mxu1 %vm385_vm0, %v10480_v41  ;;  %9040 = vmatprep.mubr.msk.f32.mxu0 %vm385_vm0, %v10485_v45  ;;  %469 = vst.msk [vmem:[#allocation2 + $0x159] sm:$0xff] %vm385_vm0, %v380_v54  ;;  %470 = vst.msk [vmem:[#allocation2 + $0x169] sm:$0xff] %vm385_vm0, %v381_v55  ;;  %v10538_v63 = vld [vmem:[#allocation2 + $0x68] sm:$0xff]  ;;  %v10540_v0 = vld [vmem:[#allocation2 + $0x79] sm:$0xff] }
  0x51   : > { %9092 = vmatprep.mubr.msk.f32.mxu1 %vm385_vm0, %v10487_v46  ;;  %471 = vst.msk [vmem:[#allocation2 + $0x171] sm:$0xff] %vm385_vm0, %v382_v58  ;;  %472 = vst.msk [vmem:[#allocation2 + $0x181] sm:$0xff] %vm385_vm0, %v383_v59  ;;  %v10542_v1 = vld [vmem:[#allocation2 + $0x78] sm:$0xff]  ;;  %v10552_v2 = vld [vmem:[#allocation2 + $0x81] sm:$0xff] }
  0x52   : > { %13706 = vst [vmem:[#allocation4_spill] sm:$0xff] %v10538_v63  ;;  %13707 = vst [vmem:[#allocation5_spill] sm:$0xff] %v10542_v1  ;;  %v10554_v3 = vld [vmem:[#allocation2 + $0x80] sm:$0xff]  ;;  %v10556_v4 = vld [vmem:[#allocation2 + $0x91] sm:$0xff] }
  0x53   : > { %9041 = vmatmul.mubr.msk.f32.gmra.mxu0 %vm385_vm0, %v10513_v56  ;;  %13708 = vst [vmem:[#allocation6_spill] sm:$0xff] %v10554_v3  ;;  %v10558_v5 = vld [vmem:[#allocation2 + $0x90] sm:$0xff]  ;;  %v10568_v6 = vld [vmem:[#allocation2 + $0x99] sm:$0xff]  ;;  %v10574_v11 = vld [vmem:[#allocation2 + $0xa8] sm:$0xff] }
  0x54   : > { %9093 = vmatmul.mubr.msk.f32.gmra.mxu1 %vm385_vm0, %v10515_v57  ;;  %9043 = vmatprep.mubr.msk.f32.mxu0 %vm385_vm0, %v10519_v60  ;;  %13709 = vst [vmem:[#allocation7_spill] sm:$0xff] %v10558_v5  ;;  %v10570_v9 = vld [vmem:[#allocation2 + $0x98] sm:$0xff]  ;;  %v10572_v10 = vld [vmem:[#allocation2 + $0xa9] sm:$0xff]  ;;  %13711 = vst [vmem:[#allocation9_spill] sm:$0xff] %v10574_v11 }
  0x55   : > { %9095 = vmatprep.mubr.msk.f32.mxu1 %vm385_vm0, %v10521_v61  ;;  %13710 = vst [vmem:[#allocation8_spill] sm:$0xff] %v10570_v9  ;;  %v10584_v12 = vld [vmem:[#allocation2 + $0xb1] sm:$0xff]  ;;  %v10588_v14 = vld [vmem:[#allocation2 + $0xc1] sm:$0xff]  ;;  %v10600_v16 = vld [vmem:[#allocation2 + $0xc9] sm:$0xff] }
  0x56   : > { %v10586_v13 = vld [vmem:[#allocation2 + $0xb0] sm:$0xff]  ;;  %v10590_v15 = vld [vmem:[#allocation2 + $0xc0] sm:$0xff]  ;;  %v10602_v17 = vld [vmem:[#allocation2 + $0xc8] sm:$0xff]  ;;  %473 = vst.msk [vmem:[#allocation2 + $0x189] sm:$0xff] %vm385_vm0, %v384_v34 }
  0x57   : > { %9044 = vmatmul.mubr.msk.f32.gmra.mxu0 %vm385_vm0, %v10536_v62  ;;  %13712 = vst [vmem:[#allocation10_spill] sm:$0xff] %v10586_v13  ;;  %13713 = vst [vmem:[#allocation11_spill] sm:$0xff] %v10590_v15  ;;  %v10604_v18 = vld [vmem:[#allocation2 + $0xd9] sm:$0xff]  ;;  %v10621_v24 = vld [vmem:[#allocation2 + $0xe1] sm:$0xff] }
  0x58   : > { %9096 = vmatmul.mubr.msk.f32.gmra.mxu1 %vm385_vm0, %v10538_v63  ;;  %9046 = vmatprep.mubr.msk.f32.mxu0 %vm385_vm0, %v10540_v0  ;;  %13714 = vst [vmem:[#allocation12_spill] sm:$0xff] %v10602_v17  ;;  %v10606_v19 = vld [vmem:[#allocation2 + $0xd8] sm:$0xff]  ;;  %v10623_v25 = vld [vmem:[#allocation2 + $0xe0] sm:$0xff]  ;;  %v10628_v32 = vld [vmem:[#allocation2 + $0xf0] sm:$0xff] }
  0x59   : > { %9098 = vmatprep.mubr.msk.f32.mxu1 %vm385_vm0, %v10542_v1  ;;  %13715 = vst [vmem:[#allocation13_spill] sm:$0xff] %v10606_v19  ;;  %13716 = vst [vmem:[#allocation14_spill] sm:$0xff] %v10623_v25  ;;  %v10626_v27 = vld [vmem:[#allocation2 + $0xf1] sm:$0xff]  ;;  %v10641_v35 = vld [vmem:[#allocation2 + $0xf9] sm:$0xff] }
  0x5a   : > { %13717 = vst [vmem:[#allocation15_spill] sm:$0xff] %v10628_v32  ;;  %v10643_v36 = vld [vmem:[#allocation2 + $0xf8] sm:$0xff]  ;;  %v10645_v37 = vld [vmem:[#allocation2 + $0x109] sm:$0xff]  ;;  %v10662_v39 = vld [vmem:[#allocation2 + $0x121] sm:$0xff] }
  0x5b   : > { %9047 = vmatmul.mubr.msk.f32.gmra.mxu0 %vm385_vm0, %v10552_v2  ;;  %13718 = vst [vmem:[#allocation16_spill] sm:$0xff] %v10643_v36  ;;  %v10647_v7 = vld [vmem:[#allocation2 + $0x108] sm:$0xff]  ;;  %v10658_v8 = vld [vmem:[#allocation2 + $0x111] sm:$0xff]  ;;  %v10664_v42 = vld [vmem:[#allocation2 + $0x120] sm:$0xff] }
  0x5c   : > { %9099 = vmatmul.mubr.msk.f32.gmra.mxu1 %vm385_vm0, %v10554_v3  ;;  %9049 = vmatprep.mubr.msk.f32.mxu0 %vm385_vm0, %v10556_v4  ;;  %13719 = vst [vmem:[#allocation17_spill] sm:$0xff] %v10647_v7  ;;  %v10660_v38 = vld [vmem:[#allocation2 + $0x110] sm:$0xff]  ;;  %13721 = vst [vmem:[#allocation19_spill] sm:$0xff] %v10664_v42  ;;  %v10676_v44 = vld [vmem:[#allocation2 + $0x128] sm:$0xff] }
  0x5d   : > { %9101 = vmatprep.mubr.msk.f32.mxu1 %vm385_vm0, %v10558_v5  ;;  %13720 = vst [vmem:[#allocation18_spill] sm:$0xff] %v10660_v38  ;;  %v10674_v43 = vld [vmem:[#allocation2 + $0x129] sm:$0xff]  ;;  %13722 = vst [vmem:[#allocation20_spill] sm:$0xff] %v10676_v44  ;;  %v10678_v47 = vld [vmem:[#allocation2 + $0x139] sm:$0xff] }
  0x5e   : > { %v10680_v48 = vld [vmem:[#allocation2 + $0x138] sm:$0xff]  ;;  %v10690_v49 = vld [vmem:[#allocation2 + $0x141] sm:$0xff]  ;;  %v10696_v52 = vld [vmem:[#allocation2 + $0x150] sm:$0xff] }
  0x5f   : > { %9050 = vmatmul.mubr.msk.f32.gmra.mxu0 %vm385_vm0, %v10568_v6  ;;  %13723 = vst [vmem:[#allocation21_spill] sm:$0xff] %v10680_v48  ;;  %v10692_v50 = vld [vmem:[#allocation2 + $0x140] sm:$0xff]  ;;  %v10694_v51 = vld [vmem:[#allocation2 + $0x151] sm:$0xff]  ;;  %13725 = vst [vmem:[#allocation23_spill] sm:$0xff] %v10696_v52 }
  0x60   : > { %9102 = vmatmul.mubr.msk.f32.gmra.mxu1 %vm385_vm0, %v10570_v9  ;;  %9052 = vmatprep.mubr.msk.f32.mxu0 %vm385_vm0, %v10572_v10  ;;  %13724 = vst [vmem:[#allocation22_spill] sm:$0xff] %v10692_v50  ;;  %v10706_v53 = vld [vmem:[#allocation2 + $0x159] sm:$0xff]  ;;  %v10710_v55 = vld [vmem:[#allocation2 + $0x169] sm:$0xff]  ;;  %v10722_v59 = vld [vmem:[#allocation2 + $0x171] sm:$0xff] }
  0x61   : > { %9104 = vmatprep.mubr.msk.f32.mxu1 %vm385_vm0, %v10574_v11  ;;  %13726 = vst [vmem:[#allocation24_spill] sm:$0xff] %v10706_v53  ;;  %v10708_v54 = vld [vmem:[#allocation2 + $0x158] sm:$0xff]  ;;  %13728 = vst [vmem:[#allocation26_spill] sm:$0xff] %v10710_v55  ;;  %v10712_v58 = vld [vmem:[#allocation2 + $0x168] sm:$0xff] }
  0x62   : > { %13727 = vst [vmem:[#allocation25_spill] sm:$0xff] %v10708_v54  ;;  %v10724_v26 = vld [vmem:[#allocation2 + $0x170] sm:$0xff] }
  0x63   : > { %9053 = vmatmul.mubr.msk.f32.gmra.mxu0 %vm385_vm0, %v10584_v12  ;;  %13729 = vst [vmem:[#allocation27_spill] sm:$0xff] %v10724_v26  ;;  %v1186_v34 = vld [vmem:[#allocation2 + $0xa] sm:$0xff] }
  0x64   : > { %9105 = vmatmul.mubr.msk.f32.gmra.mxu1 %vm385_vm0, %v10586_v13  ;;  %9055 = vmatprep.mubr.msk.f32.mxu0 %vm385_vm0, %v10588_v14 }
  0x65   : > { %9107 = vmatprep.mubr.msk.f32.mxu1 %vm385_vm0, %v10590_v15 }
  0x67   : > { %9056 = vmatmul.mubr.msk.f32.gmra.mxu0 %vm385_vm0, %v10600_v16 }
  0x68   : > { %9108 = vmatmul.mubr.msk.f32.gmra.mxu1 %vm385_vm0, %v10602_v17  ;;  %9058 = vmatprep.mubr.msk.f32.mxu0 %vm385_vm0, %v10604_v18 }
  0x69   : > { %9110 = vmatprep.mubr.msk.f32.mxu1 %vm385_vm0, %v10606_v19 }
  0x6b   : > { %9059 = vmatmul.mubr.msk.f32.gmra.mxu0 %vm385_vm0, %v10621_v24 }
  0x6c   : > { %9111 = vmatmul.mubr.msk.f32.gmra.mxu1 %vm385_vm0, %v10623_v25  ;;  %9061 = vmatprep.mubr.msk.f32.mxu0 %vm385_vm0, %v10626_v27 }
  0x6d   : > { %9113 = vmatprep.mubr.msk.f32.mxu1 %vm385_vm0, %v10628_v32 }
  0x6f   : > { %9062 = vmatmul.mubr.msk.f32.gmra.mxu0 %vm385_vm0, %v10641_v35 }
  0x70   : > { %9114 = vmatmul.mubr.msk.f32.gmra.mxu1 %vm385_vm0, %v10643_v36  ;;  %9064 = vmatprep.mubr.msk.f32.mxu0 %vm385_vm0, %v10645_v37 }
  0x71   : > { %9116 = vmatprep.mubr.msk.f32.mxu1 %vm385_vm0, %v10647_v7 }
  0x73   : > { %9065 = vmatmul.mubr.msk.f32.gmra.mxu0 %vm385_vm0, %v10658_v8 }
  0x74   : > { %9117 = vmatmul.mubr.msk.f32.gmra.mxu1 %vm385_vm0, %v10660_v38  ;;  %9067 = vmatprep.mubr.msk.f32.mxu0 %vm385_vm0, %v10662_v39 }
  0x75   : > { %9119 = vmatprep.mubr.msk.f32.mxu1 %vm385_vm0, %v10664_v42 }
  0x77   : > { %9068 = vmatmul.mubr.msk.f32.gmra.mxu0 %vm385_vm0, %v10674_v43 }
  0x78   : > { %9120 = vmatmul.mubr.msk.f32.gmra.mxu1 %vm385_vm0, %v10676_v44  ;;  %9070 = vmatprep.mubr.msk.f32.mxu0 %vm385_vm0, %v10678_v47 }
  0x79   : > { %9122 = vmatprep.mubr.msk.f32.mxu1 %vm385_vm0, %v10680_v48 }
  0x7b   : > { %9071 = vmatmul.mubr.msk.f32.gmra.mxu0 %vm385_vm0, %v10690_v49 }
  0x7c   : > { %9123 = vmatmul.mubr.msk.f32.gmra.mxu1 %vm385_vm0, %v10692_v50  ;;  %9073 = vmatprep.mubr.msk.f32.mxu0 %vm385_vm0, %v10694_v51 }
  0x7d   : > { %9125 = vmatprep.mubr.msk.f32.mxu1 %vm385_vm0, %v10696_v52 }
  0x7f   : > { %9074 = vmatmul.mubr.msk.f32.gmra.mxu0 %vm385_vm0, %v10706_v53  ;;  %v7932_v53 = vld [vmem:[%s13650_s2 + $0x40] sm:$0xff] }
  0x80   : > { %9126 = vmatmul.mubr.msk.f32.gmra.mxu1 %vm385_vm0, %v10708_v54  ;;  %9076 = vmatprep.mubr.msk.f32.mxu0 %vm385_vm0, %v10710_v55  ;;  %v10733_v55 = vld [vmem:[#allocation2 + $0x1a] sm:$0xff] }
  0x81   : > { %9128 = vmatprep.mubr.msk.f32.mxu1 %vm385_vm0, %v10712_v58 }
  0x83   : > { %9077 = vmatmul.mubr.msk.f32.gmra.mxu0 %vm385_vm0, %v10722_v59 }
  0x84   : > { %9129 = vmatmul.mubr.msk.f32.gmra.mxu1 %vm385_vm0, %v10724_v26  ;;  %9135 = vmatprep.mubr.msk.f32.mxu0 %vm385_vm0, %v1185_v33  ;;  %v10744_v33 = vld [vmem:[#allocation2 + $0x22] sm:$0xff] }
  0x85   : > { %9187 = vmatprep.mubr.msk.f32.mxu1 %vm385_vm0, %v10436_v22  ;;  %v10748_v22 = vld [vmem:[#allocation2 + $0x32] sm:$0xff] }
  0x87   : > { %9136 = vmatmul.mubr.msk.f32.vlgmr.msra.gmra.mxu0 %vm385_vm0, %v1186_v34  ;;  %v10800_v34 = vld [vmem:[#allocation2 + $0x7a] sm:$0xff] }
  0x88   : > { %9188 = vmatmul.mubr.msk.f32.vlgmr.msra.gmra.mxu1 %vm385_vm0, %v10452_v29  ;;  %9236 = vmatpush3.msra.mxu0 %v10363_v28  ;;  %v10754_v29 = vld [vmem:[%s13650_s2 + $0x68] sm:$0xff]  ;;  %v7966_v28 = vld [vmem:[%s13650_s2 + $0x50] sm:$0xff] }
  0x89   : > { %9138 = vmatprep.mubr.msk.f32.mxu0 %vm385_vm0, %v10733_v55  ;;  %9190 = vmatprep.mubr.msk.f32.mxu1 %vm385_vm0, %v10456_v31  ;;  %v10765_v31 = vld [vmem:[#allocation2 + $0x3a] sm:$0xff] }
  0x8a   : > { %9237 = vmatprep.subr.mxu0 %v7932_v53  ;;  %9288 = vmatpush3.msra.mxu1 %v10615_v20  ;;  %v10769_v20 = vld [vmem:[#allocation2 + $0x4a] sm:$0xff] }
  0x8b   : > { %9238 = vmatpush3.msra.mxu0 %v7932_v53  ;;  %9289 = vmatprep.subr.mxu1 %v7966_v28  ;;  %v10775_v53 = vld [vmem:[%s13650_s2 + $0x78] sm:$0xff] }
  0x8c   : > { %9139 = vmatmul.mubr.msk.f32.gmra.mxu0 %vm385_vm0, %v10744_v33  ;;  %9191 = vmatmul.mubr.msk.f32.gmra.mxu1 %vm385_vm0, %v10480_v41  ;;  %v10783_v41 = vld [vmem:[#allocation2 + $0x52] sm:$0xff] }
  0x8d   : > { %9141 = vmatprep.mubr.msk.f32.mxu0 %vm385_vm0, %v10748_v22  ;;  %9193 = vmatprep.mubr.msk.f32.mxu1 %vm385_vm0, %v10487_v46  ;;  %v10787_v46 = vld [vmem:[#allocation2 + $0x62] sm:$0xff] }
  0x8e   : > { %9339 = vmatprep.subr.mxu0 %v10754_v29  ;;  %9290 = vmatpush3.msra.mxu1 %v7966_v28  ;;  %v10812_v28 = vld [vmem:[#allocation2 + $0x92] sm:$0xff] }
  0x8f   : > { %9391 = vmatprep.subr.mxu1 %v10775_v53 }
  0x90   : > { %9142 = vmatmul.mubr.msk.f32.gmra.mxu0 %vm385_vm0, %v10765_v31  ;;  %9194 = vmatmul.mubr.msk.f32.gmra.mxu1 %vm385_vm0, %v10515_v57  ;;  %v10796_v57 = vld [vmem:[#allocation2 + $0x6a] sm:$0xff] }
  0x91   : > { %9144 = vmatprep.mubr.msk.f32.mxu0 %vm385_vm0, %v10769_v20  ;;  %9196 = vmatprep.mubr.msk.f32.mxu1 %vm385_vm0, %v10521_v61  ;;  %v10808_v61 = vld [vmem:[#allocation2 + $0x82] sm:$0xff] }
  0x94   : > { %9145 = vmatmul.mubr.msk.f32.gmra.mxu0 %vm385_vm0, %v10783_v41  ;;  %9197 = vmatmul.mubr.msk.f32.gmra.mxu1 %vm385_vm0, %v10538_v63  ;;  %v10922_v63 = vld [vmem:[#allocation2 + $0x180] sm:$0xff] }
  0x95   : > { %9147 = vmatprep.mubr.msk.f32.mxu0 %vm385_vm0, %v10787_v46  ;;  %9199 = vmatprep.mubr.msk.f32.mxu1 %vm385_vm0, %v10542_v1  ;;  %v10824_v1 = vld [vmem:[#allocation2 + $0xaa] sm:$0xff] }
  0x98   : > { %9148 = vmatmul.mubr.msk.f32.gmra.mxu0 %vm385_vm0, %v10796_v57  ;;  %9200 = vmatmul.mubr.msk.f32.gmra.mxu1 %vm385_vm0, %v10554_v3  ;;  %v10820_v3 = vld [vmem:[#allocation2 + $0x9a] sm:$0xff] }
  0x99   : > { %9150 = vmatprep.mubr.msk.f32.mxu0 %vm385_vm0, %v10800_v34  ;;  %9202 = vmatprep.mubr.msk.f32.mxu1 %vm385_vm0, %v10558_v5  ;;  %v10836_v5 = vld [vmem:[#allocation2 + $0xc2] sm:$0xff] }
  0x9c   : > { %9151 = vmatmul.mubr.msk.f32.gmra.mxu0 %vm385_vm0, %v10808_v61  ;;  %9203 = vmatmul.mubr.msk.f32.gmra.mxu1 %vm385_vm0, %v10570_v9  ;;  %v10832_v9 = vld [vmem:[#allocation2 + $0xb2] sm:$0xff] }
  0x9d   : > { %9153 = vmatprep.mubr.msk.f32.mxu0 %vm385_vm0, %v10812_v28  ;;  %9205 = vmatprep.mubr.msk.f32.mxu1 %vm385_vm0, %v10574_v11  ;;  %v10848_v11 = vld [vmem:[#allocation2 + $0xda] sm:$0xff] }
  0xa0   : > { %9154 = vmatmul.mubr.msk.f32.gmra.mxu0 %vm385_vm0, %v10820_v3  ;;  %9206 = vmatmul.mubr.msk.f32.gmra.mxu1 %vm385_vm0, %v10586_v13  ;;  %v10844_v13 = vld [vmem:[#allocation2 + $0xca] sm:$0xff] }
  0xa1   : > { %9156 = vmatprep.mubr.msk.f32.mxu0 %vm385_vm0, %v10824_v1  ;;  %9208 = vmatprep.mubr.msk.f32.mxu1 %vm385_vm0, %v10590_v15  ;;  %v10860_v15 = vld [vmem:[#allocation2 + $0xf2] sm:$0xff] }
  0xa4   : > { %9157 = vmatmul.mubr.msk.f32.gmra.mxu0 %vm385_vm0, %v10832_v9  ;;  %9209 = vmatmul.mubr.msk.f32.gmra.mxu1 %vm385_vm0, %v10602_v17  ;;  %v10856_v17 = vld [vmem:[#allocation2 + $0xe2] sm:$0xff] }
  0xa5   : > { %9159 = vmatprep.mubr.msk.f32.mxu0 %vm385_vm0, %v10836_v5  ;;  %9211 = vmatprep.mubr.msk.f32.mxu1 %vm385_vm0, %v10606_v19  ;;  %v10872_v19 = vld [vmem:[#allocation2 + $0x10a] sm:$0xff] }
  0xa8   : > { %9160 = vmatmul.mubr.msk.f32.gmra.mxu0 %vm385_vm0, %v10844_v13  ;;  %9212 = vmatmul.mubr.msk.f32.gmra.mxu1 %vm385_vm0, %v10623_v25  ;;  %v10868_v25 = vld [vmem:[#allocation2 + $0xfa] sm:$0xff] }
  0xa9   : > { %9162 = vmatprep.mubr.msk.f32.mxu0 %vm385_vm0, %v10848_v11  ;;  %9214 = vmatprep.mubr.msk.f32.mxu1 %vm385_vm0, %v10628_v32  ;;  %v10884_v32 = vld [vmem:[#allocation2 + $0x122] sm:$0xff] }
  0xac   : > { %9163 = vmatmul.mubr.msk.f32.gmra.mxu0 %vm385_vm0, %v10856_v17  ;;  %9215 = vmatmul.mubr.msk.f32.gmra.mxu1 %vm385_vm0, %v10643_v36  ;;  %v10880_v36 = vld [vmem:[#allocation2 + $0x112] sm:$0xff] }
  0xad   : > { %9165 = vmatprep.mubr.msk.f32.mxu0 %vm385_vm0, %v10860_v15  ;;  %9217 = vmatprep.mubr.msk.f32.mxu1 %vm385_vm0, %v10647_v7  ;;  %v10896_v7 = vld [vmem:[#allocation2 + $0x13a] sm:$0xff] }
  0xb0   : > { %9166 = vmatmul.mubr.msk.f32.gmra.mxu0 %vm385_vm0, %v10868_v25  ;;  %9218 = vmatmul.mubr.msk.f32.gmra.mxu1 %vm385_vm0, %v10660_v38  ;;  %v10892_v38 = vld [vmem:[#allocation2 + $0x12a] sm:$0xff] }
  0xb1   : > { %9168 = vmatprep.mubr.msk.f32.mxu0 %vm385_vm0, %v10872_v19  ;;  %9220 = vmatprep.mubr.msk.f32.mxu1 %vm385_vm0, %v10664_v42  ;;  %v10908_v42 = vld [vmem:[#allocation2 + $0x152] sm:$0xff] }
  0xb4   : > { %9169 = vmatmul.mubr.msk.f32.gmra.mxu0 %vm385_vm0, %v10880_v36  ;;  %9221 = vmatmul.mubr.msk.f32.gmra.mxu1 %vm385_vm0, %v10676_v44  ;;  %v10904_v44 = vld [vmem:[#allocation2 + $0x142] sm:$0xff] }
  0xb5   : > { %9171 = vmatprep.mubr.msk.f32.mxu0 %vm385_vm0, %v10884_v32  ;;  %9223 = vmatprep.mubr.msk.f32.mxu1 %vm385_vm0, %v10680_v48  ;;  %v10920_v48 = vld [vmem:[#allocation2 + $0x16a] sm:$0xff] }
  0xb8   : > { %9172 = vmatmul.mubr.msk.f32.gmra.mxu0 %vm385_vm0, %v10892_v38  ;;  %9224 = vmatmul.mubr.msk.f32.gmra.mxu1 %vm385_vm0, %v10692_v50  ;;  %v10916_v50 = vld [vmem:[#allocation2 + $0x15a] sm:$0xff] }
  0xb9   : > { %9174 = vmatprep.mubr.msk.f32.mxu0 %vm385_vm0, %v10896_v7  ;;  %9226 = vmatprep.mubr.msk.f32.mxu1 %vm385_vm0, %v10696_v52  ;;  %v10934_v52 = vld [vmem:[#allocation2 + $0x188] sm:$0xff] }
  0xbc   : > { %9175 = vmatmul.mubr.msk.f32.gmra.mxu0 %vm385_vm0, %v10904_v44  ;;  %9227 = vmatmul.mubr.msk.f32.gmra.mxu1 %vm385_vm0, %v10708_v54  ;;  %v10930_v54 = vld [vmem:[#allocation2 + $0x172] sm:$0xff] }
  0xbd   : > { %9177 = vmatprep.mubr.msk.f32.mxu0 %vm385_vm0, %v10908_v42  ;;  %9229 = vmatprep.mubr.msk.f32.mxu1 %vm385_vm0, %v10712_v58 }
  0xc0   : > { %9178 = vmatmul.mubr.msk.f32.gmra.mxu0 %vm385_vm0, %v10916_v50  ;;  %9230 = vmatmul.mubr.msk.f32.gmra.mxu1 %vm385_vm0, %v10724_v26  ;;  %v8000_v26 = vld [vmem:[%s13650_s2 + $0x60] sm:$0xff] }
  0xc1   : > { %9180 = vmatprep.mubr.msk.f32.mxu0 %vm385_vm0, %v10920_v48  ;;  %9232 = vmatprep.mubr.msk.f32.mxu1 %vm385_vm0, %v10922_v63 }
  0xc4   : > { %9181 = vmatmul.mubr.msk.f32.gmra.mxu0 %vm385_vm0, %v10930_v54  ;;  %9233 = vmatmul.mubr.msk.f32.gmra.mxu1 %vm385_vm0, %v10934_v52 }
  0xc5   : > { %9239 = vmatprep.mubr.msk.f32.mxu0 %vm385_vm0, %v10434_v21  ;;  %9291 = vmatprep.mubr.msk.f32.mxu1 %vm385_vm0, %v10733_v55  ;;  %v10960_v21 = vld [vmem:[%s13650_s2 + $0x88] sm:$0xff] }
  0xc8   : > { %9240 = vmatmul.mubr.msk.f32.vlgmr.msra.gmra.mxu0 %vm385_vm0, %v10438_v23  ;;  %9292 = vmatmul.mubr.msk.f32.vlgmr.msra.gmra.mxu1 %vm385_vm0, %v10744_v33  ;;  %v8034_v23 = vld [vmem:[%s13650_s2 + $0x70] sm:$0xff] }
  0xc9   : > { %9340 = vmatpush3.msra.mxu0 %v10754_v29  ;;  %9242 = vmatprep.mubr.msk.f32.mxu0 %vm385_vm0, %v10454_v30  ;;  %v13730_v30 = vld [vmem:[#allocation24_spill] sm:$0xff]  ;;  %v13733_v29 = vld [vmem:[#allocation5_spill] sm:$0xff] }
  0xca   : > { %9294 = vmatprep.mubr.msk.f32.mxu1 %vm385_vm0, %v10748_v22  ;;  %9341 = vmatprep.subr.mxu0 %v8000_v26 }
  0xcb   : > { %9342 = vmatpush3.msra.mxu0 %v8000_v26  ;;  %9392 = vmatpush3.msra.mxu1 %v10775_v53  ;;  %v13732_v26 = vld [vmem:[#allocation4_spill] sm:$0xff] }
  0xcc   : > { %9243 = vmatmul.mubr.msk.f32.gmra.mxu0 %vm385_vm0, %v10478_v40  ;;  %9295 = vmatmul.mubr.msk.f32.gmra.mxu1 %vm385_vm0, %v10765_v31  ;;  %v13731_v40 = vld [vmem:[#allocation26_spill] sm:$0xff]  ;;  %v3133_v53 = vld [vmem:[#allocation2 + $0x81] sm:$0xff] }
  0xcd   : > { %9245 = vmatprep.mubr.msk.f32.mxu0 %vm385_vm0, %v10485_v45  ;;  %9297 = vmatprep.mubr.msk.f32.mxu1 %vm385_vm0, %v10769_v20  ;;  %v11070_v45 = vld [vmem:[#allocation2 + $0x181] sm:$0xff] }
  0xce   : > { %9443 = vmatprep.subr.mxu0 %v10960_v21  ;;  %9393 = vmatprep.subr.mxu1 %v8034_v23 }
  0xcf   : > { %9394 = vmatpush3.msra.mxu1 %v8034_v23 }
  0xd0   : > { %9246 = vmatmul.mubr.msk.f32.gmra.mxu0 %vm385_vm0, %v10513_v56  ;;  %9298 = vmatmul.mubr.msk.f32.gmra.mxu1 %vm385_vm0, %v10783_v41  ;;  %v11072_v56 = vld [vmem:[#allocation2 + $0x182] sm:$0xff] }
  0xd1   : > { %9248 = vmatprep.mubr.msk.f32.mxu0 %vm385_vm0, %v10519_v60  ;;  %9300 = vmatprep.mubr.msk.f32.mxu1 %vm385_vm0, %v10787_v46  ;;  %v11080_v60 = vld [vmem:[#allocation2 + $0x189] sm:$0xff] }
  0xd4   : > { %9249 = vmatmul.mubr.msk.f32.gmra.mxu0 %vm385_vm0, %v10536_v62  ;;  %9301 = vmatmul.mubr.msk.f32.gmra.mxu1 %vm385_vm0, %v10796_v57 }
  0xd5   : > { %9251 = vmatprep.mubr.msk.f32.mxu0 %vm385_vm0, %v10540_v0  ;;  %9303 = vmatprep.mubr.msk.f32.mxu1 %vm385_vm0, %v10800_v34 }
  0xd6   : > { %v9085_v0 = vpop.f32.mrf.mxu1 }
  0xd8   : > { %9252 = vmatmul.mubr.msk.f32.gmra.mxu0 %vm385_vm0, %v10552_v2  ;;  %9304 = vmatmul.mubr.msk.f32.gmra.mxu1 %vm385_vm0, %v10808_v61 }
  0xd9   : > { %9254 = vmatprep.mubr.msk.f32.mxu0 %vm385_vm0, %v10556_v4  ;;  %9306 = vmatprep.mubr.msk.f32.mxu1 %vm385_vm0, %v10812_v28  ;;  %v3126_v4 = vld [vmem:[#allocation2 + $0x31] sm:$0xff] }
  0xdc   : > { %9255 = vmatmul.mubr.msk.f32.gmra.mxu0 %vm385_vm0, %v10568_v6  ;;  %9307 = vmatmul.mubr.msk.f32.gmra.mxu1 %vm385_vm0, %v10820_v3  ;;  %v2738_v3 = vld [vmem:[#allocation2 + $0x30] sm:$0xff]  ;;  %v1026_v6 = vpop.f32.mrf.mxu1 }
  0xdd   : > { %9257 = vmatprep.mubr.msk.f32.mxu0 %vm385_vm0, %v10572_v10  ;;  %9309 = vmatprep.mubr.msk.f32.mxu1 %vm385_vm0, %v10824_v1  ;;  %v11084_v1 = vld [vmem:[#allocation2 + $0x18a] sm:$0xff]  ;;  %v2739_v10 = vld [vmem:[#allocation2 + $0x38] sm:$0xff] }
  0xe0   : > { %9258 = vmatmul.mubr.msk.f32.gmra.mxu0 %vm385_vm0, %v10584_v12  ;;  %9310 = vmatmul.mubr.msk.f32.gmra.mxu1 %vm385_vm0, %v10832_v9  ;;  %v2740_v12 = vld [vmem:[#allocation2 + $0x48] sm:$0xff] }
  0xe1   : > { %9260 = vmatprep.mubr.msk.f32.mxu0 %vm385_vm0, %v10588_v14  ;;  %9312 = vmatprep.mubr.msk.f32.mxu1 %vm385_vm0, %v10836_v5  ;;  %v8068_v14 = vld [vmem:[%s13650_s2 + $0x80] sm:$0xff] }
  0xe4   : > { %9261 = vmatmul.mubr.msk.f32.gmra.mxu0 %vm385_vm0, %v10600_v16  ;;  %9313 = vmatmul.mubr.msk.f32.gmra.mxu1 %vm385_vm0, %v10844_v13  ;;  %v3128_v13 = vld [vmem:[#allocation2 + $0x49] sm:$0xff] }
  0xe5   : > { %9263 = vmatprep.mubr.msk.f32.mxu0 %vm385_vm0, %v10604_v18  ;;  %9315 = vmatprep.mubr.msk.f32.mxu1 %vm385_vm0, %v10848_v11  ;;  %v3127_v11 = vld [vmem:[#allocation2 + $0x39] sm:$0xff] }
  0xe8   : > { %9264 = vmatmul.mubr.msk.f32.gmra.mxu0 %vm385_vm0, %v10621_v24  ;;  %9316 = vmatmul.mubr.msk.f32.gmra.mxu1 %vm385_vm0, %v10856_v17  ;;  %v3129_v17 = vld [vmem:[#allocation2 + $0x51] sm:$0xff] }
  0xe9   : > { %9266 = vmatprep.mubr.msk.f32.mxu0 %vm385_vm0, %v10626_v27  ;;  %9318 = vmatprep.mubr.msk.f32.mxu1 %vm385_vm0, %v10860_v15  ;;  %v2741_v15 = vld [vmem:[#allocation2 + $0x50] sm:$0xff] }
  0xec   : > { %9267 = vmatmul.mubr.msk.f32.gmra.mxu0 %vm385_vm0, %v10641_v35  ;;  %9319 = vmatmul.mubr.msk.f32.gmra.mxu1 %vm385_vm0, %v10868_v25  ;;  %v3130_v25 = vld [vmem:[#allocation2 + $0x61] sm:$0xff] }
  0xed   : > { %9269 = vmatprep.mubr.msk.f32.mxu0 %vm385_vm0, %v10645_v37  ;;  %9321 = vmatprep.mubr.msk.f32.mxu1 %vm385_vm0, %v10872_v19  ;;  %v2742_v19 = vld [vmem:[#allocation2 + $0x60] sm:$0xff] }
  0xf0   : > { %9270 = vmatmul.mubr.msk.f32.gmra.mxu0 %vm385_vm0, %v10658_v8  ;;  %9322 = vmatmul.mubr.msk.f32.gmra.mxu1 %vm385_vm0, %v10880_v36 }
  0xf1   : > { %9272 = vmatprep.mubr.msk.f32.mxu0 %vm385_vm0, %v10662_v39  ;;  %9324 = vmatprep.mubr.msk.f32.mxu1 %vm385_vm0, %v10884_v32 }
  0xf4   : > { %9273 = vmatmul.mubr.msk.f32.gmra.mxu0 %vm385_vm0, %v10674_v43  ;;  %9325 = vmatmul.mubr.msk.f32.gmra.mxu1 %vm385_vm0, %v10892_v38  ;;  %v3131_v38 = vld [vmem:[#allocation2 + $0x69] sm:$0xff] }
  0xf5   : > { %9275 = vmatprep.mubr.msk.f32.mxu0 %vm385_vm0, %v10678_v47  ;;  %9327 = vmatprep.mubr.msk.f32.mxu1 %vm385_vm0, %v10896_v7 }
  0xf8   : > { %9276 = vmatmul.mubr.msk.f32.gmra.mxu0 %vm385_vm0, %v10690_v49  ;;  %9328 = vmatmul.mubr.msk.f32.gmra.mxu1 %vm385_vm0, %v10904_v44  ;;  %v9033_v62 = vpop.f32.mrf.mxu0 }
  0xf9   : > { %9278 = vmatprep.mubr.msk.f32.mxu0 %vm385_vm0, %v10694_v51  ;;  %9330 = vmatprep.mubr.msk.f32.mxu1 %vm385_vm0, %v10908_v42  ;;  %v11086_v2 = vadd.f32 %v9085_v0, %v9033_v62 }
  0xfa   : > { %v705_v5 = vpop.f32.mrf.mxu0 }
  0xfb   : > { %v11092_v9 = vadd.f32 %v1026_v6, %v705_v5  ;;  %v13735_v5 = vld [vmem:[#allocation7_spill] sm:$0xff] }
  0xfc   : > { %9279 = vmatmul.mubr.msk.f32.gmra.mxu0 %vm385_vm0, %v13730_v30  ;;  %9331 = vmatmul.mubr.msk.f32.gmra.mxu1 %vm385_vm0, %v10916_v50  ;;  %v3135_v6 = vld [vmem:[#allocation2 + $0x99] sm:$0xff] }
  0xfd   : > { %9281 = vmatprep.mubr.msk.f32.mxu0 %vm385_vm0, %v13731_v40  ;;  %9333 = vmatprep.mubr.msk.f32.mxu1 %vm385_vm0, %v10920_v48  ;;  %v3132_v48 = vld [vmem:[#allocation2 + $0x79] sm:$0xff] }
 0x100   : > { %9282 = vmatmul.mubr.msk.f32.gmra.mxu0 %vm385_vm0, %v10722_v59  ;;  %9334 = vmatmul.mubr.msk.f32.gmra.mxu1 %vm385_vm0, %v10930_v54 }
 0x101   : > { %9284 = vmatprep.mubr.msk.f32.mxu0 %vm385_vm0, %v11070_v45  ;;  %9336 = vmatprep.mubr.msk.f32.mxu1 %vm385_vm0, %v11072_v56 }
 0x104   : > { %9285 = vmatmul.mubr.msk.f32.gmra.mxu0 %vm385_vm0, %v11080_v60  ;;  %9337 = vmatmul.mubr.msk.f32.gmra.mxu1 %vm385_vm0, %v11084_v1 }
 0x105   : > { %9343 = vmatprep.mubr.msk.f32.mxu0 %vm385_vm0, %v2738_v3  ;;  %9395 = vmatprep.mubr.msk.f32.mxu1 %vm385_vm0, %v3126_v4  ;;  %v13734_v3 = vld [vmem:[#allocation6_spill] sm:$0xff] }
 0x108   : > { %9344 = vmatmul.mubr.msk.f32.vlgmr.msra.gmra.mxu0 %vm385_vm0, %v2739_v10  ;;  %9396 = vmatmul.mubr.msk.f32.vlgmr.msra.gmra.mxu1 %vm385_vm0, %v3127_v11 }
 0x109   : > { %9444 = vmatpush3.msra.mxu0 %v10960_v21  ;;  %9346 = vmatprep.mubr.msk.f32.mxu0 %vm385_vm0, %v2740_v12  ;;  %v3134_v21 = vld [vmem:[#allocation2 + $0x91] sm:$0xff]  ;;  %v3136_v12 = vld [vmem:[#allocation2 + $0xa9] sm:$0xff] }
 0x10a   : > { %9398 = vmatprep.mubr.msk.f32.mxu1 %vm385_vm0, %v3128_v13  ;;  %9445 = vmatprep.subr.mxu0 %v8068_v14 }
 0x10b   : > { %9446 = vmatpush3.msra.mxu0 %v8068_v14  ;;  %v9036_v32 = vpop.f32.mrf.mxu0 }
 0x10c   : > { %v9088_v36 = vpop.f32.mrf.mxu1  ;;  %9347 = vmatmul.mubr.msk.f32.gmra.mxu0 %vm385_vm0, %v2741_v15  ;;  %9399 = vmatmul.mubr.msk.f32.gmra.mxu1 %vm385_vm0, %v3129_v17  ;;  %v13736_v17 = vld [vmem:[#allocation8_spill] sm:$0xff] }
 0x10d   : > { %v11106_v7 = vadd.f32 %v9088_v36, %v9036_v32  ;;  %9349 = vmatprep.mubr.msk.f32.mxu0 %vm385_vm0, %v2742_v19  ;;  %9401 = vmatprep.mubr.msk.f32.mxu1 %vm385_vm0, %v3130_v25  ;;  %v715_v42 = vpop.f32.mrf.mxu0  ;;  %v13737_v25 = vld [vmem:[#allocation9_spill] sm:$0xff]  ;;  %v3137_v32 = vld [vmem:[#allocation2 + $0xb1] sm:$0xff] }
 0x10e   : > { %v1036_v44 = vpop.f32.mrf.mxu1 }
 0x10f   : > { %v11110_v50 = vadd.f32 %v1036_v44, %v715_v42  ;;  %v9039_v54 = vpop.f32.mrf.mxu0  ;;  %v3138_v42 = vld [vmem:[#allocation2 + $0xc1] sm:$0xff] }
 0x110   : > { %v9091_v55 = vpop.f32.mrf.mxu1  ;;  %9350 = vmatmul.mubr.msk.f32.gmra.mxu0 %vm385_vm0, %v13732_v26  ;;  %9402 = vmatmul.mubr.msk.f32.gmra.mxu1 %vm385_vm0, %v3131_v38 }
 0x111   : > { %v11115_v33 = vadd.f32 %v9091_v55, %v9039_v54  ;;  %9352 = vmatprep.mubr.msk.f32.mxu0 %vm385_vm0, %v13733_v29  ;;  %9404 = vmatprep.mubr.msk.f32.mxu1 %vm385_vm0, %v3132_v48  ;;  %v725_v61 = vpop.f32.mrf.mxu0  ;;  %v13738_v55 = vld [vmem:[#allocation10_spill] sm:$0xff]  ;;  %v13739_v29 = vld [vmem:[#allocation11_spill] sm:$0xff] }
 0x112   : > { %v1046_v28 = vpop.f32.mrf.mxu1 }
 0x113   : > { %v11120_v23 = vadd.f32 %v1046_v28, %v725_v61  ;;  %v9042_v62 = vpop.f32.mrf.mxu0 }
 0x114   : > { %v9094_v0 = vpop.f32.mrf.mxu1  ;;  %9353 = vmatmul.mubr.msk.f32.gmra.mxu0 %vm385_vm0, %v13734_v3  ;;  %9405 = vmatmul.mubr.msk.f32.gmra.mxu1 %vm385_vm0, %v3133_v53 }
 0x115   : > { %v11125_v4 = vadd.f32 %v9094_v0, %v9042_v62  ;;  %9355 = vmatprep.mubr.msk.f32.mxu0 %vm385_vm0, %v13735_v5  ;;  %9407 = vmatprep.mubr.msk.f32.mxu1 %vm385_vm0, %v3134_v21  ;;  %v735_v10 = vpop.f32.mrf.mxu0  ;;  %v13740_v0 = vld [vmem:[#allocation12_spill] sm:$0xff]  ;;  %v13741_v5 = vld [vmem:[#allocation13_spill] sm:$0xff] }
 0x116   : > { %v1056_v11 = vpop.f32.mrf.mxu1 }
 0x117   : > { %v11130_v13 = vadd.f32 %v1056_v11, %v735_v10  ;;  %v9045_v14 = vpop.f32.mrf.mxu0 }
 0x118   : > { %v9097_v15 = vpop.f32.mrf.mxu1  ;;  %9356 = vmatmul.mubr.msk.f32.gmra.mxu0 %vm385_vm0, %v13736_v17  ;;  %9408 = vmatmul.mubr.msk.f32.gmra.mxu1 %vm385_vm0, %v3135_v6  ;;  %v13743_v17 = vld [vmem:[#allocation15_spill] sm:$0xff] }
 0x119   : > { %v11135_v19 = vadd.f32 %v9097_v15, %v9045_v14  ;;  %9358 = vmatprep.mubr.msk.f32.mxu0 %vm385_vm0, %v13737_v25  ;;  %9410 = vmatprep.mubr.msk.f32.mxu1 %vm385_vm0, %v3136_v12  ;;  %v745_v36 = vpop.f32.mrf.mxu0  ;;  %v13742_v15 = vld [vmem:[#allocation14_spill] sm:$0xff] }
 0x11a   : > { %v1066_v38 = vpop.f32.mrf.mxu1 }
 0x11b   : > { %v11140_v44 = vadd.f32 %v1066_v38, %v745_v36  ;;  %v9048_v48 = vpop.f32.mrf.mxu0 }
 0x11c   : > { %v9100_v54 = vpop.f32.mrf.mxu1  ;;  %9359 = vmatmul.mubr.msk.f32.gmra.mxu0 %vm385_vm0, %v13738_v55  ;;  %9411 = vmatmul.mubr.msk.f32.gmra.mxu1 %vm385_vm0, %v3137_v32 }
 0x11d   : > { %v11145_v26 = vadd.f32 %v9100_v54, %v9048_v48  ;;  %9361 = vmatprep.mubr.msk.f32.mxu0 %vm385_vm0, %v13739_v29  ;;  %9413 = vmatprep.mubr.msk.f32.mxu1 %vm385_vm0, %v3138_v42  ;;  %v755_v53 = vpop.f32.mrf.mxu0  ;;  %v13744_v42 = vld [vmem:[#allocation16_spill] sm:$0xff]  ;;  %v13745_v48 = vld [vmem:[#allocation17_spill] sm:$0xff] }
 0x11e   : > { %v1076_v61 = vpop.f32.mrf.mxu1 }
 0x11f   : > { %v11150_v28 = vadd.f32 %v1076_v61, %v755_v53  ;;  %v9051_v21 = vpop.f32.mrf.mxu0  ;;  %v13746_v53 = vld [vmem:[#allocation18_spill] sm:$0xff]  ;;  %v13747_v61 = vld [vmem:[#allocation19_spill] sm:$0xff] }
 0x120   : > { %v9103_v62 = vpop.f32.mrf.mxu1  ;;  %9362 = vmatmul.mubr.msk.f32.gmra.mxu0 %vm385_vm0, %v13740_v0  ;;  %9414 = vmatmul.mubr.msk.f32.gmra.mxu1 %vm385_vm0, %v10600_v16 }
 0x121   : > { %v11156_v3 = vadd.f32 %v9103_v62, %v9051_v21  ;;  %9364 = vmatprep.mubr.msk.f32.mxu0 %vm385_vm0, %v13741_v5  ;;  %9416 = vmatprep.mubr.msk.f32.mxu1 %vm385_vm0, %v10604_v18  ;;  %v765_v6 = vpop.f32.mrf.mxu0  ;;  %v13748_v5 = vld [vmem:[#allocation20_spill] sm:$0xff] }
 0x122   : > { %v1086_v10 = vpop.f32.mrf.mxu1 }
 0x123   : > { %v11162_v11 = vadd.f32 %v1086_v10, %v765_v6  ;;  %v9054_v12 = vpop.f32.mrf.mxu0  ;;  %v13749_v6 = vld [vmem:[#allocation21_spill] sm:$0xff] }
 0x124   : > { %v9106_v14 = vpop.f32.mrf.mxu1  ;;  %9365 = vmatmul.mubr.msk.f32.gmra.mxu0 %vm385_vm0, %v13742_v15  ;;  %9417 = vmatmul.mubr.msk.f32.gmra.mxu1 %vm385_vm0, %v10621_v24  ;;  %v13750_v15 = vld [vmem:[#allocation22_spill] sm:$0xff] }
 0x125   : > { %v11168_v16 = vadd.f32 %v9106_v14, %v9054_v12  ;;  %9367 = vmatprep.mubr.msk.f32.mxu0 %vm385_vm0, %v13743_v17  ;;  %9419 = vmatprep.mubr.msk.f32.mxu1 %vm385_vm0, %v10626_v27  ;;  %v775_v18 = vpop.f32.mrf.mxu0  ;;  %v13751_v17 = vld [vmem:[#allocation23_spill] sm:$0xff] }
 0x126   : > { %v1096_v25 = vpop.f32.mrf.mxu1 }
 0x127   : > { %v11174_v32 = vadd.f32 %v1096_v25, %v775_v18  ;;  %v9057_v36 = vpop.f32.mrf.mxu0 }
 0x128   : > { %v9109_v38 = vpop.f32.mrf.mxu1  ;;  %9368 = vmatmul.mubr.msk.f32.gmra.mxu0 %vm385_vm0, %v13744_v42  ;;  %9420 = vmatmul.mubr.msk.f32.gmra.mxu1 %vm385_vm0, %v10641_v35 }
 0x129   : > { %v11180_v24 = vadd.f32 %v9109_v38, %v9057_v36  ;;  %9370 = vmatprep.mubr.msk.f32.mxu0 %vm385_vm0, %v13745_v48  ;;  %9422 = vmatprep.mubr.msk.f32.mxu1 %vm385_vm0, %v10645_v37  ;;  %v11186_v27 = vpop.f32.mrf.mxu0  ;;  %v13752_v38 = vld [vmem:[#allocation25_spill] sm:$0xff] }
 0x12a   : > { %v11188_v54 = vpop.f32.mrf.mxu1 }
 0x12b   : > { %v9060_v55 = vpop.f32.mrf.mxu0 }
 0x12c   : > { %v9112_v29 = vpop.f32.mrf.mxu1  ;;  %9371 = vmatmul.mubr.msk.f32.gmra.mxu0 %vm385_vm0, %v13746_v53  ;;  %9423 = vmatmul.mubr.msk.f32.gmra.mxu1 %vm385_vm0, %v10658_v8  ;;  %v2768_v53 = vld [vmem:[#allocation2 + $0x198] sm:$0xff] }
 0x12d   : > { %v11194_v35 = vadd.f32 %v9112_v29, %v9060_v55  ;;  %9373 = vmatprep.mubr.msk.f32.mxu0 %vm385_vm0, %v13747_v61  ;;  %9425 = vmatprep.mubr.msk.f32.mxu1 %vm385_vm0, %v10662_v39  ;;  %v11200_v37 = vpop.f32.mrf.mxu0  ;;  %v13753_v29 = vld [vmem:[#allocation27_spill] sm:$0xff] }
 0x12e   : > { %v11202_v21 = vpop.f32.mrf.mxu1  ;;  %v3156_v61 = vld [vmem:[#allocation2 + $0x199] sm:$0xff] }
 0x12f   : > { %v9063_v62 = vpop.f32.mrf.mxu0 }
 0x130   : > { %v9115_v0 = vpop.f32.mrf.mxu1  ;;  %9374 = vmatmul.mubr.msk.f32.gmra.mxu0 %vm385_vm0, %v13748_v5  ;;  %9426 = vmatmul.mubr.msk.f32.gmra.mxu1 %vm385_vm0, %v10674_v43 }
 0x131   : > { %v11208_v8 = vadd.f32 %v9115_v0, %v9063_v62  ;;  %9376 = vmatprep.mubr.msk.f32.mxu0 %vm385_vm0, %v13749_v6  ;;  %9428 = vmatprep.mubr.msk.f32.mxu1 %vm385_vm0, %v10678_v47  ;;  %v11214_v39 = vpop.f32.mrf.mxu0 }
 0x132   : > { %v11216_v10 = vpop.f32.mrf.mxu1 }
 0x133   : > { %v9066_v12 = vpop.f32.mrf.mxu0 }
 0x134   : > { %v9118_v14 = vpop.f32.mrf.mxu1  ;;  %9377 = vmatmul.mubr.msk.f32.gmra.mxu0 %vm385_vm0, %v13750_v15  ;;  %9429 = vmatmul.mubr.msk.f32.gmra.mxu1 %vm385_vm0, %v10690_v49 }
 0x135   : > { %v11222_v43 = vadd.f32 %v9118_v14, %v9066_v12  ;;  %9379 = vmatprep.mubr.msk.f32.mxu0 %vm385_vm0, %v13751_v17  ;;  %9431 = vmatprep.mubr.msk.f32.mxu1 %vm385_vm0, %v10694_v51  ;;  %v11228_v47 = vpop.f32.mrf.mxu0 }
 0x136   : > { %v11230_v18 = vpop.f32.mrf.mxu1 }
 0x137   : > { %v9069_v25 = vpop.f32.mrf.mxu0 }
 0x138   : > { %v9121_v36 = vpop.f32.mrf.mxu1  ;;  %9380 = vmatmul.mubr.msk.f32.gmra.mxu0 %vm385_vm0, %v13752_v38  ;;  %9432 = vmatmul.mubr.msk.f32.gmra.mxu1 %vm385_vm0, %v13730_v30 }
 0x139   : > { %v11236_v49 = vadd.f32 %v9121_v36, %v9069_v25  ;;  %9382 = vmatprep.mubr.msk.f32.mxu0 %vm385_vm0, %v10712_v58  ;;  %9434 = vmatprep.mubr.msk.f32.mxu1 %vm385_vm0, %v13731_v40  ;;  %v11242_v51 = vpop.f32.mrf.mxu0 }
 0x13a   : > { %v11244_v42 = vpop.f32.mrf.mxu1 }
 0x13b   : > { %v9072_v48 = vpop.f32.mrf.mxu0 }
 0x13c   : > { %v9124_v55 = vpop.f32.mrf.mxu1  ;;  %9383 = vmatmul.mubr.msk.f32.gmra.mxu0 %vm385_vm0, %v13753_v29  ;;  %9435 = vmatmul.mubr.msk.f32.gmra.mxu1 %vm385_vm0, %v10722_v59 }
 0x13d   : > { %v11250_v30 = vadd.f32 %v9124_v55, %v9072_v48  ;;  %9385 = vmatprep.mubr.msk.f32.mxu0 %vm385_vm0, %v10922_v63  ;;  %9437 = vmatprep.mubr.msk.f32.mxu1 %vm385_vm0, %v11070_v45  ;;  %v11256_v58 = vpop.f32.mrf.mxu0  ;;  %v2769_v63 = vld [vmem:[#allocation2 + $0x1a0] sm:$0xff] }
 0x13e   : > { %v11258_v40 = vpop.f32.mrf.mxu1  ;;  %v3157_v45 = vld [vmem:[#allocation2 + $0x1a1] sm:$0xff] }
 0x13f   : > { %v9075_v62 = vpop.f32.mrf.mxu0 }
 0x140   : > { %v9127_v0 = vpop.f32.mrf.mxu1  ;;  %9386 = vmatmul.mubr.msk.f32.gmra.mxu0 %vm385_vm0, %v10934_v52  ;;  %9438 = vmatmul.mubr.msk.f32.gmra.mxu1 %vm385_vm0, %v11080_v60 }
 0x141   : > { %v11264_v59 = vadd.f32 %v9127_v0, %v9075_v62  ;;  %9388 = vmatprep.mubr.msk.f32.mxu0 %vm385_vm0, %v2768_v53  ;;  %9440 = vmatprep.mubr.msk.f32.mxu1 %vm385_vm0, %v3156_v61  ;;  %v11268_v5 = vpop.f32.mrf.mxu0 }
 0x142   : > { %v11270_v6 = vpop.f32.mrf.mxu1 }
 0x143   : > { %v9078_v12 = vpop.f32.mrf.mxu0 }
 0x144   : > { %v9130_v14 = vpop.f32.mrf.mxu1  ;;  %9389 = vmatmul.mubr.msk.f32.gmra.mxu0 %vm385_vm0, %v2769_v63  ;;  %9441 = vmatmul.mubr.msk.f32.gmra.mxu1 %vm385_vm0, %v3157_v45  ;;  %v3522_v45 = vld [vmem:[#allocation2 + $0x92] sm:$0xff] }
 0x145   : > { %v11274_v52 = vadd.f32 %v9130_v14, %v9078_v12  ;;  %9447 = vmatprep.mubr.msk.f32.mxu0 %vm385_vm0, %v10748_v22  ;;  %v11278_v60 = vpop.f32.mrf.mxu0 }
 0x146   : > { %v11280_v15 = vpop.f32.mrf.mxu1 }
 0x147   : > { %v9137_v17 = vpop.f32.mrf.mxu0 }
 0x148   : > { %9448 = vmatmul.mubr.msk.f32.vlgmr.msra.gmra.mxu0 %vm385_vm0, %v10765_v31  ;;  %v9189_v25 = vpop.f32.mrf.mxu1  ;;  %v1542_v36 = vadd.f32 %v9137_v17, %v11086_v2 }
 0x149   : > { %9450 = vmatprep.mubr.msk.f32.mxu0 %vm385_vm0, %v10769_v20  ;;  %v1382_v38 = vpop.f32.mrf.mxu0 }
 0x14a   : > { %v11287_v48 = vpop.f32.mrf.mxu1  ;;  %v11290_v55 = vadd.f32 %v1382_v38, %v11092_v9  ;;  %v11292_v22 = vadd.f32 %v9189_v25, %v1542_v36  ;;  %v3524_v36 = vld [vmem:[#allocation2 + $0xaa] sm:$0xff] }
 0x14c   : > { %v9140_v29 = vpop.f32.mrf.mxu0  ;;  %9451 = vmatmul.mubr.msk.f32.gmra.mxu0 %vm385_vm0, %v10783_v41  ;;  %v9192_v53 = vpop.f32.mrf.mxu1 }
 0x14d   : > { %v1544_v31 = vadd.f32 %v9140_v29, %v11106_v7  ;;  %9453 = vmatprep.mubr.msk.f32.mxu0 %vm385_vm0, %v10787_v46  ;;  %v3521_v7 = vld [vmem:[#allocation2 + $0x82] sm:$0xff] }
 0x14e   : > { %v1392_v2 = vpop.f32.mrf.mxu0  ;;  %v11299_v20 = vpop.f32.mrf.mxu1 }
 0x14f   : > { %v11302_v61 = vadd.f32 %v1392_v2, %v11110_v50  ;;  %v11304_v9 = vadd.f32 %v9192_v53, %v1544_v31  ;;  %v8106_v2 = vld [vmem:[%s13653_s5 + $0x18] sm:$0xff] }
 0x150   : > { %v9143_v62 = vpop.f32.mrf.mxu0  ;;  %9454 = vmatmul.mubr.msk.f32.gmra.mxu0 %vm385_vm0, %v10796_v57  ;;  %v9195_v0 = vpop.f32.mrf.mxu1  ;;  %9495 = vmatprep.subr.mxu1 %v8106_v2 }
 0x151   : > { %v1546_v41 = vadd.f32 %v9143_v62, %v11115_v33  ;;  %9456 = vmatprep.mubr.msk.f32.mxu0 %vm385_vm0, %v10800_v34  ;;  %v3523_v33 = vld [vmem:[#allocation2 + $0x9a] sm:$0xff]  ;;  %9496 = vmatpush3.msra.mxu1 %v8106_v2  ;;  %v3530_v2 = vld [vmem:[#allocation2 + $0xf2] sm:$0xff] }
 0x152   : > { %v1402_v46 = vpop.f32.mrf.mxu0  ;;  %v11311_v63 = vpop.f32.mrf.mxu1 }
 0x153   : > { %v11314_v50 = vadd.f32 %v1402_v46, %v11120_v23  ;;  %v11316_v12 = vadd.f32 %v9195_v0, %v1546_v41 }
 0x154   : > { %v9146_v14 = vpop.f32.mrf.mxu0  ;;  %9457 = vmatmul.mubr.msk.f32.gmra.mxu0 %vm385_vm0, %v3521_v7  ;;  %v9198_v57 = vpop.f32.mrf.mxu1 }
 0x155   : > { %v1548_v17 = vadd.f32 %v9146_v14, %v11125_v4  ;;  %9459 = vmatprep.mubr.msk.f32.mxu0 %vm385_vm0, %v3522_v45  ;;  %v3525_v4 = vld [vmem:[#allocation2 + $0xb2] sm:$0xff]  ;;  %v3527_v14 = vld [vmem:[#allocation2 + $0xca] sm:$0xff] }
 0x156   : > { %v1412_v34 = vpop.f32.mrf.mxu0  ;;  %v11321_v25 = vpop.f32.mrf.mxu1 }
 0x157   : > { %v11324_v38 = vadd.f32 %v1412_v34, %v11130_v13  ;;  %v11326_v23 = vadd.f32 %v9198_v57, %v1548_v17  ;;  %v3526_v13 = vld [vmem:[#allocation2 + $0xc2] sm:$0xff] }
 0x158   : > { %v9149_v29 = vpop.f32.mrf.mxu0  ;;  %9460 = vmatmul.mubr.msk.f32.gmra.mxu0 %vm385_vm0, %v3523_v33  ;;  %v9201_v53 = vpop.f32.mrf.mxu1  ;;  %v3528_v33 = vld [vmem:[#allocation2 + $0xda] sm:$0xff] }
 0x159   : > { %v1550_v31 = vadd.f32 %v9149_v29, %v11135_v19  ;;  %9462 = vmatprep.mubr.msk.f32.mxu0 %vm385_vm0, %v3524_v36 }
 0x15a   : > { %v1422_v62 = vpop.f32.mrf.mxu0  ;;  %v11334_v0 = vpop.f32.mrf.mxu1 }
 0x15b   : > { %v11337_v41 = vadd.f32 %v1422_v62, %v11140_v44  ;;  %v11339_v7 = vadd.f32 %v9201_v53, %v1550_v31 }
 0x15c   : > { %v9152_v46 = vpop.f32.mrf.mxu0  ;;  %9463 = vmatmul.mubr.msk.f32.gmra.mxu0 %vm385_vm0, %v3525_v4  ;;  %v9204_v19 = vpop.f32.mrf.mxu1 }
 0x15d   : > { %v1552_v45 = vadd.f32 %v9152_v46, %v11145_v26  ;;  %9465 = vmatprep.mubr.msk.f32.mxu0 %vm385_vm0, %v3526_v13  ;;  %v3529_v26 = vld [vmem:[#allocation2 + $0xe2] sm:$0xff] }
 0x15e   : > { %v1432_v57 = vpop.f32.mrf.mxu0  ;;  %v11344_v17 = vpop.f32.mrf.mxu1 }
 0x15f   : > { %v11347_v34 = vadd.f32 %v1432_v57, %v11150_v28  ;;  %v11349_v44 = vadd.f32 %v9204_v19, %v1552_v45  ;;  %v3532_v57 = vld [vmem:[#allocation2 + $0x10a] sm:$0xff] }
 0x160   : > { %v9155_v36 = vpop.f32.mrf.mxu0  ;;  %9466 = vmatmul.mubr.msk.f32.gmra.mxu0 %vm385_vm0, %v3527_v14  ;;  %v9207_v29 = vpop.f32.mrf.mxu1 }
 0x161   : > { %v1554_v53 = vadd.f32 %v9155_v36, %v11156_v3  ;;  %9468 = vmatprep.mubr.msk.f32.mxu0 %vm385_vm0, %v3528_v33  ;;  %v3531_v3 = vld [vmem:[#allocation2 + $0xfa] sm:$0xff] }
 0x162   : > { %v1442_v31 = vpop.f32.mrf.mxu0  ;;  %v11354_v4 = vpop.f32.mrf.mxu1 }
 0x163   : > { %v11357_v62 = vadd.f32 %v1442_v31, %v11162_v11  ;;  %v11359_v28 = vadd.f32 %v9207_v29, %v1554_v53  ;;  %v1107_v53 = vadd.f32 %v11188_v54, %v11186_v27 }
 0x164   : > { %v9158_v13 = vpop.f32.mrf.mxu0  ;;  %9469 = vmatmul.mubr.msk.f32.gmra.mxu0 %vm385_vm0, %v3529_v26  ;;  %v9210_v46 = vpop.f32.mrf.mxu1  ;;  %v3533_v26 = vld [vmem:[#allocation2 + $0x112] sm:$0xff] }
 0x165   : > { %v1556_v19 = vadd.f32 %v9158_v13, %v11168_v16  ;;  %9471 = vmatprep.mubr.msk.f32.mxu0 %vm385_vm0, %v3530_v2  ;;  %v3534_v13 = vld [vmem:[#allocation2 + $0x122] sm:$0xff] }
 0x166   : > { %v1452_v45 = vpop.f32.mrf.mxu0  ;;  %v11364_v14 = vpop.f32.mrf.mxu1 }
 0x167   : > { %13754 = vst [vmem:[#allocation24_spill] sm:$0xff] %v11364_v14  ;;  %v11367_v33 = vadd.f32 %v1452_v45, %v11174_v32  ;;  %v11369_v11 = vadd.f32 %v9210_v46, %v1556_v19 }
 0x168   : > { %v9161_v36 = vpop.f32.mrf.mxu0  ;;  %9472 = vmatmul.mubr.msk.f32.gmra.mxu0 %vm385_vm0, %v3531_v3  ;;  %v9213_v29 = vpop.f32.mrf.mxu1 }
 0x169   : > { %v1558_v16 = vadd.f32 %v9161_v36, %v11180_v24  ;;  %9474 = vmatprep.mubr.msk.f32.mxu0 %vm385_vm0, %v3532_v57  ;;  %v3535_v24 = vld [vmem:[#allocation2 + $0x12a] sm:$0xff]  ;;  %v3536_v57 = vld [vmem:[#allocation2 + $0x13a] sm:$0xff] }
 0x16a   : > { %v1462_v31 = vpop.f32.mrf.mxu0  ;;  %v11376_v2 = vpop.f32.mrf.mxu1 }
 0x16b   : > { %13755 = vst [vmem:[#allocation26_spill] sm:$0xff] %v11376_v2  ;;  %v11378_v32 = vadd.f32 %v1462_v31, %v1107_v53  ;;  %v11380_v46 = vadd.f32 %v9213_v29, %v1558_v16 }
 0x16c   : > { %v9164_v19 = vpop.f32.mrf.mxu0  ;;  %9475 = vmatmul.mubr.msk.f32.gmra.mxu0 %vm385_vm0, %v3533_v26  ;;  %v9216_v3 = vpop.f32.mrf.mxu1  ;;  %v3537_v26 = vld [vmem:[#allocation2 + $0x142] sm:$0xff] }
 0x16d   : > { %13756 = vst [vmem:[#allocation4_spill] sm:$0xff] %v11378_v32  ;;  %v1560_v45 = vadd.f32 %v9164_v19, %v11194_v35  ;;  %9477 = vmatprep.mubr.msk.f32.mxu0 %vm385_vm0, %v3534_v13  ;;  %v3538_v13 = vld [vmem:[#allocation2 + $0x152] sm:$0xff] }
 0x16e   : > { %v11385_v27 = vpop.f32.mrf.mxu0  ;;  %v11387_v54 = vpop.f32.mrf.mxu1 }
 0x16f   : > { %13757 = vst [vmem:[#allocation5_spill] sm:$0xff] %v11387_v54  ;;  %v11389_v36 = vadd.f32 %v9216_v3, %v1560_v45 }
 0x170   : > { %v9167_v53 = vpop.f32.mrf.mxu0  ;;  %9478 = vmatmul.mubr.msk.f32.gmra.mxu0 %vm385_vm0, %v3535_v24  ;;  %v9219_v29 = vpop.f32.mrf.mxu1  ;;  %v3539_v24 = vld [vmem:[#allocation2 + $0x15a] sm:$0xff] }
 0x171   : > { %v1562_v16 = vadd.f32 %v9167_v53, %v11208_v8  ;;  %9480 = vmatprep.mubr.msk.f32.mxu0 %vm385_vm0, %v3536_v57  ;;  %v3540_v53 = vld [vmem:[#allocation2 + $0x16a] sm:$0xff] }
 0x172   : > { %v11394_v35 = vpop.f32.mrf.mxu0  ;;  %v11396_v31 = vpop.f32.mrf.mxu1 }
 0x173   : > { %13758 = vst [vmem:[#allocation6_spill] sm:$0xff] %v11396_v31  ;;  %v11398_v19 = vadd.f32 %v9219_v29, %v1562_v16 }
 0x174   : > { %v9170_v54 = vpop.f32.mrf.mxu0  ;;  %9481 = vmatmul.mubr.msk.f32.gmra.mxu0 %vm385_vm0, %v3537_v26  ;;  %v9222_v3 = vpop.f32.mrf.mxu1  ;;  %v3541_v26 = vld [vmem:[#allocation2 + $0x172] sm:$0xff] }
 0x175   : > { %v1564_v45 = vadd.f32 %v9170_v54, %v11222_v43  ;;  %9483 = vmatprep.mubr.msk.f32.mxu0 %vm385_vm0, %v3538_v13  ;;  %v8105_v43 = vld [vmem:[%s13653_s5 + $0x10] sm:$0xff] }
 0x176   : > { %v11403_v8 = vpop.f32.mrf.mxu0  ;;  %v11405_v57 = vpop.f32.mrf.mxu1  ;;  %9497 = vmatprep.subr.mxu1 %v8105_v43 }
 0x177   : > { %13759 = vst [vmem:[#allocation7_spill] sm:$0xff] %v11405_v57  ;;  %v11407_v2 = vadd.f32 %v9222_v3, %v1564_v45  ;;  %9498 = vmatpush3.msra.mxu1 %v8105_v43  ;;  %v3544_v57 = vld [vmem:[#allocation2 + $0x19a] sm:$0xff] }
 0x178   : > { %v9173_v31 = vpop.f32.mrf.mxu0  ;;  %9484 = vmatmul.mubr.msk.f32.gmra.mxu0 %vm385_vm0, %v3539_v24  ;;  %v9225_v29 = vpop.f32.mrf.mxu1 }
 0x179   : > { %v1566_v16 = vadd.f32 %v9173_v31, %v11236_v49  ;;  %9486 = vmatprep.mubr.msk.f32.mxu0 %vm385_vm0, %v3540_v53 }
 0x17a   : > { %v11415_v54 = vpop.f32.mrf.mxu0  ;;  %v11417_v13 = vpop.f32.mrf.mxu1 }
 0x17b   : > { %13760 = vst [vmem:[#allocation8_spill] sm:$0xff] %v11417_v13  ;;  %v11419_v3 = vadd.f32 %v9225_v29, %v1566_v16 }
 0x17c   : > { %v9176_v45 = vpop.f32.mrf.mxu0  ;;  %9487 = vmatmul.mubr.msk.f32.gmra.mxu0 %vm385_vm0, %v3541_v26  ;;  %v9228_v24 = vpop.f32.mrf.mxu1 }
 0x17d   : > { %v1568_v49 = vadd.f32 %v9176_v45, %v11250_v30  ;;  %9489 = vmatprep.mubr.msk.f32.mxu0 %vm385_vm0, %v11072_v56  ;;  %v3545_v30 = vld [vmem:[#allocation2 + $0x1a2] sm:$0xff] }
 0x17e   : > { %v11425_v31 = vpop.f32.mrf.mxu0  ;;  %v11427_v53 = vpop.f32.mrf.mxu1 }
 0x17f   : > { %13761 = vst [vmem:[#allocation9_spill] sm:$0xff] %v11427_v53  ;;  %v11429_v32 = vadd.f32 %v9228_v24, %v1568_v49 }
 0x180   : > { %v9179_v13 = vpop.f32.mrf.mxu0  ;;  %9490 = vmatmul.mubr.msk.f32.gmra.mxu0 %vm385_vm0, %v11084_v1  ;;  %v9231_v29 = vpop.f32.mrf.mxu1 }
 0x181   : > { %v1570_v16 = vadd.f32 %v9179_v13, %v11264_v59  ;;  %9492 = vmatprep.mubr.msk.f32.mxu0 %vm385_vm0, %v3544_v57 }
 0x182   : > { %v11435_v26 = vpop.f32.mrf.mxu0  ;;  %v11437_v56 = vpop.f32.mrf.mxu1 }
 0x183   : > { %13762 = vst [vmem:[#allocation10_spill] sm:$0xff] %v11437_v56  ;;  %v11439_v43 = vadd.f32 %v9231_v29, %v1570_v16 }
 0x184   : > { %v9182_v45 = vpop.f32.mrf.mxu0  ;;  %9493 = vmatmul.mubr.msk.f32.gmra.mxu0 %vm385_vm0, %v3545_v30  ;;  %v9234_v24 = vpop.f32.mrf.mxu1 }
 0x185   : > { %v1572_v49 = vadd.f32 %v9182_v45, %v11274_v52 }
 0x186   : > { %v11443_v53 = vpop.f32.mrf.mxu0  ;;  %v11445_v1 = vpop.f32.mrf.mxu1 }
 0x187   : > { %13763 = vst [vmem:[#allocation11_spill] sm:$0xff] %v11445_v1  ;;  %v11447_v59 = vadd.f32 %v9234_v24, %v1572_v49 }
 0x188   : > { %v9241_v57 = vpop.f32.mrf.mxu0  ;;  %v11449_v13 = vpop.f32.mrf.mxu1 }
 0x189   : > { %13764 = vst [vmem:[#allocation12_spill] sm:$0xff] %v11449_v13  ;;  %v11452_v14 = vadd.f32 %v9241_v57, %v11292_v22 }
 0x18a   : > { %v11454_v29 = vpop.f32.mrf.mxu0  ;;  %v11456_v16 = vpop.f32.mrf.mxu1 }
 0x18b   : > { %13765 = vst [vmem:[#allocation13_spill] sm:$0xff] %v11452_v14  ;;  %13766 = vst [vmem:[#allocation14_spill] sm:$0xff] %v11456_v16 }
 0x18c   : > { %v9244_v30 = vpop.f32.mrf.mxu0  ;;  %v11458_v56 = vpop.f32.mrf.mxu1 }
 0x18d   : > { %13767 = vst [vmem:[#allocation15_spill] sm:$0xff] %v11458_v56  ;;  %v11461_v52 = vadd.f32 %v9244_v30, %v11304_v9  ;;  %v4199_v56 = vld [vmem:[%s13653_s5 + $0x8] sm:$0xff] }
 0x18e   : > { %v11463_v45 = vpop.f32.mrf.mxu0  ;;  %v11465_v24 = vpop.f32.mrf.mxu1  ;;  %9547 = vmatprep.subr.mxu0 %v4199_v56 }
 0x18f   : > { %13768 = vst [vmem:[#allocation16_spill] sm:$0xff] %v11461_v52  ;;  %13769 = vst [vmem:[#allocation17_spill] sm:$0xff] %v11465_v24  ;;  %9548 = vmatpush3.msra.mxu0 %v4199_v56  ;;  %v4167_v52 = vld [vmem:[#allocation3 + $0x8] sm:$0xff] }
 0x190   : > { %v9247_v49 = vpop.f32.mrf.mxu0  ;;  %v11467_v1 = vpop.f32.mrf.mxu1 }
 0x191   : > { %13770 = vst [vmem:[#allocation18_spill] sm:$0xff] %v11467_v1  ;;  %v11470_v22 = vadd.f32 %v9247_v49, %v11316_v12  ;;  %v4198_v12 = vld [vmem:[%s13653_s5] sm:$0xff] }
 0x192   : > { %v11472_v57 = vpop.f32.mrf.mxu0  ;;  %v11474_v13 = vpop.f32.mrf.mxu1  ;;  %9549 = vmatprep.subr.mxu0 %v4198_v12 }
 0x193   : > { %13771 = vst [vmem:[#allocation19_spill] sm:$0xff] %v11470_v22  ;;  %13772 = vst [vmem:[#allocation20_spill] sm:$0xff] %v11474_v13  ;;  %v4200_v13 = vld [vmem:[#allocation3 + $0x1] sm:$0xff]  ;;  %9550 = vmatpush3.msra.mxu0 %v4198_v12 }
 0x194   : > { %v9250_v9 = vpop.f32.mrf.mxu0  ;;  %v11479_v30 = vpop.f32.mrf.mxu1  ;;  %v4166_v22 = vld [vmem:[#allocation3] sm:$0xff]  ;;  %9499 = vmatprep.mubr.msk.f32.mxu1 %vm385_vm0, %v4200_v13 }
 0x195   : > { %13773 = vst [vmem:[#allocation21_spill] sm:$0xff] %v11479_v30  ;;  %v11482_v24 = vadd.f32 %v9250_v9, %v11326_v23  ;;  %v4201_v30 = vld [vmem:[#allocation3 + $0x9] sm:$0xff]  ;;  %9551 = vmatprep.mubr.msk.f32.mxu0 %vm385_vm0, %v4166_v22 }
 0x196   : > { %v11487_v49 = vpop.f32.mrf.mxu0  ;;  %v11489_v1 = vpop.f32.mrf.mxu1  ;;  %9500 = vmatmul.mubr.msk.f32.vlgmr.msra.gmra.mxu1 %vm385_vm0, %v4201_v30  ;;  %9552 = vmatmul.mubr.msk.f32.vlgmr.msra.gmra.mxu0 %vm385_vm0, %v4167_v52 }
 0x197   : > { %13774 = vst [vmem:[#allocation22_spill] sm:$0xff] %v11482_v24  ;;  %13775 = vst [vmem:[#allocation23_spill] sm:$0xff] %v11489_v1 }
 0x198   : > { %v9253_v16 = vpop.f32.mrf.mxu0  ;;  %v11492_v23 = vpop.f32.mrf.mxu1 }
 0x199   : > { %13776 = vst [vmem:[#allocation25_spill] sm:$0xff] %v11492_v23  ;;  %v11497_v56 = vadd.f32 %v9253_v16, %v11339_v7 }
 0x19a   : > { %v11500_v9 = vpop.f32.mrf.mxu0  ;;  %v11502_v1 = vpop.f32.mrf.mxu1 }
 0x19b   : > { %13777 = vst [vmem:[#allocation27_spill] sm:$0xff] %v11497_v56  ;;  %13778 = vst [vmem:[#allocation28_spill] sm:$0xff] %v11502_v1 }
 0x19c   : > { %v9256_v13 = vpop.f32.mrf.mxu0  ;;  %v11504_v12 = vpop.f32.mrf.mxu1 }
 0x19d   : > { %13779 = vst [vmem:[#allocation29_spill] sm:$0xff] %v11504_v12  ;;  %v11507_v24 = vadd.f32 %v9256_v13, %v11349_v44  ;;  %v8172_v12 = vld [vmem:[%s13653_s5 + $0x28] sm:$0xff] }
 0x19e   : > { %v11509_v23 = vpop.f32.mrf.mxu0  ;;  %v11511_v22 = vpop.f32.mrf.mxu1  ;;  %9599 = vmatprep.subr.mxu1 %v8172_v12 }
 0x19f   : > { %13780 = vst [vmem:[#allocation30_spill] sm:$0xff] %v11507_v24  ;;  %13781 = vst [vmem:[#allocation31_spill] sm:$0xff] %v11511_v22  ;;  %9600 = vmatpush3.msra.mxu1 %v8172_v12 }
 0x1a0   : > { %v9259_v30 = vpop.f32.mrf.mxu0  ;;  %v11513_v14 = vpop.f32.mrf.mxu1 }
 0x1a1   : > { %13782 = vst [vmem:[#allocation32_spill] sm:$0xff] %v11513_v14  ;;  %v11516_v7 = vadd.f32 %v9259_v30, %v11359_v28 }
 0x1a2   : > { %v11518_v16 = vpop.f32.mrf.mxu0  ;;  %v11520_v52 = vpop.f32.mrf.mxu1 }
 0x1a3   : > { %13783 = vst [vmem:[#allocation33_spill] sm:$0xff] %v11516_v7  ;;  %13784 = vst [vmem:[#allocation34_spill] sm:$0xff] %v11520_v52 }
 0x1a4   : > { %v9262_v44 = vpop.f32.mrf.mxu0  ;;  %v11525_v13 = vpop.f32.mrf.mxu1 }
 0x1a5   : > { %13785 = vst [vmem:[#allocation35_spill] sm:$0xff] %v11525_v13  ;;  %v11528_v22 = vadd.f32 %v9262_v44, %v11369_v11 }
 0x1a6   : > { %v11530_v14 = vpop.f32.mrf.mxu0  ;;  %v11532_v28 = vpop.f32.mrf.mxu1 }
 0x1a7   : > { %13786 = vst [vmem:[#allocation36_spill] sm:$0xff] %v11528_v22  ;;  %13787 = vst [vmem:[#allocation37_spill] sm:$0xff] %v11532_v28 }
 0x1a8   : > { %v9265_v30 = vpop.f32.mrf.mxu0  ;;  %v11534_v7 = vpop.f32.mrf.mxu1 }
 0x1a9   : > { %13788 = vst [vmem:[#allocation38_spill] sm:$0xff] %v11534_v7  ;;  %v11537_v52 = vadd.f32 %v9265_v30, %v11380_v46 }
 0x1aa   : > { %v11539_v24 = vpop.f32.mrf.mxu0  ;;  %v11541_v1 = vpop.f32.mrf.mxu1 }
 0x1ab   : > { %13789 = vst [vmem:[#allocation39_spill] sm:$0xff] %v11537_v52  ;;  %13790 = vst [vmem:[#allocation40_spill] sm:$0xff] %v11541_v1 }
 0x1ac   : > { %v9268_v13 = vpop.f32.mrf.mxu0  ;;  %v11543_v56 = vpop.f32.mrf.mxu1 }
 0x1ad   : > { %13791 = vst [vmem:[#allocation41_spill] sm:$0xff] %v11543_v56  ;;  %v11546_v11 = vadd.f32 %v9268_v13, %v11389_v36 }
 0x1ae   : > { %v11548_v12 = vpop.f32.mrf.mxu0  ;;  %v11550_v44 = vpop.f32.mrf.mxu1 }
 0x1af   : > { %13792 = vst [vmem:[#allocation42_spill] sm:$0xff] %v11546_v11  ;;  %13793 = vst [vmem:[#allocation43_spill] sm:$0xff] %v11550_v44 }
 0x1b0   : > { %v9271_v28 = vpop.f32.mrf.mxu0  ;;  %v11552_v22 = vpop.f32.mrf.mxu1 }
 0x1b1   : > { %13794 = vst [vmem:[#allocation44_spill] sm:$0xff] %v11552_v22  ;;  %v11555_v46 = vadd.f32 %v9271_v28, %v11398_v19 }
 0x1b2   : > { %v11557_v30 = vpop.f32.mrf.mxu0  ;;  %v11559_v7 = vpop.f32.mrf.mxu1 }
 0x1b3   : > { %13795 = vst [vmem:[#allocation45_spill] sm:$0xff] %v11555_v46  ;;  %13796 = vst [vmem:[#allocation46_spill] sm:$0xff] %v11559_v7 }
 0x1b4   : > { %v9274_v1 = vpop.f32.mrf.mxu0  ;;  %v11561_v52 = vpop.f32.mrf.mxu1 }
 0x1b5   : > { %13797 = vst [vmem:[#allocation47_spill] sm:$0xff] %v11561_v52  ;;  %v11564_v36 = vadd.f32 %v9274_v1, %v11407_v2 }
 0x1b6   : > { %v11566_v13 = vpop.f32.mrf.mxu0  ;;  %v11568_v56 = vpop.f32.mrf.mxu1 }
 0x1b7   : > { %13798 = vst [vmem:[#allocation48_spill] sm:$0xff] %v11564_v36  ;;  %13799 = vst [vmem:[#allocation49_spill] sm:$0xff] %v11568_v56 }
 0x1b8   : > { %v9277_v44 = vpop.f32.mrf.mxu0  ;;  %v11570_v11 = vpop.f32.mrf.mxu1 }
 0x1b9   : > { %13800 = vst [vmem:[#allocation50_spill] sm:$0xff] %v11570_v11  ;;  %v11573_v19 = vadd.f32 %v9277_v44, %v11419_v3 }
 0x1ba   : > { %v11575_v28 = vpop.f32.mrf.mxu0  ;;  %v11577_v22 = vpop.f32.mrf.mxu1 }
 0x1bb   : > { %13801 = vst [vmem:[#allocation51_spill] sm:$0xff] %v11573_v19  ;;  %13802 = vst [vmem:[#allocation52_spill] sm:$0xff] %v11577_v22 }
 0x1bc   : > { %v9280_v7 = vpop.f32.mrf.mxu0  ;;  %v11579_v46 = vpop.f32.mrf.mxu1 }
 0x1bd   : > { %13803 = vst [vmem:[#allocation53_spill] sm:$0xff] %v11579_v46  ;;  %v11582_v2 = vadd.f32 %v9280_v7, %v11429_v32  ;;  %v8171_v46 = vld [vmem:[%s13653_s5 + $0x20] sm:$0xff] }
 0x1be   : > { %v11584_v1 = vpop.f32.mrf.mxu0  ;;  %v11586_v52 = vpop.f32.mrf.mxu1  ;;  %9601 = vmatprep.subr.mxu1 %v8171_v46 }
 0x1bf   : > { %13804 = vst [vmem:[#allocation54_spill] sm:$0xff] %v11582_v2  ;;  %13805 = vst [vmem:[#allocation55_spill] sm:$0xff] %v11586_v52  ;;  %9602 = vmatpush3.msra.mxu1 %v8171_v46 }
 0x1c0   : > { %v9283_v56 = vpop.f32.mrf.mxu0  ;;  %v11588_v36 = vpop.f32.mrf.mxu1 }
 0x1c1   : > { %13806 = vst [vmem:[#allocation56_spill] sm:$0xff] %v11588_v36  ;;  %v11591_v3 = vadd.f32 %v9283_v56, %v11439_v43 }
 0x1c2   : > { %v11593_v44 = vpop.f32.mrf.mxu0  ;;  %v11595_v11 = vpop.f32.mrf.mxu1 }
 0x1c3   : > { %13807 = vst [vmem:[#allocation57_spill] sm:$0xff] %v11591_v3  ;;  %13808 = vst [vmem:[#allocation58_spill] sm:$0xff] %v11595_v11 }
 0x1c4   : > { %v9286_v32 = vpop.f32.mrf.mxu0  ;;  %v11600_v7 = vpop.f32.mrf.mxu1 }
 0x1c5   : > { %13809 = vst [vmem:[#allocation59_spill] sm:$0xff] %v11600_v7  ;;  %v11603_v52 = vadd.f32 %v9286_v32, %v11447_v59 }
 0x1c6   : > { %v11605_v36 = vpop.f32.mrf.mxu0  ;;  %v11607_v43 = vpop.f32.mrf.mxu1 }
 0x1c7   : > { %13810 = vst [vmem:[#allocation60_spill] sm:$0xff] %v11603_v52  ;;  %13811 = vst [vmem:[#allocation61_spill] sm:$0xff] %v11605_v36 }
 0x1c8   : > { %13812 = vst [vmem:[#allocation62_spill] sm:$0xff] %v11607_v43  ;;  %v11609_v56 = vpop.f32.mrf.mxu0  ;;  %v11611_v3 = vpop.f32.mrf.mxu1 }
 0x1c9   : > { %13813 = vst [vmem:[#allocation63_spill] sm:$0xff] %v11611_v3 }
 0x1ca   : > { %v11613_v11 = vpop.f32.mrf.mxu0  ;;  %v11615_v2 = vpop.f32.mrf.mxu1 }
 0x1cb   : > { %13814 = vst [vmem:[#allocation64_spill] sm:$0xff] %v11615_v2  ;;  %v8206_v2 = vld [vmem:[%s13653_s5 + $0x38] sm:$0xff] }
 0x1cc   : > { %v11617_v22 = vpop.f32.mrf.mxu0  ;;  %v11619_v7 = vpop.f32.mrf.mxu1  ;;  %9651 = vmatprep.subr.mxu0 %v8206_v2 }
 0x1cd   : > { %13815 = vst [vmem:[#allocation65_spill] sm:$0xff] %v11617_v22  ;;  %13816 = vst [vmem:[#allocation66_spill] sm:$0xff] %v11619_v7  ;;  %9652 = vmatpush3.msra.mxu0 %v8206_v2  ;;  %v8205_v7 = vld [vmem:[%s13653_s5 + $0x30] sm:$0xff] }
 0x1ce   : > { %v11621_v19 = vpop.f32.mrf.mxu0  ;;  %v11625_v46 = vpop.f32.mrf.mxu1  ;;  %9653 = vmatprep.subr.mxu0 %v8205_v7 }
 0x1cf   : > { %13817 = vst [vmem:[#allocation67_spill] sm:$0xff] %v11621_v19  ;;  %13819 = vst [vmem:[#allocation69_spill] sm:$0xff] %v11625_v46  ;;  %v8240_v46 = vld [vmem:[%s13653_s5 + $0x48] sm:$0xff]  ;;  %9654 = vmatpush3.msra.mxu0 %v8205_v7 }
 0x1d0   : > { %v11623_v59 = vpop.f32.mrf.mxu0  ;;  %v11631_v52 = vpop.f32.mrf.mxu1  ;;  %9703 = vmatprep.subr.mxu1 %v8240_v46 }
 0x1d1   : > { %13818 = vst [vmem:[#allocation68_spill] sm:$0xff] %v11623_v59  ;;  %13822 = vst [vmem:[#allocation72_spill] sm:$0xff] %v11631_v52 }
 0x1d2   : > { %v11627_v32 = vpop.f32.mrf.mxu0  ;;  %v11646_v52 = vpop.f32.mrf.mxu1 }
 0x1d3   : > { %13820 = vst [vmem:[#allocation70_spill] sm:$0xff] %v11627_v32  ;;  %13825 = vst [vmem:[#allocation75_spill] sm:$0xff] %v11646_v52 }
 0x1d4   : > { %v11629_v43 = vpop.f32.mrf.mxu0  ;;  %v11652_v2 = vpop.f32.mrf.mxu1 }
 0x1d5   : > { %13821 = vst [vmem:[#allocation71_spill] sm:$0xff] %v11629_v43  ;;  %13828 = vst [vmem:[#allocation78_spill] sm:$0xff] %v11652_v2 }
 0x1d6   : > { %v11636_v3 = vpop.f32.mrf.mxu0  ;;  %v11658_v22 = vpop.f32.mrf.mxu1 }
 0x1d7   : > { %13823 = vst [vmem:[#allocation73_spill] sm:$0xff] %v11636_v3  ;;  %13831 = vst [vmem:[#allocation81_spill] sm:$0xff] %v11658_v22 }
 0x1d8   : > { %v11644_v32 = vpop.f32.mrf.mxu0  ;;  %v11664_v46 = vpop.f32.mrf.mxu1 }
 0x1d9   : > { %13824 = vst [vmem:[#allocation74_spill] sm:$0xff] %v11644_v32 }
 0x1da   : > { %v11648_v43 = vpop.f32.mrf.mxu0 }
 0x1db   : > { %13826 = vst [vmem:[#allocation76_spill] sm:$0xff] %v11648_v43  ;;  %v11670_v43 = vpop.f32.mrf.mxu1 }
 0x1dc   : > { %v11650_v3 = vpop.f32.mrf.mxu0 }
 0x1dd   : > { %13827 = vst [vmem:[#allocation77_spill] sm:$0xff] %v11650_v3 }
 0x1de   : > { %v11654_v59 = vpop.f32.mrf.mxu0 }
 0x1df   : > { %13829 = vst [vmem:[#allocation79_spill] sm:$0xff] %v11654_v59  ;;  %v11676_v59 = vpop.f32.mrf.mxu1 }
 0x1e0   : > { %v11656_v19 = vpop.f32.mrf.mxu0 }
 0x1e1   : > { %13830 = vst [vmem:[#allocation80_spill] sm:$0xff] %v11656_v19 }
 0x1e2   : > { %v11660_v36 = vpop.f32.mrf.mxu0 }
 0x1e3   : > { %13832 = vst [vmem:[#allocation82_spill] sm:$0xff] %v11660_v36  ;;  %v11682_v36 = vpop.f32.mrf.mxu1 }
 0x1e4   : > { %v11662_v32 = vpop.f32.mrf.mxu0 }
 0x1e5   : > { %13833 = vst [vmem:[#allocation83_spill] sm:$0xff] %v11662_v32 }
 0x1e6   : > { %v11666_v52 = vpop.f32.mrf.mxu0 }
 0x1e7   : > { %13834 = vst [vmem:[#allocation84_spill] sm:$0xff] %v11666_v52  ;;  %v1117_v52 = vadd.f32 %v11202_v21, %v11200_v37  ;;  %v1177_v37 = vadd.f32 %v11280_v15, %v11278_v60  ;;  %v11702_v21 = vpop.f32.mrf.mxu1 }
 0x1e8   : > { %v11668_v7 = vpop.f32.mrf.mxu0 }
 0x1e9   : > { %13835 = vst [vmem:[#allocation85_spill] sm:$0xff] %v11668_v7  ;;  %v1127_v7 = vadd.f32 %v11216_v10, %v11214_v39  ;;  %v1929_v39 = vadd.f32 %v11287_v48, %v11290_v55  ;;  %v1931_v10 = vadd.f32 %v11299_v20, %v11302_v61  ;;  %v1571_v48 = vadd.f32 %v11443_v53, %v1177_v37 }
 0x1ea   : > { %v11672_v3 = vpop.f32.mrf.mxu0  ;;  %v1939_v20 = vadd.f32 %v11344_v17, %v11347_v34  ;;  %v1941_v61 = vadd.f32 %v11354_v4, %v11357_v62  ;;  %v13845_v34 = vld [vmem:[#allocation6_spill] sm:$0xff]  ;;  %v13846_v62 = vld [vmem:[#allocation7_spill] sm:$0xff] }
 0x1eb   : > { %13836 = vst [vmem:[#allocation86_spill] sm:$0xff] %v11672_v3  ;;  %v1137_v3 = vadd.f32 %v11230_v18, %v11228_v47  ;;  %v1933_v47 = vadd.f32 %v11311_v63, %v11314_v50  ;;  %v1559_v18 = vadd.f32 %v11385_v27, %v1117_v52  ;;  %v13841_v63 = vld [vmem:[#allocation24_spill] sm:$0xff] }
 0x1ec   : > { %v11674_v2 = vpop.f32.mrf.mxu0  ;;  %v1943_v50 = vadd.f32 %v13841_v63, %v11367_v33  ;;  %v13847_v33 = vld [vmem:[#allocation8_spill] sm:$0xff]  ;;  %v13857_v63 = vld [vmem:[#allocation19_spill] sm:$0xff] }
 0x1ed   : > { %13837 = vst [vmem:[#allocation87_spill] sm:$0xff] %v11674_v2 }
 0x1ee   : > { %v11678_v19 = vpop.f32.mrf.mxu0 }
 0x1ef   : > { %13838 = vst [vmem:[#allocation88_spill] sm:$0xff] %v11678_v19  ;;  %v1147_v19 = vadd.f32 %v11244_v42, %v11242_v51  ;;  %v1935_v42 = vadd.f32 %v11321_v25, %v11324_v38  ;;  %v2317_v25 = vadd.f32 %v11454_v29, %v1929_v39  ;;  %v11732_v38 = vpop.f32.mrf.mxu1  ;;  %v13852_v39 = vld [vmem:[#allocation12_spill] sm:$0xff] }
 0x1f0   : > { %v11680_v22 = vpop.f32.mrf.mxu0 }
 0x1f1   : > { %13839 = vst [vmem:[#allocation89_spill] sm:$0xff] %v11680_v22  ;;  %v1157_v22 = vadd.f32 %v11258_v40, %v11256_v58  ;;  %v1561_v58 = vadd.f32 %v11394_v35, %v1127_v7  ;;  %v1563_v40 = vadd.f32 %v11403_v8, %v1137_v3  ;;  %v13844_v35 = vld [vmem:[#allocation5_spill] sm:$0xff]  ;;  %v2323_v29 = vadd.f32 %v11487_v49, %v1935_v42  ;;  %v11757_v42 = vpop.f32.mrf.mxu1 }
 0x1f2   : > { %v11684_v32 = vpop.f32.mrf.mxu0  ;;  %v1947_v8 = vadd.f32 %v13844_v35, %v1559_v18  ;;  %v2327_v49 = vadd.f32 %v11509_v23, %v1939_v20  ;;  %v2331_v23 = vadd.f32 %v11530_v14, %v1943_v50  ;;  %v13870_v14 = vld [vmem:[#allocation33_spill] sm:$0xff]  ;;  %v13871_v50 = vld [vmem:[#allocation32_spill] sm:$0xff] }
 0x1f3   : > { %13840 = vst [vmem:[#allocation90_spill] sm:$0xff] %v11684_v32  ;;  %v1167_v32 = vadd.f32 %v11270_v6, %v11268_v5  ;;  %v1565_v5 = vadd.f32 %v11415_v54, %v1147_v19  ;;  %v1937_v6 = vadd.f32 %v11334_v0, %v11337_v41  ;;  %v1567_v60 = vadd.f32 %v11425_v31, %v1157_v22  ;;  %v13842_v0 = vld [vmem:[#allocation4_spill] sm:$0xff]  ;;  %v13843_v41 = vld [vmem:[#allocation26_spill] sm:$0xff]  ;;  %v13848_v22 = vld [vmem:[#allocation9_spill] sm:$0xff] }
 0x1f4   : > { %v11692_v2 = vpop.f32.mrf.mxu0  ;;  %v1945_v27 = vadd.f32 %v13843_v41, %v13842_v0  ;;  %v2319_v54 = vadd.f32 %v11463_v45, %v1931_v10  ;;  %v2321_v31 = vadd.f32 %v11472_v57, %v1933_v47  ;;  %v1949_v4 = vadd.f32 %v13845_v34, %v1561_v58  ;;  %v13849_v19 = vld [vmem:[#allocation10_spill] sm:$0xff]  ;;  %v13851_v57 = vld [vmem:[#allocation13_spill] sm:$0xff]  ;;  %v13854_v58 = vld [vmem:[#allocation16_spill] sm:$0xff] }
 0x1f5   : > { %v1569_v15 = vadd.f32 %v11435_v26, %v1167_v32  ;;  %v1951_v53 = vadd.f32 %v13846_v62, %v1563_v40  ;;  %v1953_v26 = vadd.f32 %v13847_v33, %v1565_v5  ;;  %v1955_v52 = vadd.f32 %v13848_v22, %v1567_v60  ;;  %v13850_v32 = vld [vmem:[#allocation11_spill] sm:$0xff]  ;;  %v13853_v47 = vld [vmem:[#allocation14_spill] sm:$0xff]  ;;  %v13856_v60 = vld [vmem:[#allocation17_spill] sm:$0xff] }
 0x1f6   : > { %v11711_v51 = vpop.f32.mrf.mxu0  ;;  %v1959_v7 = vadd.f32 %v13850_v32, %v1571_v48  ;;  %v2325_v45 = vadd.f32 %v11500_v9, %v1937_v6  ;;  %v2706_v10 = vadd.f32 %v13852_v39, %v13851_v57  ;;  %v2705_v18 = vadd.f32 %v13853_v47, %v2317_v25  ;;  %v13855_v40 = vld [vmem:[#allocation15_spill] sm:$0xff]  ;;  %v13858_v48 = vld [vmem:[#allocation18_spill] sm:$0xff]  ;;  %v13859_v9 = vld [vmem:[#allocation20_spill] sm:$0xff] }
 0x1f7   : > { %v1957_v3 = vadd.f32 %v13849_v19, %v1569_v15  ;;  %v2708_v5 = vadd.f32 %v13855_v40, %v13854_v58  ;;  %v2707_v15 = vadd.f32 %v13856_v60, %v2319_v54  ;;  %v2710_v0 = vadd.f32 %v13858_v48, %v13857_v63  ;;  %v13860_v34 = vld [vmem:[#allocation22_spill] sm:$0xff]  ;;  %v13861_v25 = vld [vmem:[#allocation21_spill] sm:$0xff]  ;;  %v13862_v33 = vld [vmem:[#allocation23_spill] sm:$0xff]  ;;  %v11788_v63 = vpop.f32.mrf.mxu1 }
 0x1f8   : > { %v11723_v55 = vpop.f32.mrf.mxu0  ;;  %v2709_v6 = vadd.f32 %v13859_v9, %v2321_v31  ;;  %v2329_v41 = vadd.f32 %v11518_v16, %v1941_v61  ;;  %v2712_v62 = vadd.f32 %v13861_v25, %v13860_v34  ;;  %v2711_v22 = vadd.f32 %v13862_v33, %v2323_v29  ;;  %v13863_v19 = vld [vmem:[#allocation27_spill] sm:$0xff]  ;;  %v13864_v54 = vld [vmem:[#allocation25_spill] sm:$0xff]  ;;  %v13865_v57 = vld [vmem:[#allocation28_spill] sm:$0xff] }
 0x1f9   : > { %v2333_v20 = vadd.f32 %v11539_v24, %v1945_v27  ;;  %v2714_v32 = vadd.f32 %v13864_v54, %v13863_v19  ;;  %v2713_v39 = vadd.f32 %v13865_v57, %v2325_v45  ;;  %v2335_v31 = vadd.f32 %v11548_v12, %v1947_v8  ;;  %v13867_v47 = vld [vmem:[#allocation30_spill] sm:$0xff]  ;;  %v13868_v58 = vld [vmem:[#allocation29_spill] sm:$0xff]  ;;  %v13869_v60 = vld [vmem:[#allocation31_spill] sm:$0xff] }
 0x1fa   : > { %v11739_v17 = vpop.f32.mrf.mxu0  ;;  %v2337_v16 = vadd.f32 %v11557_v30, %v1949_v4  ;;  %v2716_v40 = vadd.f32 %v13868_v58, %v13867_v47  ;;  %v11781_v29 = vadd.f32 %v13869_v60, %v2327_v49  ;;  %v11785_v24 = vadd.f32 %v13871_v50, %v13870_v14  ;;  %v13872_v45 = vld [vmem:[#allocation34_spill] sm:$0xff]  ;;  %v13873_v30 = vld [vmem:[#allocation36_spill] sm:$0xff]  ;;  %v13874_v8 = vld [vmem:[#allocation35_spill] sm:$0xff] }
 0x1fb   : > { %v2339_v27 = vadd.f32 %v11566_v13, %v1951_v53  ;;  %v11791_v12 = vadd.f32 %v13872_v45, %v2329_v41  ;;  %v11795_v4 = vadd.f32 %v13874_v8, %v13873_v30  ;;  %v2341_v48 = vadd.f32 %v11575_v28, %v1953_v26  ;;  %v13876_v34 = vld [vmem:[#allocation37_spill] sm:$0xff]  ;;  %v13877_v33 = vld [vmem:[#allocation39_spill] sm:$0xff]  ;;  %v13878_v13 = vld [vmem:[#allocation38_spill] sm:$0xff] }
 0x1fc   : > { %v11749_v37 = vpop.f32.mrf.mxu0  ;;  %v2343_v49 = vadd.f32 %v11584_v1, %v1955_v52  ;;  %v11802_v25 = vadd.f32 %v13876_v34, %v2331_v23  ;;  %v11806_v53 = vadd.f32 %v13878_v13, %v13877_v33  ;;  %v13879_v19 = vld [vmem:[#allocation40_spill] sm:$0xff]  ;;  %v3095_v54 = vadd.f32 %v11609_v56, %v2706_v10  ;;  %v13880_v57 = vld [vmem:[#allocation42_spill] sm:$0xff]  ;;  %v13881_v47 = vld [vmem:[#allocation41_spill] sm:$0xff]  ;;  %v11837_v34 = vpop.f32.mrf.mxu1 }
 0x1fd   : > { %v11809_v41 = vadd.f32 %v13879_v19, %v2333_v20  ;;  %v11814_v58 = vadd.f32 %v13881_v47, %v13880_v57  ;;  %v13882_v28 = vld [vmem:[#allocation43_spill] sm:$0xff]  ;;  %v13883_v26 = vld [vmem:[#allocation45_spill] sm:$0xff]  ;;  %v13884_v52 = vld [vmem:[#allocation44_spill] sm:$0xff]  ;;  %v2345_v8 = vadd.f32 %v11593_v44, %v1957_v3 }
 0x1fe   : > { %v11764_v35 = vpop.f32.mrf.mxu0  ;;  %v11817_v1 = vadd.f32 %v13882_v28, %v2335_v31  ;;  %v11821_v23 = vadd.f32 %v13884_v52, %v13883_v26  ;;  %v13885_v60 = vld [vmem:[#allocation46_spill] sm:$0xff]  ;;  %v13887_v20 = vld [vmem:[#allocation48_spill] sm:$0xff]  ;;  %v13888_v45 = vld [vmem:[#allocation47_spill] sm:$0xff]  ;;  %v3094_v31 = vadd.f32 %v11613_v11, %v2705_v18 }
 0x1ff   : > { %v11824_v14 = vadd.f32 %v13885_v60, %v2337_v16  ;;  %v11830_v30 = vadd.f32 %v13888_v45, %v13887_v20  ;;  %v13889_v56 = vld [vmem:[#allocation49_spill] sm:$0xff]  ;;  %v13890_v33 = vld [vmem:[#allocation51_spill] sm:$0xff]  ;;  %v13891_v13 = vld [vmem:[#allocation50_spill] sm:$0xff] }
 0x200   : > { %v11776_v61 = vpop.f32.mrf.mxu0  ;;  %v11833_v10 = vadd.f32 %v13889_v56, %v2339_v27  ;;  %v11841_v19 = vadd.f32 %v13891_v13, %v13890_v33  ;;  %v13892_v16 = vld [vmem:[#allocation52_spill] sm:$0xff]  ;;  %v13893_v47 = vld [vmem:[#allocation54_spill] sm:$0xff]  ;;  %v13894_v28 = vld [vmem:[#allocation53_spill] sm:$0xff] }
 0x201   : > { %13866 = vst [vmem:[#allocation24_spill] sm:$0xff] %v11776_v61  ;;  %v11844_v57 = vadd.f32 %v13892_v16, %v2341_v48  ;;  %v11848_v26 = vadd.f32 %v13894_v28, %v13893_v47  ;;  %v13895_v52 = vld [vmem:[#allocation55_spill] sm:$0xff]  ;;  %v13897_v44 = vld [vmem:[#allocation57_spill] sm:$0xff]  ;;  %v13898_v11 = vld [vmem:[#allocation56_spill] sm:$0xff] }
 0x202   : > { %v11799_v9 = vpop.f32.mrf.mxu0  ;;  %v11851_v27 = vadd.f32 %v13895_v52, %v2343_v49  ;;  %v11857_v3 = vadd.f32 %v13898_v11, %v13897_v44  ;;  %v13900_v18 = vld [vmem:[#allocation61_spill] sm:$0xff]  ;;  %v13901_v45 = vld [vmem:[#allocation63_spill] sm:$0xff]  ;;  %v13905_v28 = vld [vmem:[#allocation70_spill] sm:$0xff] }
 0x203   : > { %13875 = vst [vmem:[#allocation4_spill] sm:$0xff] %v11799_v9  ;;  %v2347_v20 = vadd.f32 %v13900_v18, %v1959_v7  ;;  %v3483_v56 = vadd.f32 %v13901_v45, %v3095_v54  ;;  %v13902_v33 = vld [vmem:[#allocation65_spill] sm:$0xff]  ;;  %v13903_v13 = vld [vmem:[#allocation67_spill] sm:$0xff]  ;;  %v3098_v9 = vadd.f32 %v13905_v28, %v2709_v6  ;;  %v11869_v44 = vld [vmem:[%s13651_s3] ss:$0 sm:$0xff] }
 0x204   : > { %v11826_v50 = vpop.f32.mrf.mxu0  ;;  %13899 = vst [vmem:[#allocation6_spill] sm:$0xff] %v11857_v3  ;;  %v3097_v48 = vadd.f32 %v13902_v33, %v2708_v5  ;;  %v3096_v16 = vadd.f32 %v13903_v13, %v2707_v15  ;;  %v13906_v49 = vld [vmem:[#allocation71_spill] sm:$0xff]  ;;  %v13907_v11 = vld [vmem:[#allocation58_spill] sm:$0xff]  ;;  %v13908_v54 = vld [vmem:[#allocation64_spill] sm:$0xff]  ;;  %v11876_v15 = vpop.f32.mrf.mxu1 }
 0x205   : > { %13886 = vst [vmem:[#allocation26_spill] sm:$0xff] %v11826_v50  ;;  %v13904_v50 = vld [vmem:[#allocation68_spill] sm:$0xff]  ;;  %v3101_v52 = vadd.f32 %v13906_v49, %v2712_v62  ;;  %v11872_v7 = vadd.f32 %v13907_v11, %v2345_v8  ;;  %v3482_v18 = vadd.f32 %v13908_v54, %v3094_v31  ;;  %v13909_v5 = vld [vmem:[#allocation73_spill] sm:$0xff]  ;;  %v13911_v6 = vld [vmem:[#allocation59_spill] sm:$0xff] }
 0x206   : > { %v11853_v60 = vpop.f32.mrf.mxu0  ;;  %v3099_v47 = vadd.f32 %v13904_v50, %v2710_v0  ;;  %v3100_v45 = vadd.f32 %v13909_v5, %v2711_v22  ;;  %v13910_v50 = vld [vmem:[#allocation60_spill] sm:$0xff]  ;;  %v13913_v62 = vld [vmem:[#allocation74_spill] sm:$0xff] }
 0x207   : > { %13896 = vst [vmem:[#allocation5_spill] sm:$0xff] %v11853_v60  ;;  %v11880_v33 = vadd.f32 %v13911_v6, %v13910_v50  ;;  %v3103_v13 = vadd.f32 %v13913_v62, %v2714_v32  ;;  %v13914_v28 = vld [vmem:[#allocation76_spill] sm:$0xff]  ;;  %v13915_v60 = vld [vmem:[#allocation77_spill] sm:$0xff]  ;;  %v13916_v22 = vld [vmem:[#allocation62_spill] sm:$0xff] }
 0x208   : > { %v9449_v61 = vpop.f32.mrf.mxu0  ;;  %v3102_v49 = vadd.f32 %v13914_v28, %v2713_v39  ;;  %v3105_v3 = vadd.f32 %v13915_v60, %v2716_v40  ;;  %v11888_v8 = vld [vmem:[%s13651_s3 + $0x1] ss:$0 sm:$0xff]  ;;  %v11891_v11 = vadd.f32 %v13916_v22, %v2347_v20  ;;  %v13919_v50 = vld [vmem:[#allocation69_spill] sm:$0xff]  ;;  %v13921_v62 = vld [vmem:[#allocation75_spill] sm:$0xff] }
 0x209   : > { %v3871_v0 = vadd.f32 %v9449_v61, %v3483_v56  ;;  %13912 = vst [vmem:[#allocation7_spill] sm:$0xff] %v11880_v33  ;;  %v13918_v61 = vld [vmem:[#allocation66_spill] sm:$0xff]  ;;  %v3484_v32 = vadd.f32 %v13919_v50, %v3096_v16  ;;  %v13920_v6 = vld [vmem:[#allocation72_spill] sm:$0xff]  ;;  %v3486_v40 = vadd.f32 %v13921_v62, %v3098_v9  ;;  %v13923_v22 = vld [vmem:[#allocation81_spill] sm:$0xff] }
 0x20a   : > { %v3711_v31 = vpop.f32.mrf.mxu0  ;;  %13917 = vst [vmem:[#allocation8_spill] sm:$0xff] %v11891_v11  ;;  %v3485_v56 = vadd.f32 %v13918_v61, %v3097_v48  ;;  %v3487_v39 = vadd.f32 %v13920_v6, %v3099_v47  ;;  %v13922_v60 = vld [vmem:[#allocation78_spill] sm:$0xff]  ;;  %v11902_v33 = vld [vmem:[%s13652_s4] ss:$0 sm:$0xff]  ;;  %v3488_v11 = vadd.f32 %v13923_v22, %v3100_v45  ;;  %v11905_v48 = vpop.f32.mrf.mxu1  ;;  %v11910_v47 = vadd.f32 %v11664_v46, %v3103_v13 }
 0x20b   : > { %v3908_v54 = vmul.f32 %v11869_v44, %v3871_v0  ;;  %v3870_v5 = vadd.f32 %v3711_v31, %v3482_v18  ;;  %v3489_v28 = vadd.f32 %v13922_v60, %v3101_v52  ;;  %v11913_v9 = vadd.f32 %v11670_v43, %v3102_v49  ;;  %v13924_v52 = vld [vmem:[#allocation79_spill] sm:$0xff]  ;;  %v13925_v46 = vld [vmem:[#allocation80_spill] sm:$0xff]  ;;  %v13926_v43 = vld [vmem:[#allocation82_spill] sm:$0xff] }
 0x20c   : > { %v9452_v20 = vpop.f32.mrf.mxu0  ;;  %v3104_v31 = vadd.f32 %v13924_v52, %v11781_v29  ;;  %v11918_v61 = vadd.f32 %v11676_v59, %v3105_v3  ;;  %v3107_v13 = vadd.f32 %v13925_v46, %v11785_v24  ;;  %v3106_v49 = vadd.f32 %v13926_v43, %v11791_v12  ;;  %v11929_v3 = vpop.f32.mrf.mxu1  ;;  %v13928_v24 = vld [vmem:[#allocation84_spill] sm:$0xff]  ;;  %v13929_v46 = vld [vmem:[#allocation85_spill] sm:$0xff] }
 0x20d   : > { %v3945_v18 = vadd.f32 %v11888_v8, %v3908_v54  ;;  %v3907_v16 = vmul.f32 %v11869_v44, %v3870_v5  ;;  %v3873_v0 = vadd.f32 %v9452_v20, %v3485_v56  ;;  %v13927_v5 = vld [vmem:[#allocation83_spill] sm:$0xff] }
 0x20e   : > { %v3721_v45 = vpop.f32.mrf.mxu0  ;;  %v3109_v29 = vadd.f32 %v13927_v5, %v11795_v4  ;;  %v11934_v22 = vadd.f32 %v11682_v36, %v3104_v31  ;;  %v11945_v36 = vadd.f32 %v11732_v38, %v3106_v49  ;;  %v3111_v38 = vadd.f32 %v13929_v46, %v11806_v53 }
 0x20f   : > { %vm3977_vm2 = vcmp.ge.f32.partialorder %v3945_v18, 0.0  ;;  %v4016_v50 = vmul.f32 %v11902_v33, %v3945_v18  ;;  %v3944_v54 = vadd.f32 %v11888_v8, %v3907_v16  ;;  %v3910_v56 = vmul.f32 %v11869_v44, %v3873_v0 }
 0x210   : > { %v3872_v6 = vadd.f32 %v3721_v45, %v3484_v32  ;;  %v9455_v59 = vpop.f32.mrf.mxu0  ;;  %v3108_v16 = vadd.f32 %v13928_v24, %v11802_v25  ;;  %v11942_v45 = vadd.f32 %v11702_v21, %v3107_v13 }
 0x211   : > { %v4048_v62 = vsel %vm3977_vm2, %v3945_v18, %v4016_v50  ;;  %vm3976_vm3 = vcmp.ge.f32.partialorder %v3944_v54, 0.0  ;;  %v4015_v60 = vmul.f32 %v11902_v33, %v3944_v54  ;;  %v3947_v20 = vadd.f32 %v11888_v8, %v3910_v56 }
 0x212   : > { %4135 = vst.msk [vmem:[#allocation3 + $0x21] sm:$0xff] %vm385_vm0, %v4048_v62  ;;  %v3909_v12 = vmul.f32 %v11869_v44, %v3872_v6  ;;  %v3875_v4 = vadd.f32 %v9455_v59, %v3487_v39  ;;  %v3731_v32 = vpop.f32.mrf.mxu0  ;;  %v11951_v39 = vadd.f32 %v11757_v42, %v3109_v29  ;;  %v11964_v42 = vld [vmem:[%s13653_s5 + $0x58] sm:$0xff]  ;;  %v11967_v5 = vadd.f32 %v11788_v63, %v3108_v16  ;;  %v13930_v6 = vld [vmem:[#allocation86_spill] sm:$0xff] }
 0x213   : > { %v4047_v0 = vsel %vm3976_vm3, %v3944_v54, %v4015_v60  ;;  %vm3979_vm4 = vcmp.ge.f32.partialorder %v3947_v20, 0.0  ;;  %v4018_v18 = vmul.f32 %v11902_v33, %v3947_v20  ;;  %v3874_v52 = vadd.f32 %v3731_v32, %v3486_v40  ;;  %v11953_v54 = vpop.f32.mrf.mxu1  ;;  %9755 = vmatprep.subr.mxu0 %v11964_v42 }
 0x214   : > { %4134 = vst.msk [vmem:[#allocation3 + $0x19] sm:$0xff] %vm385_vm0, %v4047_v0  ;;  %v3946_v25 = vadd.f32 %v11888_v8, %v3909_v12  ;;  %v3912_v31 = vmul.f32 %v11869_v44, %v3875_v4  ;;  %v9458_v50 = vpop.f32.mrf.mxu0  ;;  %v3110_v59 = vadd.f32 %v13930_v6, %v11809_v41  ;;  %v11982_v12 = vadd.f32 %v11837_v34, %v3111_v38  ;;  %v13931_v41 = vld [vmem:[#allocation87_spill] sm:$0xff] }
 0x215   : > { %v4050_v56 = vsel %vm3979_vm4, %v3947_v20, %v4018_v18  ;;  %v3911_v40 = vmul.f32 %v11869_v44, %v3874_v52  ;;  %v3877_v21 = vadd.f32 %v9458_v50, %v3489_v28  ;;  %v11975_v24 = vpop.f32.mrf.mxu1  ;;  %v3113_v4 = vadd.f32 %v13931_v41, %v11814_v58  ;;  %v13932_v58 = vld [vmem:[#allocation88_spill] sm:$0xff] }
 0x216   : > { %4137 = vst.msk [vmem:[#allocation3 + $0x39] sm:$0xff] %vm385_vm0, %v4050_v56  ;;  %vm3978_vm5 = vcmp.ge.f32.partialorder %v3946_v25, 0.0  ;;  %v4017_v13 = vmul.f32 %v11902_v33, %v3946_v25  ;;  %v3949_v43 = vadd.f32 %v11888_v8, %v3912_v31  ;;  %v3741_v49 = vpop.f32.mrf.mxu0 }
 0x217   : > { %v3948_v28 = vadd.f32 %v11888_v8, %v3911_v40  ;;  %v3914_v53 = vmul.f32 %v11869_v44, %v3877_v21  ;;  %v3876_v29 = vadd.f32 %v3741_v49, %v3488_v11  ;;  %v3112_v40 = vadd.f32 %v13932_v58, %v11817_v1 }
 0x218   : > { %v4049_v62 = vsel %vm3978_vm5, %v3946_v25, %v4017_v13  ;;  %vm3981_vm6 = vcmp.ge.f32.partialorder %v3949_v43, 0.0  ;;  %v4020_v60 = vmul.f32 %v11902_v33, %v3949_v43  ;;  %v9461_v20 = vpop.f32.mrf.mxu0  ;;  %v12007_v13 = vpop.f32.mrf.mxu1 }
 0x219   : > { %4136 = vst.msk [vmem:[#allocation3 + $0x31] sm:$0xff] %vm385_vm0, %v4049_v62  ;;  %vm3980_vm7 = vcmp.ge.f32.partialorder %v3948_v28, 0.0  ;;  %v4019_v63 = vmul.f32 %v11902_v33, %v3948_v28  ;;  %v3951_v16 = vadd.f32 %v11888_v8, %v3914_v53  ;;  %v3913_v11 = vmul.f32 %v11869_v44, %v3876_v29  ;;  %v12005_v38 = vld [vmem:[#allocation3 + $0x21] sm:$0xff] }
 0x21a   : > { %v4052_v32 = vsel %vm3981_vm6, %v3949_v43, %v4020_v60  ;;  %v3879_v0 = vadd.f32 %v9461_v20, %v11910_v47  ;;  %v3751_v18 = vpop.f32.mrf.mxu0 }
 0x21b   : > { %4139 = vst.msk [vmem:[#allocation3 + $0x51] sm:$0xff] %vm385_vm0, %v4052_v32  ;;  %v4051_v52 = vsel %vm3980_vm7, %v3948_v28, %v4019_v63  ;;  %vm3983_vm8 = vcmp.ge.f32.partialorder %v3951_v16, 0.0  ;;  %v4022_v25 = vmul.f32 %v11902_v33, %v3951_v16  ;;  %v3950_v31 = vadd.f32 %v11888_v8, %v3913_v11  ;;  %v11990_v50 = vld [vmem:[#allocation3 + $0x19] sm:$0xff] }
 0x21c   : > { %v11992_v56 = vld [vmem:[#allocation3 + $0x18] sm:$0xff]  ;;  %v11994_v34 = vld [vmem:[#allocation3 + $0x20] sm:$0xff]  ;;  %4138 = vst.msk [vmem:[#allocation3 + $0x49] sm:$0xff] %vm385_vm0, %v4051_v52  ;;  %v3916_v47 = vmul.f32 %v11869_v44, %v3879_v0  ;;  %v3878_v21 = vadd.f32 %v3751_v18, %v11913_v9  ;;  %v9464_v46 = vpop.f32.mrf.mxu0  ;;  %9502 = vmatprep.mubr.msk.f32.mxu1 %vm385_vm0, %v11990_v50  ;;  %v12016_v9 = vadd.f32 %v11876_v15, %v3110_v59 }
 0x21d   : > { %9554 = vmatprep.mubr.msk.f32.mxu0 %vm385_vm0, %v11992_v56  ;;  %v4054_v43 = vsel %vm3983_vm8, %v3951_v16, %v4022_v25  ;;  %vm3982_vm9 = vcmp.ge.f32.partialorder %v3950_v31, 0.0  ;;  %v4021_v1 = vmul.f32 %v11902_v33, %v3950_v31  ;;  %v3881_v49 = vadd.f32 %v9464_v46, %v11918_v61  ;;  %9503 = vmatmul.mubr.msk.f32.gmra.mxu1 %vm385_vm0, %v12005_v38  ;;  %v13933_v61 = vld [vmem:[#allocation89_spill] sm:$0xff]  ;;  %v13934_v18 = vld [vmem:[#allocation90_spill] sm:$0xff] }
 0x21e   : > { %9555 = vmatmul.mubr.msk.f32.gmra.mxu0 %vm385_vm0, %v11994_v34  ;;  %v12019_v28 = vadd.f32 %v11905_v48, %v3113_v4  ;;  %4141 = vst.msk [vmem:[#allocation3 + $0x69] sm:$0xff] %vm385_vm0, %v4054_v43  ;;  %v3953_v53 = vadd.f32 %v11888_v8, %v3916_v47  ;;  %v3915_v29 = vmul.f32 %v11869_v44, %v3878_v21  ;;  %v3761_v6 = vpop.f32.mrf.mxu0  ;;  %v12040_v4 = vpop.f32.mrf.mxu1  ;;  %v12049_v0 = vld [vmem:[#allocation3 + $0x39] sm:$0xff] }
 0x21f   : > { %v3115_v62 = vadd.f32 %v13933_v61, %v11821_v23  ;;  %v4053_v60 = vsel %vm3982_vm9, %v3950_v31, %v4021_v1  ;;  %v3918_v20 = vmul.f32 %v11869_v44, %v3881_v49  ;;  %v3880_v63 = vadd.f32 %v3761_v6, %v11934_v22 }
 0x220   : > { %v12029_v15 = vadd.f32 %v11929_v3, %v3112_v40  ;;  %4140 = vst.msk [vmem:[#allocation3 + $0x61] sm:$0xff] %vm385_vm0, %v4053_v60  ;;  %vm3985_vm10 = vcmp.ge.f32.partialorder %v3953_v53, 0.0  ;;  %v4024_v48 = vmul.f32 %v11902_v33, %v3953_v53  ;;  %v3952_v59 = vadd.f32 %v11888_v8, %v3915_v29  ;;  %v9467_v16 = vpop.f32.mrf.mxu0  ;;  %v12034_v11 = vld [vmem:[#allocation3 + $0x31] sm:$0xff]  ;;  %v12076_v29 = vpop.f32.mrf.mxu1 }
 0x221   : > { %v12036_v41 = vld [vmem:[#allocation3 + $0x30] sm:$0xff]  ;;  %v12038_v23 = vld [vmem:[#allocation3 + $0x38] sm:$0xff]  ;;  %v3955_v22 = vadd.f32 %v11888_v8, %v3918_v20  ;;  %v3917_v3 = vmul.f32 %v11869_v44, %v3880_v63  ;;  %v3883_v32 = vadd.f32 %v9467_v16, %v11942_v45  ;;  %9505 = vmatprep.mubr.msk.f32.mxu1 %vm385_vm0, %v12034_v11  ;;  %v3114_v52 = vadd.f32 %v13934_v18, %v11824_v14 }
 0x222   : > { %9557 = vmatprep.mubr.msk.f32.mxu0 %vm385_vm0, %v12036_v41  ;;  %v4056_v25 = vsel %vm3985_vm10, %v3953_v53, %v4024_v48  ;;  %vm3984_vm11 = vcmp.ge.f32.partialorder %v3952_v59, 0.0  ;;  %v4023_v31 = vmul.f32 %v11902_v33, %v3952_v59  ;;  %9506 = vmatmul.mubr.msk.f32.gmra.mxu1 %vm385_vm0, %v12049_v0  ;;  %v3771_v45 = vpop.f32.mrf.mxu0  ;;  %v12069_v43 = vadd.f32 %v11953_v54, %v3115_v62  ;;  %v12081_v62 = vld [vmem:[#allocation3 + $0x51] sm:$0xff] }
 0x223   : > { %9558 = vmatmul.mubr.msk.f32.gmra.mxu0 %vm385_vm0, %v12038_v23  ;;  %4143 = vst.msk [vmem:[#allocation3 + $0x81] sm:$0xff] %vm385_vm0, %v4056_v25  ;;  %vm3987_vm12 = vcmp.ge.f32.partialorder %v3955_v22, 0.0  ;;  %v4026_v58 = vmul.f32 %v11902_v33, %v3955_v22  ;;  %v3954_v40 = vadd.f32 %v11888_v8, %v3917_v3  ;;  %v3920_v14 = vmul.f32 %v11869_v44, %v3883_v32  ;;  %v12062_v47 = vld [vmem:[#allocation3 + $0x49] sm:$0xff]  ;;  %v12112_v25 = vpop.f32.mrf.mxu1 }
 0x224   : > { %v12064_v21 = vld [vmem:[#allocation3 + $0x48] sm:$0xff]  ;;  %v12066_v46 = vld [vmem:[#allocation3 + $0x50] sm:$0xff]  ;;  %v4055_v1 = vsel %vm3984_vm11, %v3952_v59, %v4023_v31  ;;  %v3882_v49 = vadd.f32 %v3771_v45, %v11945_v36  ;;  %v9470_v53 = vpop.f32.mrf.mxu0  ;;  %9508 = vmatprep.mubr.msk.f32.mxu1 %vm385_vm0, %v12062_v47  ;;  %v3117_v36 = vadd.f32 %v11692_v2, %v11830_v30 }
 0x225   : > { %9560 = vmatprep.mubr.msk.f32.mxu0 %vm385_vm0, %v12064_v21  ;;  %4142 = vst.msk [vmem:[#allocation3 + $0x79] sm:$0xff] %vm385_vm0, %v4055_v1  ;;  %v4058_v6 = vsel %vm3987_vm12, %v3955_v22, %v4026_v58  ;;  %vm3986_vm13 = vcmp.ge.f32.partialorder %v3954_v40, 0.0  ;;  %v4025_v61 = vmul.f32 %v11902_v33, %v3954_v40  ;;  %v3957_v54 = vadd.f32 %v11888_v8, %v3920_v14  ;;  %v12116_v45 = vld [vmem:[#allocation3 + $0x69] sm:$0xff] }
 0x226   : > { %4145 = vst.msk [vmem:[#allocation3 + $0x99] sm:$0xff] %vm385_vm0, %v4058_v6  ;;  %v3919_v60 = vmul.f32 %v11869_v44, %v3882_v49  ;;  %v3885_v20 = vadd.f32 %v9470_v53, %v11951_v39  ;;  %9509 = vmatmul.mubr.msk.f32.gmra.mxu1 %vm385_vm0, %v12081_v62  ;;  %v3781_v63 = vpop.f32.mrf.mxu0  ;;  %v3116_v39 = vadd.f32 %v11711_v51, %v11833_v10 }
 0x227   : > { %9561 = vmatmul.mubr.msk.f32.gmra.mxu0 %vm385_vm0, %v12066_v46  ;;  %v4057_v48 = vsel %vm3986_vm13, %v3954_v40, %v4025_v61  ;;  %vm3989_vm14 = vcmp.ge.f32.partialorder %v3957_v54, 0.0  ;;  %v4028_v59 = vmul.f32 %v11902_v33, %v3957_v54  ;;  %v3884_v16 = vadd.f32 %v3781_v63, %v11967_v5  ;;  %v12094_v2 = vld [vmem:[#allocation3 + $0x61] sm:$0xff] }
 0x228   : > { %v12096_v30 = vld [vmem:[#allocation3 + $0x60] sm:$0xff]  ;;  %v12098_v22 = vld [vmem:[#allocation3 + $0x68] sm:$0xff]  ;;  %4144 = vst.msk [vmem:[#allocation3 + $0x91] sm:$0xff] %vm385_vm0, %v4057_v48  ;;  %v3956_v3 = vadd.f32 %v11888_v8, %v3919_v60  ;;  %v3922_v32 = vmul.f32 %v11869_v44, %v3885_v20  ;;  %v9473_v18 = vpop.f32.mrf.mxu0  ;;  %9511 = vmatprep.mubr.msk.f32.mxu1 %vm385_vm0, %v12094_v2  ;;  %v12110_v5 = vadd.f32 %v11975_v24, %v3114_v52 }
 0x229   : > { %9563 = vmatprep.mubr.msk.f32.mxu0 %vm385_vm0, %v12096_v30  ;;  %v4060_v31 = vsel %vm3989_vm14, %v3957_v54, %v4028_v59  ;;  %v3921_v51 = vmul.f32 %v11869_v44, %v3884_v16  ;;  %v3887_v10 = vadd.f32 %v9473_v18, %v11982_v12  ;;  %v12119_v58 = vadd.f32 %v12007_v13, %v3117_v36 }
 0x22a   : > { %4147 = vst.msk [vmem:[#allocation3 + $0xb1] sm:$0xff] %vm385_vm0, %v4060_v31  ;;  %vm3988_vm15 = vcmp.ge.f32.partialorder %v3956_v3, 0.0  ;;  %v4027_v40 = vmul.f32 %v11902_v33, %v3956_v3  ;;  %v3959_v24 = vadd.f32 %v11888_v8, %v3922_v32  ;;  %9512 = vmatmul.mubr.msk.f32.gmra.mxu1 %vm385_vm0, %v12116_v45  ;;  %v3791_v52 = vpop.f32.mrf.mxu0  ;;  %v3119_v12 = vadd.f32 %v11723_v55, %v11841_v19  ;;  %v12143_v55 = vpop.f32.mrf.mxu1  ;;  %v12153_v20 = vld [vmem:[#allocation3 + $0x81] sm:$0xff] }
 0x22b   : > { %9564 = vmatmul.mubr.msk.f32.gmra.mxu0 %vm385_vm0, %v12098_v22  ;;  %v3958_v13 = vadd.f32 %v11888_v8, %v3921_v51  ;;  %v3924_v14 = vmul.f32 %v11869_v44, %v3887_v10  ;;  %v3886_v1 = vadd.f32 %v3791_v52, %v12016_v9  ;;  %v12134_v49 = vadd.f32 %v12040_v4, %v3116_v39 }
 0x22c   : > { %v4059_v53 = vsel %vm3988_vm15, %v3956_v3, %v4027_v40  ;;  %vm3991_vm1 = vcmp.ge.f32.partialorder %v3959_v24, 0.0  ;;  %v4030_v6 = vmul.f32 %v11902_v33, %v3959_v24  ;;  %v9476_v61 = vpop.f32.mrf.mxu0  ;;  %v12137_v54 = vld [vmem:[#allocation3 + $0x79] sm:$0xff]  ;;  %v3118_v63 = vadd.f32 %v11739_v17, %v11844_v57  ;;  %v12182_v40 = vpop.f32.mrf.mxu1 }
 0x22d   : > { %v12139_v36 = vld [vmem:[#allocation3 + $0x78] sm:$0xff]  ;;  %v12141_v60 = vld [vmem:[#allocation3 + $0x80] sm:$0xff]  ;;  %4146 = vst.msk [vmem:[#allocation3 + $0xa9] sm:$0xff] %vm385_vm0, %v4059_v53  ;;  %vm3990_vm2 = vcmp.ge.f32.partialorder %v3958_v13, 0.0  ;;  %v4029_v19 = vmul.f32 %v11902_v33, %v3958_v13  ;;  %v3961_v9 = vadd.f32 %v11888_v8, %v3924_v14  ;;  %v3923_v4 = vmul.f32 %v11869_v44, %v3886_v1  ;;  %9514 = vmatprep.mubr.msk.f32.mxu1 %vm385_vm0, %v12137_v54 }
 0x22e   : > { %9566 = vmatprep.mubr.msk.f32.mxu0 %vm385_vm0, %v12139_v36  ;;  %v4062_v48 = vsel %vm3991_vm1, %v3959_v24, %v4030_v6  ;;  %v3889_v59 = vadd.f32 %v9476_v61, %v12019_v28  ;;  %9515 = vmatmul.mubr.msk.f32.gmra.mxu1 %vm385_vm0, %v12153_v20  ;;  %v3801_v16 = vpop.f32.mrf.mxu0  ;;  %v12173_v18 = vadd.f32 %v12076_v29, %v3119_v12  ;;  %v12186_v12 = vld [vmem:[#allocation3 + $0x99] sm:$0xff] }
 0x22f   : > { %9567 = vmatmul.mubr.msk.f32.gmra.mxu0 %vm385_vm0, %v12141_v60  ;;  %4149 = vst.msk [vmem:[#allocation3 + $0xc9] sm:$0xff] %vm385_vm0, %v4062_v48  ;;  %v4061_v39 = vsel %vm3990_vm2, %v3958_v13, %v4029_v19  ;;  %vm3993_vm3 = vcmp.ge.f32.partialorder %v3961_v9, 0.0  ;;  %v4032_v3 = vmul.f32 %v11902_v33, %v3961_v9  ;;  %v3960_v32 = vadd.f32 %v11888_v8, %v3923_v4  ;;  %v12166_v17 = vld [vmem:[#allocation3 + $0x91] sm:$0xff] }
 0x230   : > { %v12168_v57 = vld [vmem:[#allocation3 + $0x90] sm:$0xff]  ;;  %v12170_v28 = vld [vmem:[#allocation3 + $0x98] sm:$0xff]  ;;  %4148 = vst.msk [vmem:[#allocation3 + $0xc1] sm:$0xff] %vm385_vm0, %v4061_v39  ;;  %v3926_v31 = vmul.f32 %v11869_v44, %v3889_v59  ;;  %v3888_v51 = vadd.f32 %v3801_v16, %v12029_v15  ;;  %v9479_v10 = vpop.f32.mrf.mxu0  ;;  %9517 = vmatprep.mubr.msk.f32.mxu1 %vm385_vm0, %v12166_v17  ;;  %v3121_v15 = vadd.f32 %v11749_v37, %v11848_v26 }
 0x231   : > { %9569 = vmatprep.mubr.msk.f32.mxu0 %vm385_vm0, %v12168_v57  ;;  %v4064_v24 = vsel %vm3993_vm3, %v3961_v9, %v4032_v3  ;;  %vm3992_vm4 = vcmp.ge.f32.partialorder %v3960_v32, 0.0  ;;  %v4031_v29 = vmul.f32 %v11902_v33, %v3960_v32  ;;  %v3891_v52 = vadd.f32 %v9479_v10, %v12069_v43 }
 0x232   : > { %4151 = vst.msk [vmem:[#allocation3 + $0xe1] sm:$0xff] %vm385_vm0, %v4064_v24  ;;  %v3963_v13 = vadd.f32 %v11888_v8, %v3926_v31  ;;  %v3925_v14 = vmul.f32 %v11869_v44, %v3888_v51  ;;  %9518 = vmatmul.mubr.msk.f32.gmra.mxu1 %vm385_vm0, %v12186_v12  ;;  %v3811_v1 = vpop.f32.mrf.mxu0  ;;  %v3506_v43 = vadd.f32 %v12112_v25, %v3118_v63  ;;  %v9439_v63 = vpop.f32.mrf.mxu1 }
 0x233   : > { %9570 = vmatmul.mubr.msk.f32.gmra.mxu0 %vm385_vm0, %v12170_v28  ;;  %v4063_v53 = vsel %vm3992_vm4, %v3960_v32, %v4031_v29  ;;  %v3928_v6 = vmul.f32 %v11869_v44, %v3891_v52  ;;  %v3890_v37 = vadd.f32 %v3811_v1, %v12110_v5  ;;  %v3120_v26 = vadd.f32 %v11764_v35, %v11851_v27  ;;  %v12218_v27 = vld [vmem:[#allocation3 + $0xb1] sm:$0xff]  ;;  %v13937_v29 = vld [vmem:[#allocation6_spill] sm:$0xff] }
 0x234   : > { %4150 = vst.msk [vmem:[#allocation3 + $0xd9] sm:$0xff] %vm385_vm0, %v4063_v53  ;;  %vm3995_vm5 = vcmp.ge.f32.partialorder %v3963_v13, 0.0  ;;  %v4034_v61 = vmul.f32 %v11902_v33, %v3963_v13  ;;  %v3962_v19 = vadd.f32 %v11888_v8, %v3925_v14  ;;  %v9482_v9 = vpop.f32.mrf.mxu0  ;;  %v12205_v4 = vld [vmem:[#allocation3 + $0xa9] sm:$0xff]  ;;  %v3509_v16 = vadd.f32 %v12143_v55, %v3121_v15  ;;  %v3463_v53 = vpop.f32.mrf.mxu1 }
 0x235   : > { %v12207_v48 = vld [vmem:[#allocation3 + $0xa8] sm:$0xff]  ;;  %v12209_v25 = vld [vmem:[#allocation3 + $0xb0] sm:$0xff]  ;;  %v3965_v5 = vadd.f32 %v11888_v8, %v3928_v6  ;;  %v3927_v59 = vmul.f32 %v11869_v44, %v3890_v37  ;;  %v3893_v35 = vadd.f32 %v9482_v9, %v12119_v58  ;;  %9520 = vmatprep.mubr.msk.f32.mxu1 %vm385_vm0, %v12205_v4 }
 0x236   : > { %9572 = vmatprep.mubr.msk.f32.mxu0 %vm385_vm0, %v12207_v48  ;;  %v4066_v39 = vsel %vm3995_vm5, %v3963_v13, %v4034_v61  ;;  %vm3994_vm6 = vcmp.ge.f32.partialorder %v3962_v19, 0.0  ;;  %v4033_v3 = vmul.f32 %v11902_v33, %v3962_v19  ;;  %9521 = vmatmul.mubr.msk.f32.gmra.mxu1 %vm385_vm0, %v12218_v27  ;;  %v3821_v58 = vpop.f32.mrf.mxu0  ;;  %v13938_v52 = vld [vmem:[#allocation24_spill] sm:$0xff] }
 0x237   : > { %9573 = vmatmul.mubr.msk.f32.gmra.mxu0 %vm385_vm0, %v12209_v25  ;;  %4153 = vst.msk [vmem:[#allocation3 + $0xf9] sm:$0xff] %vm385_vm0, %v4066_v39  ;;  %vm3997_vm7 = vcmp.ge.f32.partialorder %v3965_v5, 0.0  ;;  %v4036_v32 = vmul.f32 %v11902_v33, %v3965_v5  ;;  %v3964_v31 = vadd.f32 %v11888_v8, %v3927_v59  ;;  %v3930_v55 = vmul.f32 %v11869_v44, %v3893_v35  ;;  %v12230_v51 = vld [vmem:[#allocation3 + $0xc1] sm:$0xff]  ;;  %v12246_v9 = vld [vmem:[#allocation3 + $0xc9] sm:$0xff] }
 0x238   : > { %v12232_v10 = vld [vmem:[#allocation3 + $0xc0] sm:$0xff]  ;;  %v12234_v24 = vld [vmem:[#allocation3 + $0xc8] sm:$0xff]  ;;  %v3123_v15 = vadd.f32 %v13938_v52, %v13937_v29  ;;  %v4065_v13 = vsel %vm3994_vm6, %v3962_v19, %v4033_v3  ;;  %v3892_v14 = vadd.f32 %v3821_v58, %v12134_v49  ;;  %v9485_v1 = vpop.f32.mrf.mxu0  ;;  %9523 = vmatprep.mubr.msk.f32.mxu1 %vm385_vm0, %v12230_v51  ;;  %v13939_v49 = vld [vmem:[#allocation4_spill] sm:$0xff] }
 0x239   : > { %13935 = vst [vmem:[#allocation9_spill] sm:$0xff] %v12232_v10  ;;  %13936 = vst [vmem:[#allocation10_spill] sm:$0xff] %v12234_v24  ;;  %9575 = vmatprep.mubr.msk.f32.mxu0 %vm385_vm0, %v12232_v10  ;;  %v4068_v6 = vsel %vm3997_vm7, %v3965_v5, %v4036_v32  ;;  %vm3996_vm8 = vcmp.ge.f32.partialorder %v3964_v31, 0.0  ;;  %v4035_v37 = vmul.f32 %v11902_v33, %v3964_v31 }
 0x23a   : > { %4152 = vst.msk [vmem:[#allocation3 + $0xf1] sm:$0xff] %vm385_vm0, %v4065_v13  ;;  %v3967_v61 = vadd.f32 %v11888_v8, %v3930_v55  ;;  %v3122_v19 = vadd.f32 %v13939_v49, %v11872_v7  ;;  %4155 = vst.msk [vmem:[#allocation3 + $0x111] sm:$0xff] %vm385_vm0, %v4068_v6  ;;  %v3929_v59 = vmul.f32 %v11869_v44, %v3892_v14  ;;  %9524 = vmatmul.mubr.msk.f32.gmra.mxu1 %vm385_vm0, %v12246_v9  ;;  %v3831_v5 = vpop.f32.mrf.mxu0 }
 0x23b   : > { %v3895_v35 = vadd.f32 %v9485_v1, %v12173_v18  ;;  %9576 = vmatmul.mubr.msk.f32.gmra.mxu0 %vm385_vm0, %v12234_v24  ;;  %v4067_v39 = vsel %vm3996_vm8, %v3964_v31, %v4035_v37  ;;  %v3894_v58 = vadd.f32 %v3831_v5, %v3506_v43  ;;  %v12258_v32 = vld [vmem:[#allocation3 + $0xd9] sm:$0xff]  ;;  %v3508_v18 = vadd.f32 %v12182_v40, %v3120_v26  ;;  %v9442_v31 = vpop.f32.mrf.mxu1  ;;  %v12273_v40 = vld [vmem:[#allocation3 + $0xe1] sm:$0xff] }
 0x23c   : > { %vm3999_vm9 = vcmp.ge.f32.partialorder %v3967_v61, 0.0  ;;  %v4038_v3 = vmul.f32 %v11902_v33, %v3967_v61  ;;  %v12260_v7 = vld [vmem:[#allocation3 + $0xd8] sm:$0xff]  ;;  %v12262_v55 = vld [vmem:[#allocation3 + $0xe0] sm:$0xff]  ;;  %4154 = vst.msk [vmem:[#allocation3 + $0x109] sm:$0xff] %vm385_vm0, %v4067_v39  ;;  %v3966_v29 = vadd.f32 %v11888_v8, %v3929_v59  ;;  %v9488_v13 = vpop.f32.mrf.mxu0  ;;  %9526 = vmatprep.mubr.msk.f32.mxu1 %vm385_vm0, %v12258_v32  ;;  %v3511_v43 = vadd.f32 %v9439_v63, %v3123_v15  ;;  %v13943_v26 = vld [vmem:[#allocation7_spill] sm:$0xff] }
 0x23d   : > { %13940 = vst [vmem:[#allocation11_spill] sm:$0xff] %v12260_v7  ;;  %13941 = vst [vmem:[#allocation13_spill] sm:$0xff] %v12262_v55  ;;  %v3932_v52 = vmul.f32 %v11869_v44, %v3895_v35  ;;  %9578 = vmatprep.mubr.msk.f32.mxu0 %vm385_vm0, %v12260_v7  ;;  %v3931_v1 = vmul.f32 %v11869_v44, %v3894_v58  ;;  %v3897_v6 = vadd.f32 %v9488_v13, %v3509_v16  ;;  %v13944_v37 = vld [vmem:[#allocation26_spill] sm:$0xff]  ;;  %v13945_v39 = vld [vmem:[#allocation8_spill] sm:$0xff] }
 0x23e   : > { %v4070_v14 = vsel %vm3999_vm9, %v3967_v61, %v4038_v3  ;;  %13942 = vst [vmem:[#allocation12_spill] sm:$0xff] %v12273_v40  ;;  %v3125_v49 = vadd.f32 %v13944_v37, %v13943_v26  ;;  %vm3998_vm10 = vcmp.ge.f32.partialorder %v3966_v29, 0.0  ;;  %v4037_v59 = vmul.f32 %v11902_v33, %v3966_v29  ;;  %9527 = vmatmul.mubr.msk.f32.gmra.mxu1 %vm385_vm0, %v12273_v40  ;;  %v3841_v63 = vpop.f32.mrf.mxu0  ;;  %v13946_v3 = vld [vmem:[#allocation5_spill] sm:$0xff] }
 0x23f   : > { %4157 = vst.msk [vmem:[#allocation3 + $0x129] sm:$0xff] %vm385_vm0, %v4070_v14  ;;  %v3969_v35 = vadd.f32 %v11888_v8, %v3932_v52  ;;  %9579 = vmatmul.mubr.msk.f32.gmra.mxu0 %vm385_vm0, %v12262_v55  ;;  %v3510_v16 = vadd.f32 %v3463_v53, %v3122_v19  ;;  %v3968_v15 = vadd.f32 %v11888_v8, %v3931_v1  ;;  %v3473_v53 = vpop.f32.mrf.mxu1  ;;  %v12303_v1 = vld [vmem:[#allocation3 + $0xf9] sm:$0xff] }
 0x240   : > { %v3934_v61 = vmul.f32 %v11869_v44, %v3897_v6  ;;  %v3896_v5 = vadd.f32 %v3841_v63, %v3508_v18  ;;  %v3124_v58 = vadd.f32 %v13946_v3, %v13945_v39  ;;  %v4069_v13 = vsel %vm3998_vm10, %v3966_v29, %v4037_v59  ;;  %v9491_v14 = vpop.f32.mrf.mxu0 }
 0x241   : > { %vm4001_vm11 = vcmp.ge.f32.partialorder %v3969_v35, 0.0  ;;  %v4040_v52 = vmul.f32 %v11902_v33, %v3969_v35  ;;  %v12289_v26 = vld [vmem:[#allocation3 + $0xf1] sm:$0xff]  ;;  %4156 = vst.msk [vmem:[#allocation3 + $0x121] sm:$0xff] %vm385_vm0, %v4069_v13  ;;  %vm4000_vm12 = vcmp.ge.f32.partialorder %v3968_v15, 0.0  ;;  %v4039_v19 = vmul.f32 %v11902_v33, %v3968_v15 }
 0x242   : > { %v12291_v37 = vld [vmem:[#allocation3 + $0xf0] sm:$0xff]  ;;  %v12293_v40 = vld [vmem:[#allocation3 + $0xf8] sm:$0xff]  ;;  %v3971_v18 = vadd.f32 %v11888_v8, %v3934_v61  ;;  %v3933_v29 = vmul.f32 %v11869_v44, %v3896_v5  ;;  %9529 = vmatprep.mubr.msk.f32.mxu1 %vm385_vm0, %v12289_v26  ;;  %v3513_v6 = vadd.f32 %v9442_v31, %v3125_v49  ;;  %v3899_v63 = vadd.f32 %v9491_v14, %v3511_v43  ;;  %v3851_v61 = vpop.f32.mrf.mxu0 }
 0x243   : > { %13947 = vst [vmem:[#allocation14_spill] sm:$0xff] %v12291_v37  ;;  %13948 = vst [vmem:[#allocation16_spill] sm:$0xff] %v12293_v40  ;;  %9581 = vmatprep.mubr.msk.f32.mxu0 %vm385_vm0, %v12291_v37  ;;  %v4072_v59 = vsel %vm4001_vm11, %v3969_v35, %v4040_v52  ;;  %9530 = vmatmul.mubr.msk.f32.gmra.mxu1 %vm385_vm0, %v12303_v1  ;;  %v4071_v5 = vsel %vm4000_vm12, %v3968_v15, %v4039_v19  ;;  %v12313_v13 = vld [vmem:[#allocation3 + $0x109] sm:$0xff] }
 0x244   : > { %9582 = vmatmul.mubr.msk.f32.gmra.mxu0 %vm385_vm0, %v12293_v40  ;;  %4159 = vst.msk [vmem:[#allocation3 + $0x141] sm:$0xff] %vm385_vm0, %v4072_v59  ;;  %vm4003_vm13 = vcmp.ge.f32.partialorder %v3971_v18, 0.0  ;;  %v4042_v39 = vmul.f32 %v11902_v33, %v3971_v18  ;;  %v3970_v3 = vadd.f32 %v11888_v8, %v3933_v29  ;;  %v12315_v31 = vld [vmem:[#allocation3 + $0x108] sm:$0xff]  ;;  %v12317_v43 = vld [vmem:[#allocation3 + $0x110] sm:$0xff]  ;;  %v3512_v49 = vadd.f32 %v3473_v53, %v3124_v58  ;;  %v9494_v14 = vpop.f32.mrf.mxu0 }
 0x245   : > { %13949 = vst [vmem:[#allocation15_spill] sm:$0xff] %v12315_v31  ;;  %13950 = vst [vmem:[#allocation17_spill] sm:$0xff] %v12317_v43  ;;  %v3936_v35 = vmul.f32 %v11869_v44, %v3899_v63  ;;  %v3898_v52 = vadd.f32 %v3851_v61, %v3510_v16  ;;  %9532 = vmatprep.mubr.msk.f32.mxu1 %vm385_vm0, %v12313_v13  ;;  %9584 = vmatprep.mubr.msk.f32.mxu0 %vm385_vm0, %v12315_v31  ;;  %v12326_v59 = vld [vmem:[#allocation3 + $0x111] sm:$0xff] }
 0x246   : > { %4158 = vst.msk [vmem:[#allocation3 + $0x139] sm:$0xff] %vm385_vm0, %v4071_v5  ;;  %v4074_v15 = vsel %vm4003_vm13, %v3971_v18, %v4042_v39  ;;  %vm4002_vm14 = vcmp.ge.f32.partialorder %v3970_v3, 0.0  ;;  %v4041_v19 = vmul.f32 %v11902_v33, %v3970_v3  ;;  %v3901_v29 = vadd.f32 %v9494_v14, %v3513_v6  ;;  %v3861_v53 = vpop.f32.mrf.mxu0 }
 0x247   : > { %4161 = vst.msk [vmem:[#allocation3 + $0x159] sm:$0xff] %vm385_vm0, %v4074_v15  ;;  %v3973_v58 = vadd.f32 %v11888_v8, %v3936_v35  ;;  %v3935_v16 = vmul.f32 %v11869_v44, %v3898_v52  ;;  %9533 = vmatmul.mubr.msk.f32.gmra.mxu1 %vm385_vm0, %v12326_v59  ;;  %v3900_v61 = vadd.f32 %v3861_v53, %v3512_v49  ;;  %v12351_v49 = vld [vmem:[#allocation3 + $0x129] sm:$0xff] }
 0x248   : > { %9585 = vmatmul.mubr.msk.f32.gmra.mxu0 %vm385_vm0, %v12317_v43  ;;  %v4073_v18 = vsel %vm4002_vm14, %v3970_v3, %v4041_v19  ;;  %v3938_v63 = vmul.f32 %v11869_v44, %v3901_v29  ;;  %v12339_v39 = vld [vmem:[#allocation3 + $0x121] sm:$0xff] }
 0x249   : > { %4160 = vst.msk [vmem:[#allocation3 + $0x151] sm:$0xff] %vm385_vm0, %v4073_v18  ;;  %vm4005_vm15 = vcmp.ge.f32.partialorder %v3973_v58, 0.0  ;;  %v4044_v6 = vmul.f32 %v11902_v33, %v3973_v58  ;;  %v3972_v5 = vadd.f32 %v11888_v8, %v3935_v16  ;;  %v12341_v35 = vld [vmem:[#allocation3 + $0x120] sm:$0xff]  ;;  %v12343_v52 = vld [vmem:[#allocation3 + $0x128] sm:$0xff]  ;;  %v3937_v3 = vmul.f32 %v11869_v44, %v3900_v61  ;;  %9535 = vmatprep.mubr.msk.f32.mxu1 %vm385_vm0, %v12339_v39 }
 0x24a   : > { %13951 = vst [vmem:[#allocation19_spill] sm:$0xff] %v12341_v35  ;;  %13952 = vst [vmem:[#allocation18_spill] sm:$0xff] %v12343_v52  ;;  %v3975_v14 = vadd.f32 %v11888_v8, %v3938_v63  ;;  %9587 = vmatprep.mubr.msk.f32.mxu0 %vm385_vm0, %v12341_v35 }
 0x24b   : > { %v4076_v15 = vsel %vm4005_vm15, %v3973_v58, %v4044_v6  ;;  %vm4004_vm1 = vcmp.ge.f32.partialorder %v3972_v5, 0.0  ;;  %v4043_v19 = vmul.f32 %v11902_v33, %v3972_v5  ;;  %9536 = vmatmul.mubr.msk.f32.gmra.mxu1 %vm385_vm0, %v12351_v49  ;;  %v3974_v29 = vadd.f32 %v11888_v8, %v3937_v3  ;;  %v12373_v8 = vld [vmem:[#allocation3 + $0x141] sm:$0xff] }
 0x24c   : > { %9588 = vmatmul.mubr.msk.f32.gmra.mxu0 %vm385_vm0, %v12343_v52  ;;  %4163 = vst.msk [vmem:[#allocation3 + $0x171] sm:$0xff] %vm385_vm0, %v4076_v15  ;;  %vm4007_vm2 = vcmp.ge.f32.partialorder %v3975_v14, 0.0  ;;  %v4046_v44 = vmul.f32 %v11902_v33, %v3975_v14 }
 0x24d   : > { %v12361_v16 = vld [vmem:[#allocation3 + $0x139] sm:$0xff]  ;;  %v4075_v18 = vsel %vm4004_vm1, %v3972_v5, %v4043_v19  ;;  %vm4006_vm3 = vcmp.ge.f32.partialorder %v3974_v29, 0.0  ;;  %v4045_v61 = vmul.f32 %v11902_v33, %v3974_v29 }
 0x24e   : > { %v12363_v53 = vld [vmem:[#allocation3 + $0x138] sm:$0xff]  ;;  %v12365_v58 = vld [vmem:[#allocation3 + $0x140] sm:$0xff]  ;;  %9538 = vmatprep.mubr.msk.f32.mxu1 %vm385_vm0, %v12361_v16  ;;  %4162 = vst.msk [vmem:[#allocation3 + $0x169] sm:$0xff] %vm385_vm0, %v4075_v18  ;;  %v4078_v63 = vsel %vm4007_vm2, %v3975_v14, %v4046_v44 }
 0x24f   : > { %13953 = vst [vmem:[#allocation20_spill] sm:$0xff] %v12363_v53  ;;  %13954 = vst [vmem:[#allocation22_spill] sm:$0xff] %v12365_v58  ;;  %9590 = vmatprep.mubr.msk.f32.mxu0 %vm385_vm0, %v12363_v53  ;;  %9539 = vmatmul.mubr.msk.f32.gmra.mxu1 %vm385_vm0, %v12373_v8  ;;  %v4077_v6 = vsel %vm4006_vm3, %v3974_v29, %v4045_v61  ;;  %v12391_v33 = vld [vmem:[#allocation3 + $0x159] sm:$0xff]  ;;  %v4877_v14 = vld [vmem:[#allocation3 + $0x2] sm:$0xff] }
 0x250   : > { %4165 = vst.msk [vmem:[#allocation3 + $0x189] sm:$0xff] %vm385_vm0, %v4078_v63  ;;  %9591 = vmatmul.mubr.msk.f32.gmra.mxu0 %vm385_vm0, %v12365_v58  ;;  %v12380_v5 = vld [vmem:[#allocation3 + $0x151] sm:$0xff]  ;;  %4164 = vst.msk [vmem:[#allocation3 + $0x181] sm:$0xff] %vm385_vm0, %v4077_v6 }
 0x251   : > { %v12382_v3 = vld [vmem:[#allocation3 + $0x150] sm:$0xff]  ;;  %v12384_v15 = vld [vmem:[#allocation3 + $0x158] sm:$0xff]  ;;  %9541 = vmatprep.mubr.msk.f32.mxu1 %vm385_vm0, %v12380_v5  ;;  %13957 = vst [vmem:[#allocation27_spill] sm:$0xff] %v12391_v33 }
 0x252   : > { %13955 = vst [vmem:[#allocation21_spill] sm:$0xff] %v12382_v3  ;;  %13956 = vst [vmem:[#allocation23_spill] sm:$0xff] %v12384_v15  ;;  %9593 = vmatprep.mubr.msk.f32.mxu0 %vm385_vm0, %v12382_v3  ;;  %v4878_v63 = vld [vmem:[#allocation3 + $0xa] sm:$0xff] }
 0x253   : > { %9542 = vmatmul.mubr.msk.f32.gmra.mxu1 %vm385_vm0, %v12391_v33  ;;  %v12407_v18 = vld [vmem:[#allocation3 + $0x171] sm:$0xff] }
 0x254   : > { %9594 = vmatmul.mubr.msk.f32.gmra.mxu0 %vm385_vm0, %v12384_v15  ;;  %13960 = vst [vmem:[#allocation30_spill] sm:$0xff] %v12407_v18  ;;  %v8239_v61 = vld [vmem:[%s13653_s5 + $0x40] sm:$0xff] }
 0x255   : > { %v12397_v19 = vld [vmem:[#allocation3 + $0x169] sm:$0xff] }
 0x256   : > { %13958 = vst [vmem:[#allocation25_spill] sm:$0xff] %v12397_v19  ;;  %v12399_v44 = vld [vmem:[#allocation3 + $0x168] sm:$0xff]  ;;  %v12401_v29 = vld [vmem:[#allocation3 + $0x170] sm:$0xff]  ;;  %9544 = vmatprep.mubr.msk.f32.mxu1 %vm385_vm0, %v12397_v19  ;;  %v9501_v6 = vpop.f32.mrf.mxu1  ;;  %v9553_v19 = vpop.f32.mrf.mxu0 }
 0x257   : > { %13959 = vst [vmem:[#allocation28_spill] sm:$0xff] %v12399_v44  ;;  %9596 = vmatprep.mubr.msk.f32.mxu0 %vm385_vm0, %v12399_v44  ;;  %9545 = vmatmul.mubr.msk.f32.gmra.mxu1 %vm385_vm0, %v12407_v18  ;;  %v12422_v18 = vld [vmem:[#allocation3 + $0x1a] sm:$0xff]  ;;  %v12424_v33 = vadd.f32 %v9553_v19, %v9501_v6  ;;  %v12515_v6 = vld [vmem:[#allocation3 + $0xaa] sm:$0xff] }
 0x258   : > { %9597 = vmatmul.mubr.msk.f32.gmra.mxu0 %vm385_vm0, %v12401_v29  ;;  %9603 = vmatprep.mubr.msk.f32.mxu1 %vm385_vm0, %v4877_v14  ;;  %v12433_v14 = vld [vmem:[#allocation3 + $0x22] sm:$0xff]  ;;  %v12442_v19 = vld [vmem:[%s13653_s5 + $0x68] sm:$0xff] }
 0x259   : > { %9655 = vmatprep.mubr.msk.f32.mxu0 %vm385_vm0, %v11992_v56  ;;  %13961 = vst [vmem:[#allocation29_spill] sm:$0xff] %v12424_v33  ;;  %v9972_v56 = vld [vmem:[%s13653_s5 + $0x48] sm:$0xff] }
 0x25a   : > { %v12539_v33 = vld [vmem:[#allocation3 + $0xda] sm:$0xff] }
 0x25b   : > { %9604 = vmatmul.mubr.msk.f32.vlgmr.msra.gmra.mxu1 %vm385_vm0, %v4878_v63  ;;  %v12460_v63 = vld [vmem:[%s13653_s5 + $0x78] sm:$0xff] }
 0x25c   : > { %9656 = vmatmul.mubr.msk.f32.vlgmr.msra.gmra.mxu0 %vm385_vm0, %v11994_v34  ;;  %9704 = vmatpush3.msra.mxu1 %v9972_v56  ;;  %v8273_v34 = vld [vmem:[%s13653_s5 + $0x50] sm:$0xff] }
 0x25d   : > { %9606 = vmatprep.mubr.msk.f32.mxu1 %vm385_vm0, %v12422_v18  ;;  %9658 = vmatprep.mubr.msk.f32.mxu0 %vm385_vm0, %v12036_v41  ;;  %v12448_v41 = vld [vmem:[#allocation3 + $0x32] sm:$0xff]  ;;  %v12527_v56 = vld [vmem:[#allocation3 + $0xc2] sm:$0xff] }
 0x25e   : > { %9705 = vmatprep.subr.mxu1 %v8239_v61  ;;  %9756 = vmatpush3.msra.mxu0 %v11964_v42  ;;  %v12455_v42 = vld [vmem:[#allocation3 + $0x3a] sm:$0xff] }
 0x25f   : > { %9706 = vmatpush3.msra.mxu1 %v8239_v61  ;;  %9757 = vmatprep.subr.mxu0 %v8273_v34  ;;  %v12479_v61 = vld [vmem:[#allocation3 + $0x62] sm:$0xff] }
 0x260   : > { %9607 = vmatmul.mubr.msk.f32.gmra.mxu1 %vm385_vm0, %v12433_v14  ;;  %9659 = vmatmul.mubr.msk.f32.gmra.mxu0 %vm385_vm0, %v12038_v23  ;;  %v12466_v23 = vld [vmem:[#allocation3 + $0x4a] sm:$0xff] }
 0x261   : > { %9609 = vmatprep.mubr.msk.f32.mxu1 %vm385_vm0, %v12448_v41  ;;  %9661 = vmatprep.mubr.msk.f32.mxu0 %vm385_vm0, %v12064_v21  ;;  %v12473_v21 = vld [vmem:[#allocation3 + $0x52] sm:$0xff] }
 0x262   : > { %9807 = vmatprep.subr.mxu1 %v12442_v19  ;;  %9758 = vmatpush3.msra.mxu0 %v8273_v34  ;;  %v12533_v34 = vld [vmem:[#allocation3 + $0xca] sm:$0xff] }
 0x263   : > { %9859 = vmatprep.subr.mxu0 %v12460_v63 }
 0x264   : > { %9610 = vmatmul.mubr.msk.f32.gmra.mxu1 %vm385_vm0, %v12455_v42  ;;  %9662 = vmatmul.mubr.msk.f32.gmra.mxu0 %vm385_vm0, %v12066_v46  ;;  %v12485_v46 = vld [vmem:[#allocation3 + $0x6a] sm:$0xff] }
 0x265   : > { %9612 = vmatprep.mubr.msk.f32.mxu1 %vm385_vm0, %v12466_v23  ;;  %9664 = vmatprep.mubr.msk.f32.mxu0 %vm385_vm0, %v12096_v30  ;;  %v12491_v30 = vld [vmem:[#allocation3 + $0x7a] sm:$0xff] }
 0x268   : > { %9613 = vmatmul.mubr.msk.f32.gmra.mxu1 %vm385_vm0, %v12473_v21  ;;  %9665 = vmatmul.mubr.msk.f32.gmra.mxu0 %vm385_vm0, %v12098_v22  ;;  %v12497_v22 = vld [vmem:[#allocation3 + $0x82] sm:$0xff] }
 0x269   : > { %9615 = vmatprep.mubr.msk.f32.mxu1 %vm385_vm0, %v12479_v61  ;;  %9667 = vmatprep.mubr.msk.f32.mxu0 %vm385_vm0, %v12139_v36  ;;  %v12503_v36 = vld [vmem:[#allocation3 + $0x92] sm:$0xff] }
 0x26c   : > { %9616 = vmatmul.mubr.msk.f32.gmra.mxu1 %vm385_vm0, %v12485_v46  ;;  %9668 = vmatmul.mubr.msk.f32.gmra.mxu0 %vm385_vm0, %v12141_v60  ;;  %v12509_v60 = vld [vmem:[#allocation3 + $0x9a] sm:$0xff] }
 0x26d   : > { %9618 = vmatprep.mubr.msk.f32.mxu1 %vm385_vm0, %v12491_v30  ;;  %9670 = vmatprep.mubr.msk.f32.mxu0 %vm385_vm0, %v12168_v57 }
 0x270   : > { %9619 = vmatmul.mubr.msk.f32.gmra.mxu1 %vm385_vm0, %v12497_v22  ;;  %9671 = vmatmul.mubr.msk.f32.gmra.mxu0 %vm385_vm0, %v12170_v28  ;;  %v12521_v28 = vld [vmem:[#allocation3 + $0xb2] sm:$0xff] }
 0x271   : > { %9621 = vmatprep.mubr.msk.f32.mxu1 %vm385_vm0, %v12503_v36  ;;  %9673 = vmatprep.mubr.msk.f32.mxu0 %vm385_vm0, %v12207_v48 }
 0x274   : > { %9622 = vmatmul.mubr.msk.f32.gmra.mxu1 %vm385_vm0, %v12509_v60  ;;  %9674 = vmatmul.mubr.msk.f32.gmra.mxu0 %vm385_vm0, %v12209_v25 }
 0x275   : > { %9624 = vmatprep.mubr.msk.f32.mxu1 %vm385_vm0, %v12515_v6  ;;  %9676 = vmatprep.mubr.msk.f32.mxu0 %vm385_vm0, %v12232_v10  ;;  %v12613_v10 = vld [vmem:[#allocation3 + $0x180] sm:$0xff] }
 0x276   : > { %13962 = vst [vmem:[#allocation31_spill] sm:$0xff] %v12613_v10 }
 0x278   : > { %9625 = vmatmul.mubr.msk.f32.gmra.mxu1 %vm385_vm0, %v12521_v28  ;;  %9677 = vmatmul.mubr.msk.f32.gmra.mxu0 %vm385_vm0, %v12234_v24  ;;  %v12545_v24 = vld [vmem:[#allocation3 + $0xe2] sm:$0xff] }
 0x279   : > { %9627 = vmatprep.mubr.msk.f32.mxu1 %vm385_vm0, %v12527_v56  ;;  %9679 = vmatprep.mubr.msk.f32.mxu0 %vm385_vm0, %v12260_v7  ;;  %v12551_v7 = vld [vmem:[#allocation3 + $0xf2] sm:$0xff] }
 0x27c   : > { %9628 = vmatmul.mubr.msk.f32.gmra.mxu1 %vm385_vm0, %v12533_v34  ;;  %9680 = vmatmul.mubr.msk.f32.gmra.mxu0 %vm385_vm0, %v12262_v55  ;;  %v12557_v55 = vld [vmem:[#allocation3 + $0xfa] sm:$0xff] }
 0x27d   : > { %9630 = vmatprep.mubr.msk.f32.mxu1 %vm385_vm0, %v12539_v33  ;;  %9682 = vmatprep.mubr.msk.f32.mxu0 %vm385_vm0, %v12291_v37  ;;  %v12563_v37 = vld [vmem:[#allocation3 + $0x10a] sm:$0xff] }
 0x280   : > { %9631 = vmatmul.mubr.msk.f32.gmra.mxu1 %vm385_vm0, %v12545_v24  ;;  %9683 = vmatmul.mubr.msk.f32.gmra.mxu0 %vm385_vm0, %v12293_v40  ;;  %v12569_v40 = vld [vmem:[#allocation3 + $0x112] sm:$0xff] }
 0x281   : > { %9633 = vmatprep.mubr.msk.f32.mxu1 %vm385_vm0, %v12551_v7  ;;  %9685 = vmatprep.mubr.msk.f32.mxu0 %vm385_vm0, %v12315_v31  ;;  %v12575_v31 = vld [vmem:[#allocation3 + $0x122] sm:$0xff] }
 0x284   : > { %9634 = vmatmul.mubr.msk.f32.gmra.mxu1 %vm385_vm0, %v12557_v55  ;;  %9686 = vmatmul.mubr.msk.f32.gmra.mxu0 %vm385_vm0, %v12317_v43  ;;  %v12581_v43 = vld [vmem:[#allocation3 + $0x12a] sm:$0xff] }
 0x285   : > { %9636 = vmatprep.mubr.msk.f32.mxu1 %vm385_vm0, %v12563_v37  ;;  %9688 = vmatprep.mubr.msk.f32.mxu0 %vm385_vm0, %v12341_v35  ;;  %v12587_v35 = vld [vmem:[#allocation3 + $0x13a] sm:$0xff] }
 0x288   : > { %9637 = vmatmul.mubr.msk.f32.gmra.mxu1 %vm385_vm0, %v12569_v40  ;;  %9689 = vmatmul.mubr.msk.f32.gmra.mxu0 %vm385_vm0, %v12343_v52  ;;  %v12593_v52 = vld [vmem:[#allocation3 + $0x142] sm:$0xff] }
 0x289   : > { %9639 = vmatprep.mubr.msk.f32.mxu1 %vm385_vm0, %v12575_v31  ;;  %9691 = vmatprep.mubr.msk.f32.mxu0 %vm385_vm0, %v12363_v53  ;;  %v12599_v53 = vld [vmem:[#allocation3 + $0x152] sm:$0xff] }
 0x28c   : > { %9640 = vmatmul.mubr.msk.f32.gmra.mxu1 %vm385_vm0, %v12581_v43  ;;  %9692 = vmatmul.mubr.msk.f32.gmra.mxu0 %vm385_vm0, %v12365_v58  ;;  %v12605_v58 = vld [vmem:[#allocation3 + $0x15a] sm:$0xff] }
 0x28d   : > { %9642 = vmatprep.mubr.msk.f32.mxu1 %vm385_vm0, %v12587_v35  ;;  %9694 = vmatprep.mubr.msk.f32.mxu0 %vm385_vm0, %v12382_v3  ;;  %v12611_v3 = vld [vmem:[#allocation3 + $0x16a] sm:$0xff] }
 0x290   : > { %9643 = vmatmul.mubr.msk.f32.gmra.mxu1 %vm385_vm0, %v12593_v52  ;;  %9695 = vmatmul.mubr.msk.f32.gmra.mxu0 %vm385_vm0, %v12384_v15  ;;  %v12619_v15 = vld [vmem:[#allocation3 + $0x172] sm:$0xff] }
 0x291   : > { %9645 = vmatprep.mubr.msk.f32.mxu1 %vm385_vm0, %v12599_v53  ;;  %9697 = vmatprep.mubr.msk.f32.mxu0 %vm385_vm0, %v12399_v44  ;;  %v12621_v44 = vld [vmem:[#allocation3 + $0x188] sm:$0xff] }
 0x294   : > { %9646 = vmatmul.mubr.msk.f32.gmra.mxu1 %vm385_vm0, %v12605_v58  ;;  %9698 = vmatmul.mubr.msk.f32.gmra.mxu0 %vm385_vm0, %v12401_v29 }
 0x295   : > { %9648 = vmatprep.mubr.msk.f32.mxu1 %vm385_vm0, %v12611_v3  ;;  %9700 = vmatprep.mubr.msk.f32.mxu0 %vm385_vm0, %v12613_v10  ;;  %v8307_v10 = vld [vmem:[%s13653_s5 + $0x60] sm:$0xff] }
 0x298   : > { %9649 = vmatmul.mubr.msk.f32.gmra.mxu1 %vm385_vm0, %v12619_v15  ;;  %9701 = vmatmul.mubr.msk.f32.gmra.mxu0 %vm385_vm0, %v12621_v44 }
 0x299   : > { %9707 = vmatprep.mubr.msk.f32.mxu1 %vm385_vm0, %v11990_v50  ;;  %9759 = vmatprep.mubr.msk.f32.mxu0 %vm385_vm0, %v12422_v18  ;;  %v8341_v50 = vld [vmem:[%s13653_s5 + $0x70] sm:$0xff] }
 0x29c   : > { %9708 = vmatmul.mubr.msk.f32.vlgmr.msra.gmra.mxu1 %vm385_vm0, %v12005_v38  ;;  %9760 = vmatmul.mubr.msk.f32.vlgmr.msra.gmra.mxu0 %vm385_vm0, %v12433_v14  ;;  %v12650_v38 = vld [vmem:[%s13653_s5 + $0x88] sm:$0xff] }
 0x29d   : > { %9808 = vmatpush3.msra.mxu1 %v12442_v19  ;;  %9710 = vmatprep.mubr.msk.f32.mxu1 %vm385_vm0, %v12034_v11  ;;  %v13963_v11 = vld [vmem:[#allocation12_spill] sm:$0xff] }
 0x29e   : > { %9762 = vmatprep.mubr.msk.f32.mxu0 %vm385_vm0, %v12448_v41  ;;  %9809 = vmatprep.subr.mxu1 %v8307_v10 }
 0x29f   : > { %9810 = vmatpush3.msra.mxu1 %v8307_v10  ;;  %9860 = vmatpush3.msra.mxu0 %v12460_v63  ;;  %v6431_v10 = vld [vmem:[#allocation3 + $0x38] sm:$0xff]  ;;  %v6435_v63 = vld [vmem:[#allocation3 + $0x68] sm:$0xff] }
 0x2a0   : > { %9711 = vmatmul.mubr.msk.f32.gmra.mxu1 %vm385_vm0, %v12049_v0  ;;  %9763 = vmatmul.mubr.msk.f32.gmra.mxu0 %vm385_vm0, %v12455_v42  ;;  %v13964_v0 = vld [vmem:[#allocation27_spill] sm:$0xff] }
 0x2a1   : > { %9713 = vmatprep.mubr.msk.f32.mxu1 %vm385_vm0, %v12062_v47  ;;  %9765 = vmatprep.mubr.msk.f32.mxu0 %vm385_vm0, %v12466_v23  ;;  %v13965_v47 = vld [vmem:[#allocation25_spill] sm:$0xff] }
 0x2a2   : > { %9861 = vmatprep.subr.mxu0 %v8341_v50  ;;  %9911 = vmatprep.subr.mxu1 %v12650_v38 }
 0x2a3   : > { %9862 = vmatpush3.msra.mxu0 %v8341_v50 }
 0x2a4   : > { %9714 = vmatmul.mubr.msk.f32.gmra.mxu1 %vm385_vm0, %v12081_v62  ;;  %9766 = vmatmul.mubr.msk.f32.gmra.mxu0 %vm385_vm0, %v12473_v21  ;;  %v13966_v62 = vld [vmem:[#allocation30_spill] sm:$0xff] }
 0x2a5   : > { %9716 = vmatprep.mubr.msk.f32.mxu1 %vm385_vm0, %v12094_v2  ;;  %9768 = vmatprep.mubr.msk.f32.mxu0 %vm385_vm0, %v12479_v61  ;;  %v12761_v2 = vld [vmem:[#allocation3 + $0x181] sm:$0xff] }
 0x2a8   : > { %9717 = vmatmul.mubr.msk.f32.gmra.mxu1 %vm385_vm0, %v12116_v45  ;;  %9769 = vmatmul.mubr.msk.f32.gmra.mxu0 %vm385_vm0, %v12485_v46  ;;  %v12763_v45 = vld [vmem:[#allocation3 + $0x182] sm:$0xff] }
 0x2a9   : > { %9719 = vmatprep.mubr.msk.f32.mxu1 %vm385_vm0, %v12137_v54  ;;  %9771 = vmatprep.mubr.msk.f32.mxu0 %vm385_vm0, %v12491_v30  ;;  %v12769_v54 = vld [vmem:[#allocation3 + $0x189] sm:$0xff] }
 0x2ac   : > { %9720 = vmatmul.mubr.msk.f32.gmra.mxu1 %vm385_vm0, %v12153_v20  ;;  %9772 = vmatmul.mubr.msk.f32.gmra.mxu0 %vm385_vm0, %v12497_v22  ;;  %v12771_v20 = vld [vmem:[#allocation3 + $0x18a] sm:$0xff] }
 0x2ad   : > { %9722 = vmatprep.mubr.msk.f32.mxu1 %vm385_vm0, %v12166_v17  ;;  %9774 = vmatprep.mubr.msk.f32.mxu0 %vm385_vm0, %v12503_v36  ;;  %v6430_v17 = vld [vmem:[#allocation3 + $0x30] sm:$0xff] }
 0x2b0   : > { %9723 = vmatmul.mubr.msk.f32.gmra.mxu1 %vm385_vm0, %v12186_v12  ;;  %9775 = vmatmul.mubr.msk.f32.gmra.mxu0 %vm385_vm0, %v12509_v60  ;;  %v6818_v12 = vld [vmem:[#allocation3 + $0x31] sm:$0xff] }
 0x2b1   : > { %9725 = vmatprep.mubr.msk.f32.mxu1 %vm385_vm0, %v12205_v4  ;;  %9777 = vmatprep.mubr.msk.f32.mxu0 %vm385_vm0, %v12515_v6 }
 0x2b4   : > { %9726 = vmatmul.mubr.msk.f32.gmra.mxu1 %vm385_vm0, %v12218_v27  ;;  %9778 = vmatmul.mubr.msk.f32.gmra.mxu0 %vm385_vm0, %v12521_v28  ;;  %v6823_v28 = vld [vmem:[#allocation3 + $0x69] sm:$0xff] }
 0x2b5   : > { %9728 = vmatprep.mubr.msk.f32.mxu1 %vm385_vm0, %v12230_v51  ;;  %9780 = vmatprep.mubr.msk.f32.mxu0 %vm385_vm0, %v12527_v56 }
 0x2b8   : > { %9729 = vmatmul.mubr.msk.f32.gmra.mxu1 %vm385_vm0, %v12246_v9  ;;  %9781 = vmatmul.mubr.msk.f32.gmra.mxu0 %vm385_vm0, %v12533_v34 }
 0x2b9   : > { %9731 = vmatprep.mubr.msk.f32.mxu1 %vm385_vm0, %v12258_v32  ;;  %9783 = vmatprep.mubr.msk.f32.mxu0 %vm385_vm0, %v12539_v33 }
 0x2bc   : > { %9732 = vmatmul.mubr.msk.f32.gmra.mxu1 %vm385_vm0, %v13963_v11  ;;  %9784 = vmatmul.mubr.msk.f32.gmra.mxu0 %vm385_vm0, %v12545_v24  ;;  %v6819_v24 = vld [vmem:[#allocation3 + $0x39] sm:$0xff] }
 0x2bd   : > { %9734 = vmatprep.mubr.msk.f32.mxu1 %vm385_vm0, %v12289_v26  ;;  %9786 = vmatprep.mubr.msk.f32.mxu0 %vm385_vm0, %v12551_v7  ;;  %v8375_v7 = vld [vmem:[%s13653_s5 + $0x80] sm:$0xff] }
 0x2c0   : > { %9735 = vmatmul.mubr.msk.f32.gmra.mxu1 %vm385_vm0, %v12303_v1  ;;  %9787 = vmatmul.mubr.msk.f32.gmra.mxu0 %vm385_vm0, %v12557_v55  ;;  %v6432_v55 = vld [vmem:[#allocation3 + $0x48] sm:$0xff] }
 0x2c1   : > { %9737 = vmatprep.mubr.msk.f32.mxu1 %vm385_vm0, %v12313_v13  ;;  %9789 = vmatprep.mubr.msk.f32.mxu0 %vm385_vm0, %v12563_v37  ;;  %v12786_v37 = vpop.f32.mrf.mxu0 }
 0x2c4   : > { %9738 = vmatmul.mubr.msk.f32.gmra.mxu1 %vm385_vm0, %v12326_v59  ;;  %9790 = vmatmul.mubr.msk.f32.gmra.mxu0 %vm385_vm0, %v12569_v40  ;;  %v12784_v40 = vpop.f32.mrf.mxu1 }
 0x2c5   : > { %9740 = vmatprep.mubr.msk.f32.mxu1 %vm385_vm0, %v12339_v39  ;;  %9792 = vmatprep.mubr.msk.f32.mxu0 %vm385_vm0, %v12575_v31  ;;  %v6820_v31 = vld [vmem:[#allocation3 + $0x49] sm:$0xff] }
 0x2c8   : > { %9741 = vmatmul.mubr.msk.f32.gmra.mxu1 %vm385_vm0, %v12351_v49  ;;  %9793 = vmatmul.mubr.msk.f32.gmra.mxu0 %vm385_vm0, %v12581_v43 }
 0x2c9   : > { %9743 = vmatprep.mubr.msk.f32.mxu1 %vm385_vm0, %v12361_v16  ;;  %9795 = vmatprep.mubr.msk.f32.mxu0 %vm385_vm0, %v12587_v35 }
 0x2cc   : > { %9744 = vmatmul.mubr.msk.f32.gmra.mxu1 %vm385_vm0, %v12373_v8  ;;  %9796 = vmatmul.mubr.msk.f32.gmra.mxu0 %vm385_vm0, %v12593_v52  ;;  %v6433_v52 = vld [vmem:[#allocation3 + $0x50] sm:$0xff] }
 0x2cd   : > { %9746 = vmatprep.mubr.msk.f32.mxu1 %vm385_vm0, %v12380_v5  ;;  %9798 = vmatprep.mubr.msk.f32.mxu0 %vm385_vm0, %v12599_v53  ;;  %v6821_v53 = vld [vmem:[#allocation3 + $0x51] sm:$0xff] }
 0x2d0   : > { %9747 = vmatmul.mubr.msk.f32.gmra.mxu1 %vm385_vm0, %v13964_v0  ;;  %9799 = vmatmul.mubr.msk.f32.gmra.mxu0 %vm385_vm0, %v12605_v58 }
 0x2d1   : > { %9749 = vmatprep.mubr.msk.f32.mxu1 %vm385_vm0, %v13965_v47  ;;  %9801 = vmatprep.mubr.msk.f32.mxu0 %vm385_vm0, %v12611_v3  ;;  %v6434_v3 = vld [vmem:[#allocation3 + $0x60] sm:$0xff] }
 0x2d4   : > { %9750 = vmatmul.mubr.msk.f32.gmra.mxu1 %vm385_vm0, %v13966_v62  ;;  %9802 = vmatmul.mubr.msk.f32.gmra.mxu0 %vm385_vm0, %v12619_v15  ;;  %v6822_v15 = vld [vmem:[#allocation3 + $0x61] sm:$0xff] }
 0x2d5   : > { %9752 = vmatprep.mubr.msk.f32.mxu1 %vm385_vm0, %v12761_v2  ;;  %9804 = vmatprep.mubr.msk.f32.mxu0 %vm385_vm0, %v12763_v45 }
 0x2d8   : > { %9753 = vmatmul.mubr.msk.f32.gmra.mxu1 %vm385_vm0, %v12769_v54  ;;  %9805 = vmatmul.mubr.msk.f32.gmra.mxu0 %vm385_vm0, %v12771_v20 }
 0x2d9   : > { %9811 = vmatprep.mubr.msk.f32.mxu1 %vm385_vm0, %v6430_v17  ;;  %9863 = vmatprep.mubr.msk.f32.mxu0 %vm385_vm0, %v6818_v12  ;;  %v6824_v17 = vld [vmem:[#allocation3 + $0x79] sm:$0xff] }
 0x2dc   : > { %9812 = vmatmul.mubr.msk.f32.vlgmr.msra.gmra.mxu1 %vm385_vm0, %v6431_v10  ;;  %9864 = vmatmul.mubr.msk.f32.vlgmr.msra.gmra.mxu0 %vm385_vm0, %v6819_v24 }
 0x2dd   : > { %9912 = vmatpush3.msra.mxu1 %v12650_v38  ;;  %9814 = vmatprep.mubr.msk.f32.mxu1 %vm385_vm0, %v6432_v55  ;;  %v9504_v43 = vpop.f32.mrf.mxu1  ;;  %v6436_v38 = vld [vmem:[#allocation3 + $0x78] sm:$0xff]  ;;  %v6437_v55 = vld [vmem:[#allocation3 + $0x80] sm:$0xff] }
 0x2de   : > { %9866 = vmatprep.mubr.msk.f32.mxu0 %vm385_vm0, %v6820_v31  ;;  %9913 = vmatprep.subr.mxu1 %v8375_v7  ;;  %v9556_v35 = vpop.f32.mrf.mxu0  ;;  %v6825_v31 = vld [vmem:[#allocation3 + $0x81] sm:$0xff] }
 0x2df   : > { %9914 = vmatpush3.msra.mxu1 %v8375_v7  ;;  %v12791_v58 = vadd.f32 %v9556_v35, %v9504_v43  ;;  %v4407_v18 = vpop.f32.mrf.mxu1 }
 0x2e0   : > { %9815 = vmatmul.mubr.msk.f32.gmra.mxu1 %vm385_vm0, %v6433_v52  ;;  %9867 = vmatmul.mubr.msk.f32.gmra.mxu0 %vm385_vm0, %v6821_v53  ;;  %v4728_v14 = vpop.f32.mrf.mxu0  ;;  %v6826_v52 = vld [vmem:[#allocation3 + $0x91] sm:$0xff] }
 0x2e1   : > { %9817 = vmatprep.mubr.msk.f32.mxu1 %vm385_vm0, %v6434_v3  ;;  %9869 = vmatprep.mubr.msk.f32.mxu0 %vm385_vm0, %v6822_v15  ;;  %v12797_v19 = vadd.f32 %v4728_v14, %v4407_v18  ;;  %v6439_v14 = vld [vmem:[#allocation3 + $0x98] sm:$0xff] }
 0x2e2   : > { %v9507_v34 = vpop.f32.mrf.mxu1 }
 0x2e3   : > { %v9559_v50 = vpop.f32.mrf.mxu0 }
 0x2e4   : > { %9818 = vmatmul.mubr.msk.f32.gmra.mxu1 %vm385_vm0, %v6435_v63  ;;  %9870 = vmatmul.mubr.msk.f32.gmra.mxu0 %vm385_vm0, %v6823_v28  ;;  %v12801_v12 = vadd.f32 %v9559_v50, %v9507_v34  ;;  %v4417_v10 = vpop.f32.mrf.mxu1  ;;  %v6827_v63 = vld [vmem:[#allocation3 + $0x99] sm:$0xff] }
 0x2e5   : > { %9820 = vmatprep.mubr.msk.f32.mxu1 %vm385_vm0, %v6436_v38  ;;  %9872 = vmatprep.mubr.msk.f32.mxu0 %vm385_vm0, %v6824_v17  ;;  %v4738_v24 = vpop.f32.mrf.mxu0 }
 0x2e6   : > { %v12805_v7 = vadd.f32 %v4738_v24, %v4417_v10  ;;  %v9510_v43 = vpop.f32.mrf.mxu1 }
 0x2e7   : > { %v9562_v35 = vpop.f32.mrf.mxu0 }
 0x2e8   : > { %9821 = vmatmul.mubr.msk.f32.gmra.mxu1 %vm385_vm0, %v6437_v55  ;;  %9873 = vmatmul.mubr.msk.f32.gmra.mxu0 %vm385_vm0, %v6825_v31  ;;  %v12809_v53 = vadd.f32 %v9562_v35, %v9510_v43  ;;  %v4427_v3 = vpop.f32.mrf.mxu1  ;;  %v13967_v31 = vld [vmem:[#allocation9_spill] sm:$0xff] }
 0x2e9   : > { %9823 = vmatprep.mubr.msk.f32.mxu1 %vm385_vm0, %v12168_v57  ;;  %9875 = vmatprep.mubr.msk.f32.mxu0 %vm385_vm0, %v6826_v52  ;;  %v4748_v15 = vpop.f32.mrf.mxu0 }
 0x2ea   : > { %v12814_v18 = vadd.f32 %v4748_v15, %v4427_v3  ;;  %v9513_v28 = vpop.f32.mrf.mxu1  ;;  %v13968_v3 = vld [vmem:[#allocation10_spill] sm:$0xff] }
 0x2eb   : > { %v9565_v34 = vpop.f32.mrf.mxu0 }
 0x2ec   : > { %9824 = vmatmul.mubr.msk.f32.gmra.mxu1 %vm385_vm0, %v6439_v14  ;;  %9876 = vmatmul.mubr.msk.f32.gmra.mxu0 %vm385_vm0, %v6827_v63  ;;  %v12818_v50 = vadd.f32 %v9565_v34, %v9513_v28  ;;  %v4437_v57 = vpop.f32.mrf.mxu1  ;;  %v13970_v34 = vld [vmem:[#allocation13_spill] sm:$0xff] }
 0x2ed   : > { %9826 = vmatprep.mubr.msk.f32.mxu1 %vm385_vm0, %v12207_v48  ;;  %9878 = vmatprep.mubr.msk.f32.mxu0 %vm385_vm0, %v12205_v4  ;;  %v4758_v38 = vpop.f32.mrf.mxu0 }
 0x2ee   : > { %v12824_v17 = vadd.f32 %v4758_v38, %v4437_v57  ;;  %v9516_v10 = vpop.f32.mrf.mxu1  ;;  %v13971_v57 = vld [vmem:[#allocation14_spill] sm:$0xff] }
 0x2ef   : > { %v9568_v24 = vpop.f32.mrf.mxu0 }
 0x2f0   : > { %9827 = vmatmul.mubr.msk.f32.gmra.mxu1 %vm385_vm0, %v12209_v25  ;;  %9879 = vmatmul.mubr.msk.f32.gmra.mxu0 %vm385_vm0, %v12218_v27  ;;  %v12830_v55 = vadd.f32 %v9568_v24, %v9516_v10  ;;  %v4447_v4 = vpop.f32.mrf.mxu1  ;;  %v13969_v27 = vld [vmem:[#allocation11_spill] sm:$0xff] }
 0x2f1   : > { %9829 = vmatprep.mubr.msk.f32.mxu1 %vm385_vm0, %v13967_v31  ;;  %9881 = vmatprep.mubr.msk.f32.mxu0 %vm385_vm0, %v12230_v51  ;;  %v4768_v48 = vpop.f32.mrf.mxu0 }
 0x2f2   : > { %v12836_v43 = vadd.f32 %v4768_v48, %v4447_v4  ;;  %v9519_v35 = vpop.f32.mrf.mxu1  ;;  %v13972_v4 = vld [vmem:[#allocation16_spill] sm:$0xff]  ;;  %v13973_v48 = vld [vmem:[#allocation15_spill] sm:$0xff] }
 0x2f3   : > { %v9571_v52 = vpop.f32.mrf.mxu0 }
 0x2f4   : > { %9830 = vmatmul.mubr.msk.f32.gmra.mxu1 %vm385_vm0, %v13968_v3  ;;  %9882 = vmatmul.mubr.msk.f32.gmra.mxu0 %vm385_vm0, %v12246_v9  ;;  %v12842_v25 = vadd.f32 %v9571_v52, %v9519_v35  ;;  %v4457_v51 = vpop.f32.mrf.mxu1 }
 0x2f5   : > { %9832 = vmatprep.mubr.msk.f32.mxu1 %vm385_vm0, %v13969_v27  ;;  %9884 = vmatprep.mubr.msk.f32.mxu0 %vm385_vm0, %v12258_v32  ;;  %v4778_v15 = vpop.f32.mrf.mxu0 }
 0x2f6   : > { %v12848_v14 = vadd.f32 %v4778_v15, %v4457_v51  ;;  %v9522_v63 = vpop.f32.mrf.mxu1  ;;  %v13974_v51 = vld [vmem:[#allocation17_spill] sm:$0xff]  ;;  %v13975_v15 = vld [vmem:[#allocation19_spill] sm:$0xff] }
 0x2f7   : > { %v9574_v28 = vpop.f32.mrf.mxu0 }
 0x2f8   : > { %9833 = vmatmul.mubr.msk.f32.gmra.mxu1 %vm385_vm0, %v13970_v34  ;;  %9885 = vmatmul.mubr.msk.f32.gmra.mxu0 %vm385_vm0, %v13963_v11  ;;  %v12854_v9 = vadd.f32 %v9574_v28, %v9522_v63  ;;  %v4467_v32 = vpop.f32.mrf.mxu1 }
 0x2f9   : > { %9835 = vmatprep.mubr.msk.f32.mxu1 %vm385_vm0, %v13971_v57  ;;  %9887 = vmatprep.mubr.msk.f32.mxu0 %vm385_vm0, %v12289_v26  ;;  %v4788_v38 = vpop.f32.mrf.mxu0 }
 0x2fa   : > { %v12860_v10 = vadd.f32 %v4788_v38, %v4467_v32  ;;  %v9525_v24 = vpop.f32.mrf.mxu1  ;;  %v13976_v32 = vld [vmem:[#allocation18_spill] sm:$0xff]  ;;  %v13977_v38 = vld [vmem:[#allocation20_spill] sm:$0xff] }
 0x2fb   : > { %v9577_v31 = vpop.f32.mrf.mxu0 }
 0x2fc   : > { %9836 = vmatmul.mubr.msk.f32.gmra.mxu1 %vm385_vm0, %v13972_v4  ;;  %9888 = vmatmul.mubr.msk.f32.gmra.mxu0 %vm385_vm0, %v12303_v1  ;;  %v12866_v11 = vadd.f32 %v9577_v31, %v9525_v24  ;;  %v4477_v26 = vpop.f32.mrf.mxu1 }
 0x2fd   : > { %9838 = vmatprep.mubr.msk.f32.mxu1 %vm385_vm0, %v13973_v48  ;;  %9890 = vmatprep.mubr.msk.f32.mxu0 %vm385_vm0, %v12313_v13  ;;  %v4798_v35 = vpop.f32.mrf.mxu0 }
 0x2fe   : > { %v12872_v52 = vadd.f32 %v4798_v35, %v4477_v26  ;;  %v9528_v3 = vpop.f32.mrf.mxu1  ;;  %v13978_v26 = vld [vmem:[#allocation22_spill] sm:$0xff]  ;;  %v13979_v35 = vld [vmem:[#allocation21_spill] sm:$0xff] }
 0x2ff   : > { %v9580_v27 = vpop.f32.mrf.mxu0 }
 0x300   : > { %9839 = vmatmul.mubr.msk.f32.gmra.mxu1 %vm385_vm0, %v13974_v51  ;;  %9891 = vmatmul.mubr.msk.f32.gmra.mxu0 %vm385_vm0, %v12326_v59  ;;  %v12878_v1 = vadd.f32 %v9580_v27, %v9528_v3  ;;  %v4487_v13 = vpop.f32.mrf.mxu1 }
 0x301   : > { %9841 = vmatprep.mubr.msk.f32.mxu1 %vm385_vm0, %v13975_v15  ;;  %9893 = vmatprep.mubr.msk.f32.mxu0 %vm385_vm0, %v12339_v39  ;;  %v4808_v63 = vpop.f32.mrf.mxu0 }
 0x302   : > { %v12884_v28 = vadd.f32 %v4808_v63, %v4487_v13  ;;  %v13980_v13 = vld [vmem:[#allocation23_spill] sm:$0xff]  ;;  %v13981_v63 = vld [vmem:[#allocation28_spill] sm:$0xff] }
 0x303   : > { %v9531_v34 = vpop.f32.mrf.mxu1 }
 0x304   : > { %v9583_v57 = vpop.f32.mrf.mxu0  ;;  %9842 = vmatmul.mubr.msk.f32.gmra.mxu1 %vm385_vm0, %v13976_v32  ;;  %9894 = vmatmul.mubr.msk.f32.gmra.mxu0 %vm385_vm0, %v12351_v49 }
 0x305   : > { %v12890_v59 = vadd.f32 %v9583_v57, %v9531_v34  ;;  %9844 = vmatprep.mubr.msk.f32.mxu1 %vm385_vm0, %v13977_v38  ;;  %9896 = vmatprep.mubr.msk.f32.mxu0 %vm385_vm0, %v12361_v16  ;;  %v4497_v39 = vpop.f32.mrf.mxu1 }
 0x306   : > { %v4818_v24 = vpop.f32.mrf.mxu0 }
 0x307   : > { %v12896_v31 = vadd.f32 %v4818_v24, %v4497_v39  ;;  %v9534_v4 = vpop.f32.mrf.mxu1  ;;  %v13982_v39 = vld [vmem:[#allocation31_spill] sm:$0xff] }
 0x308   : > { %v9586_v48 = vpop.f32.mrf.mxu0  ;;  %9845 = vmatmul.mubr.msk.f32.gmra.mxu1 %vm385_vm0, %v13978_v26  ;;  %9897 = vmatmul.mubr.msk.f32.gmra.mxu0 %vm385_vm0, %v12373_v8 }
 0x309   : > { %v12902_v49 = vadd.f32 %v9586_v48, %v9534_v4  ;;  %9847 = vmatprep.mubr.msk.f32.mxu1 %vm385_vm0, %v13979_v35  ;;  %9899 = vmatprep.mubr.msk.f32.mxu0 %vm385_vm0, %v12380_v5  ;;  %v4507_v16 = vpop.f32.mrf.mxu1  ;;  %v6460_v4 = vld [vmem:[#allocation3 + $0x198] sm:$0xff] }
 0x30a   : > { %v4828_v3 = vpop.f32.mrf.mxu0  ;;  %v6848_v48 = vld [vmem:[#allocation3 + $0x199] sm:$0xff] }
 0x30b   : > { %v12908_v27 = vadd.f32 %v4828_v3, %v4507_v16  ;;  %v9537_v51 = vpop.f32.mrf.mxu1 }
 0x30c   : > { %v9589_v15 = vpop.f32.mrf.mxu0  ;;  %9848 = vmatmul.mubr.msk.f32.gmra.mxu1 %vm385_vm0, %v13980_v13  ;;  %9900 = vmatmul.mubr.msk.f32.gmra.mxu0 %vm385_vm0, %v13964_v0 }
 0x30d   : > { %v12914_v8 = vadd.f32 %v9589_v15, %v9537_v51  ;;  %9850 = vmatprep.mubr.msk.f32.mxu1 %vm385_vm0, %v13981_v63  ;;  %9902 = vmatprep.mubr.msk.f32.mxu0 %vm385_vm0, %v13965_v47  ;;  %v4517_v5 = vpop.f32.mrf.mxu1 }
 0x30e   : > { %v4838_v34 = vpop.f32.mrf.mxu0 }
 0x30f   : > { %v12920_v57 = vadd.f32 %v4838_v34, %v4517_v5  ;;  %v9540_v32 = vpop.f32.mrf.mxu1 }
 0x310   : > { %v9592_v38 = vpop.f32.mrf.mxu0  ;;  %9851 = vmatmul.mubr.msk.f32.gmra.mxu1 %vm385_vm0, %v12401_v29  ;;  %9903 = vmatmul.mubr.msk.f32.gmra.mxu0 %vm385_vm0, %v13966_v62  ;;  %v6461_v62 = vld [vmem:[#allocation3 + $0x1a0] sm:$0xff] }
 0x311   : > { %v12926_v0 = vadd.f32 %v9592_v38, %v9540_v32  ;;  %9853 = vmatprep.mubr.msk.f32.mxu1 %vm385_vm0, %v13982_v39  ;;  %9905 = vmatprep.mubr.msk.f32.mxu0 %vm385_vm0, %v12761_v2  ;;  %v4527_v47 = vpop.f32.mrf.mxu1  ;;  %v6849_v2 = vld [vmem:[#allocation3 + $0x1a1] sm:$0xff]  ;;  %v4719_v39 = vadd.f32 %v12786_v37, %v12784_v40 }
 0x312   : > { %v4848_v24 = vpop.f32.mrf.mxu0 }
 0x313   : > { %v12932_v26 = vadd.f32 %v4848_v24, %v4527_v47  ;;  %v9543_v35 = vpop.f32.mrf.mxu1  ;;  %v13983_v47 = vld [vmem:[#allocation29_spill] sm:$0xff] }
 0x314   : > { %v9595_v16 = vpop.f32.mrf.mxu0  ;;  %9854 = vmatmul.mubr.msk.f32.gmra.mxu1 %vm385_vm0, %v12621_v44  ;;  %9906 = vmatmul.mubr.msk.f32.gmra.mxu0 %vm385_vm0, %v12769_v54 }
 0x315   : > { %v12938_v29 = vadd.f32 %v9595_v16, %v9543_v35  ;;  %9856 = vmatprep.mubr.msk.f32.mxu1 %vm385_vm0, %v6460_v4  ;;  %9908 = vmatprep.mubr.msk.f32.mxu0 %vm385_vm0, %v6848_v48  ;;  %v4537_v3 = vpop.f32.mrf.mxu1 }
 0x316   : > { %v4858_v51 = vpop.f32.mrf.mxu0 }
 0x317   : > { %v12942_v15 = vadd.f32 %v4858_v51, %v4537_v3  ;;  %v9546_v13 = vpop.f32.mrf.mxu1 }
 0x318   : > { %v9598_v63 = vpop.f32.mrf.mxu0  ;;  %9857 = vmatmul.mubr.msk.f32.gmra.mxu1 %vm385_vm0, %v6461_v62  ;;  %9909 = vmatmul.mubr.msk.f32.gmra.mxu0 %vm385_vm0, %v6849_v2 }
 0x319   : > { %v12946_v44 = vadd.f32 %v9598_v63, %v9546_v13  ;;  %9915 = vmatprep.mubr.msk.f32.mxu1 %vm385_vm0, %v12448_v41  ;;  %v4547_v54 = vpop.f32.mrf.mxu1 }
 0x31a   : > { %v4868_v5 = vpop.f32.mrf.mxu0 }
 0x31b   : > { %v12950_v34 = vadd.f32 %v4868_v5, %v4547_v54  ;;  %v9605_v32 = vpop.f32.mrf.mxu1 }
 0x31c   : > { %v9657_v38 = vpop.f32.mrf.mxu0  ;;  %9916 = vmatmul.mubr.msk.f32.vlgmr.msra.gmra.mxu1 %vm385_vm0, %v12455_v42  ;;  %v5234_v24 = vadd.f32 %v9605_v32, %v13983_v47 }
 0x31d   : > { %9918 = vmatprep.mubr.msk.f32.mxu1 %vm385_vm0, %v12466_v23  ;;  %v5074_v4 = vpop.f32.mrf.mxu1 }
 0x31e   : > { %v5462_v48 = vpop.f32.mrf.mxu0  ;;  %v12959_v41 = vadd.f32 %v9657_v38, %v5234_v24  ;;  %v5233_v35 = vadd.f32 %v5074_v4, %v4719_v39 }
 0x320   : > { %v9608_v16 = vpop.f32.mrf.mxu1  ;;  %v9660_v62 = vpop.f32.mrf.mxu0  ;;  %9919 = vmatmul.mubr.msk.f32.gmra.mxu1 %vm385_vm0, %v12473_v21  ;;  %v12963_v2 = vadd.f32 %v5462_v48, %v5233_v35 }
 0x321   : > { %v5236_v42 = vadd.f32 %v9608_v16, %v12791_v58  ;;  %9921 = vmatprep.mubr.msk.f32.mxu1 %vm385_vm0, %v12479_v61  ;;  %v7217_v16 = vld [vmem:[#allocation3 + $0xb2] sm:$0xff] }
 0x322   : > { %v5084_v40 = vpop.f32.mrf.mxu1  ;;  %v5472_v37 = vpop.f32.mrf.mxu0 }
 0x323   : > { %v12968_v23 = vadd.f32 %v9660_v62, %v5236_v42  ;;  %v5235_v3 = vadd.f32 %v5084_v40, %v12797_v19 }
 0x324   : > { %v9611_v51 = vpop.f32.mrf.mxu1  ;;  %v9663_v13 = vpop.f32.mrf.mxu0  ;;  %9922 = vmatmul.mubr.msk.f32.gmra.mxu1 %vm385_vm0, %v12485_v46 }
 0x325   : > { %v12973_v63 = vadd.f32 %v5472_v37, %v5235_v3  ;;  %v5238_v21 = vadd.f32 %v9611_v51, %v12801_v12  ;;  %9924 = vmatprep.mubr.msk.f32.mxu1 %vm385_vm0, %v12491_v30  ;;  %v7219_v3 = vld [vmem:[#allocation3 + $0xca] sm:$0xff] }
 0x326   : > { %v5094_v58 = vpop.f32.mrf.mxu1  ;;  %v5482_v61 = vpop.f32.mrf.mxu0 }
 0x327   : > { %v12978_v54 = vadd.f32 %v9663_v13, %v5238_v21  ;;  %v5237_v5 = vadd.f32 %v5094_v58, %v12805_v7 }
 0x328   : > { %v9614_v32 = vpop.f32.mrf.mxu1  ;;  %v9666_v19 = vpop.f32.mrf.mxu0  ;;  %9925 = vmatmul.mubr.msk.f32.gmra.mxu1 %vm385_vm0, %v12497_v22 }
 0x329   : > { %v12983_v38 = vadd.f32 %v5482_v61, %v5237_v5  ;;  %v5240_v46 = vadd.f32 %v9614_v32, %v12809_v53  ;;  %9927 = vmatprep.mubr.msk.f32.mxu1 %vm385_vm0, %v12503_v36  ;;  %v7221_v5 = vld [vmem:[#allocation3 + $0xe2] sm:$0xff] }
 0x32a   : > { %v5104_v12 = vpop.f32.mrf.mxu1  ;;  %v5492_v30 = vpop.f32.mrf.mxu0 }
 0x32b   : > { %v12988_v39 = vadd.f32 %v9666_v19, %v5240_v46  ;;  %v5239_v47 = vadd.f32 %v5104_v12, %v12814_v18  ;;  %v7222_v19 = vld [vmem:[#allocation3 + $0xf2] sm:$0xff] }
 0x32c   : > { %v9617_v24 = vpop.f32.mrf.mxu1  ;;  %v9669_v7 = vpop.f32.mrf.mxu0  ;;  %9928 = vmatmul.mubr.msk.f32.gmra.mxu1 %vm385_vm0, %v12509_v60 }
 0x32d   : > { %v12993_v4 = vadd.f32 %v5492_v30, %v5239_v47  ;;  %v5242_v22 = vadd.f32 %v9617_v24, %v12818_v50  ;;  %9930 = vmatprep.mubr.msk.f32.mxu1 %vm385_vm0, %v12515_v6  ;;  %v7223_v24 = vld [vmem:[#allocation3 + $0xfa] sm:$0xff] }
 0x32e   : > { %v5114_v53 = vpop.f32.mrf.mxu1  ;;  %v5502_v36 = vpop.f32.mrf.mxu0 }
 0x32f   : > { %v12998_v48 = vadd.f32 %v9669_v7, %v5242_v22  ;;  %v5241_v35 = vadd.f32 %v5114_v53, %v12824_v17  ;;  %v7224_v22 = vld [vmem:[#allocation3 + $0x10a] sm:$0xff] }
 0x330   : > { %v9620_v18 = vpop.f32.mrf.mxu1  ;;  %v9672_v62 = vpop.f32.mrf.mxu0  ;;  %9931 = vmatmul.mubr.msk.f32.gmra.mxu1 %vm385_vm0, %v7217_v16 }
 0x331   : > { %v13002_v42 = vadd.f32 %v5502_v36, %v5241_v35  ;;  %v5244_v60 = vadd.f32 %v9620_v18, %v12830_v55  ;;  %9933 = vmatprep.mubr.msk.f32.mxu1 %vm385_vm0, %v12527_v56 }
 0x332   : > { %v5124_v50 = vpop.f32.mrf.mxu1  ;;  %v5512_v6 = vpop.f32.mrf.mxu0 }
 0x333   : > { %v13007_v40 = vadd.f32 %v9672_v62, %v5244_v60  ;;  %v5243_v37 = vadd.f32 %v5124_v50, %v12836_v43  ;;  %v7225_v62 = vld [vmem:[#allocation3 + $0x112] sm:$0xff]  ;;  %v7226_v50 = vld [vmem:[#allocation3 + $0x122] sm:$0xff] }
 0x334   : > { %v9623_v17 = vpop.f32.mrf.mxu1  ;;  %v9675_v51 = vpop.f32.mrf.mxu0  ;;  %9934 = vmatmul.mubr.msk.f32.gmra.mxu1 %vm385_vm0, %v7219_v3 }
 0x335   : > { %v13011_v13 = vadd.f32 %v5512_v6, %v5243_v37  ;;  %v5246_v21 = vadd.f32 %v9623_v17, %v12842_v25  ;;  %9936 = vmatprep.mubr.msk.f32.mxu1 %vm385_vm0, %v12539_v33 }
 0x336   : > { %v5134_v55 = vpop.f32.mrf.mxu1  ;;  %v5522_v56 = vpop.f32.mrf.mxu0 }
 0x337   : > { %v13016_v58 = vadd.f32 %v9675_v51, %v5246_v21  ;;  %v5245_v61 = vadd.f32 %v5134_v55, %v12848_v14  ;;  %v7227_v21 = vld [vmem:[#allocation3 + $0x12a] sm:$0xff] }
 0x338   : > { %v9626_v43 = vpop.f32.mrf.mxu1  ;;  %v9678_v32 = vpop.f32.mrf.mxu0  ;;  %9937 = vmatmul.mubr.msk.f32.gmra.mxu1 %vm385_vm0, %v7221_v5 }
 0x339   : > { %v13020_v46 = vadd.f32 %v5522_v56, %v5245_v61  ;;  %v5248_v12 = vadd.f32 %v9626_v43, %v12854_v9  ;;  %9939 = vmatprep.mubr.msk.f32.mxu1 %vm385_vm0, %v7222_v19  ;;  %v7228_v56 = vld [vmem:[#allocation3 + $0x13a] sm:$0xff] }
 0x33a   : > { %v5144_v25 = vpop.f32.mrf.mxu1  ;;  %v5532_v33 = vpop.f32.mrf.mxu0 }
 0x33b   : > { %v13024_v30 = vadd.f32 %v9678_v32, %v5248_v12  ;;  %v5247_v47 = vadd.f32 %v5144_v25, %v12860_v10  ;;  %v7229_v12 = vld [vmem:[#allocation3 + $0x142] sm:$0xff] }
 0x33c   : > { %v9629_v14 = vpop.f32.mrf.mxu1  ;;  %v9681_v7 = vpop.f32.mrf.mxu0  ;;  %9940 = vmatmul.mubr.msk.f32.gmra.mxu1 %vm385_vm0, %v7223_v24 }
 0x33d   : > { %v13028_v53 = vadd.f32 %v5532_v33, %v5247_v47  ;;  %v5250_v36 = vadd.f32 %v9629_v14, %v12866_v11  ;;  %9942 = vmatprep.mubr.msk.f32.mxu1 %vm385_vm0, %v7224_v22  ;;  %v7230_v33 = vld [vmem:[#allocation3 + $0x152] sm:$0xff] }
 0x33e   : > { %v5154_v9 = vpop.f32.mrf.mxu1  ;;  %v5542_v35 = vpop.f32.mrf.mxu0 }
 0x33f   : > { %v13032_v16 = vadd.f32 %v9681_v7, %v5250_v36  ;;  %v5249_v18 = vadd.f32 %v5154_v9, %v12872_v52  ;;  %v7231_v36 = vld [vmem:[#allocation3 + $0x15a] sm:$0xff] }
 0x340   : > { %v9632_v10 = vpop.f32.mrf.mxu1  ;;  %v9684_v60 = vpop.f32.mrf.mxu0  ;;  %9943 = vmatmul.mubr.msk.f32.gmra.mxu1 %vm385_vm0, %v7225_v62 }
 0x341   : > { %v13036_v6 = vadd.f32 %v5542_v35, %v5249_v18  ;;  %v5252_v37 = vadd.f32 %v9632_v10, %v12878_v1  ;;  %9945 = vmatprep.mubr.msk.f32.mxu1 %vm385_vm0, %v7226_v50  ;;  %v7232_v35 = vld [vmem:[#allocation3 + $0x16a] sm:$0xff] }
 0x342   : > { %v5164_v11 = vpop.f32.mrf.mxu1  ;;  %v5552_v3 = vpop.f32.mrf.mxu0 }
 0x343   : > { %v13040_v17 = vadd.f32 %v9684_v60, %v5252_v37  ;;  %v5251_v51 = vadd.f32 %v5164_v11, %v12884_v28  ;;  %v7233_v37 = vld [vmem:[#allocation3 + $0x172] sm:$0xff] }
 0x344   : > { %v9635_v52 = vpop.f32.mrf.mxu1  ;;  %v9687_v55 = vpop.f32.mrf.mxu0  ;;  %9946 = vmatmul.mubr.msk.f32.gmra.mxu1 %vm385_vm0, %v7227_v21 }
 0x345   : > { %v13044_v61 = vadd.f32 %v5552_v3, %v5251_v51  ;;  %v5254_v5 = vadd.f32 %v9635_v52, %v12890_v59  ;;  %9948 = vmatprep.mubr.msk.f32.mxu1 %vm385_vm0, %v7228_v56  ;;  %v7236_v52 = vld [vmem:[#allocation3 + $0x19a] sm:$0xff] }
 0x346   : > { %v5174_v1 = vpop.f32.mrf.mxu1  ;;  %v5562_v43 = vpop.f32.mrf.mxu0 }
 0x347   : > { %v13048_v32 = vadd.f32 %v9687_v55, %v5254_v5  ;;  %v5253_v19 = vadd.f32 %v5174_v1, %v12896_v31 }
 0x348   : > { %v9638_v28 = vpop.f32.mrf.mxu1  ;;  %v9690_v25 = vpop.f32.mrf.mxu0  ;;  %9949 = vmatmul.mubr.msk.f32.gmra.mxu1 %vm385_vm0, %v7229_v12 }
 0x349   : > { %v13052_v47 = vadd.f32 %v5562_v43, %v5253_v19  ;;  %v5256_v24 = vadd.f32 %v9638_v28, %v12902_v49  ;;  %9951 = vmatprep.mubr.msk.f32.mxu1 %vm385_vm0, %v7230_v33 }
 0x34a   : > { %v5184_v59 = vpop.f32.mrf.mxu1  ;;  %v5572_v14 = vpop.f32.mrf.mxu0 }
 0x34b   : > { %v13056_v7 = vadd.f32 %v9690_v25, %v5256_v24  ;;  %v5255_v22 = vadd.f32 %v5184_v59, %v12908_v27 }
 0x34c   : > { %v9641_v31 = vpop.f32.mrf.mxu1  ;;  %v9693_v9 = vpop.f32.mrf.mxu0  ;;  %9952 = vmatmul.mubr.msk.f32.gmra.mxu1 %vm385_vm0, %v7231_v36 }
 0x34d   : > { %v13060_v18 = vadd.f32 %v5572_v14, %v5255_v22  ;;  %v5258_v62 = vadd.f32 %v9641_v31, %v12914_v8  ;;  %9954 = vmatprep.mubr.msk.f32.mxu1 %vm385_vm0, %v7232_v35 }
 0x34e   : > { %v5194_v49 = vpop.f32.mrf.mxu1  ;;  %v5582_v10 = vpop.f32.mrf.mxu0 }
 0x34f   : > { %v13064_v60 = vadd.f32 %v9693_v9, %v5258_v62  ;;  %v5257_v50 = vadd.f32 %v5194_v49, %v12920_v57 }
 0x350   : > { %v9644_v27 = vpop.f32.mrf.mxu1  ;;  %v9696_v11 = vpop.f32.mrf.mxu0  ;;  %9955 = vmatmul.mubr.msk.f32.gmra.mxu1 %vm385_vm0, %v7233_v37 }
 0x351   : > { %v13068_v3 = vadd.f32 %v5582_v10, %v5257_v50  ;;  %v5260_v51 = vadd.f32 %v9644_v27, %v12926_v0  ;;  %9957 = vmatprep.mubr.msk.f32.mxu1 %vm385_vm0, %v12763_v45  ;;  %v7237_v0 = vld [vmem:[#allocation3 + $0x1a2] sm:$0xff] }
 0x352   : > { %v5204_v8 = vpop.f32.mrf.mxu1  ;;  %v5592_v21 = vpop.f32.mrf.mxu0 }
 0x353   : > { %v13073_v55 = vadd.f32 %v9696_v11, %v5260_v51  ;;  %v5259_v56 = vadd.f32 %v5204_v8, %v12932_v26 }
 0x354   : > { %v9647_v57 = vpop.f32.mrf.mxu1  ;;  %v9699_v5 = vpop.f32.mrf.mxu0  ;;  %9958 = vmatmul.mubr.msk.f32.gmra.mxu1 %vm385_vm0, %v12771_v20 }
 0x355   : > { %v13078_v1 = vadd.f32 %v5592_v21, %v5259_v56  ;;  %v5262_v43 = vadd.f32 %v9647_v57, %v12938_v29  ;;  %9960 = vmatprep.mubr.msk.f32.mxu1 %vm385_vm0, %v7236_v52 }
 0x356   : > { %v5214_v45 = vpop.f32.mrf.mxu1  ;;  %v5602_v19 = vpop.f32.mrf.mxu0 }
 0x357   : > { %v13082_v12 = vadd.f32 %v9699_v5, %v5262_v43  ;;  %v5261_v28 = vadd.f32 %v5214_v45, %v12942_v15 }
 0x358   : > { %v9650_v25 = vpop.f32.mrf.mxu1  ;;  %v9702_v26 = vpop.f32.mrf.mxu0  ;;  %9961 = vmatmul.mubr.msk.f32.gmra.mxu1 %vm385_vm0, %v7237_v0 }
 0x359   : > { %v13086_v33 = vadd.f32 %v5602_v19, %v5261_v28  ;;  %v5264_v20 = vadd.f32 %v9650_v25, %v12946_v44 }
 0x35a   : > { %v5224_v24 = vpop.f32.mrf.mxu1  ;;  %v5612_v59 = vpop.f32.mrf.mxu0 }
 0x35b   : > { %v13089_v29 = vadd.f32 %v9702_v26, %v5264_v20  ;;  %v5263_v14 = vadd.f32 %v5224_v24, %v12950_v34 }
 0x35c   : > { %v9709_v22 = vpop.f32.mrf.mxu1  ;;  %v13092_v36 = vpop.f32.mrf.mxu0 }
 0x35d   : > { %v13094_v31 = vadd.f32 %v5612_v59, %v5263_v14  ;;  %v13097_v15 = vadd.f32 %v9709_v22, %v12959_v41 }
 0x35e   : > { %v5850_v9 = vpop.f32.mrf.mxu1  ;;  %v13099_v35 = vpop.f32.mrf.mxu0 }
 0x35f   : > { %v13102_v62 = vadd.f32 %v5850_v9, %v12963_v2 }
 0x360   : > { %v9712_v44 = vpop.f32.mrf.mxu1  ;;  %v13104_v49 = vpop.f32.mrf.mxu0 }
 0x361   : > { %v13107_v10 = vadd.f32 %v9712_v44, %v12968_v23 }
 0x362   : > { %v5860_v34 = vpop.f32.mrf.mxu1  ;;  %v13109_v50 = vpop.f32.mrf.mxu0 }
 0x363   : > { %v13112_v37 = vadd.f32 %v5860_v34, %v12973_v63 }
 0x364   : > { %v9715_v41 = vpop.f32.mrf.mxu1  ;;  %v13114_v27 = vpop.f32.mrf.mxu0 }
 0x365   : > { %v13117_v11 = vadd.f32 %v9715_v41, %v12978_v54 }
 0x366   : > { %v5870_v2 = vpop.f32.mrf.mxu1  ;;  %v13119_v51 = vpop.f32.mrf.mxu0 }
 0x367   : > { %v13122_v8 = vadd.f32 %v5870_v2, %v12983_v38 }
 0x368   : > { %v9718_v23 = vpop.f32.mrf.mxu1  ;;  %v13124_v21 = vpop.f32.mrf.mxu0 }
 0x369   : > { %v13127_v52 = vadd.f32 %v9718_v23, %v12988_v39 }
 0x36a   : > { %v5880_v63 = vpop.f32.mrf.mxu1  ;;  %v13129_v56 = vpop.f32.mrf.mxu0 }
 0x36b   : > { %v13132_v57 = vadd.f32 %v5880_v63, %v12993_v4 }
 0x36c   : > { %v9721_v54 = vpop.f32.mrf.mxu1  ;;  %v13134_v5 = vpop.f32.mrf.mxu0 }
 0x36d   : > { %v13137_v43 = vadd.f32 %v9721_v54, %v12998_v48 }
 0x36e   : > { %v5890_v38 = vpop.f32.mrf.mxu1  ;;  %v13139_v0 = vpop.f32.mrf.mxu0 }
 0x36f   : > { %v13142_v45 = vadd.f32 %v5890_v38, %v13002_v42 }
 0x370   : > { %v9724_v39 = vpop.f32.mrf.mxu1  ;;  %v13144_v19 = vpop.f32.mrf.mxu0 }
 0x371   : > { %v13147_v28 = vadd.f32 %v9724_v39, %v13007_v40 }
 0x372   : > { %v5900_v4 = vpop.f32.mrf.mxu1  ;;  %v13149_v25 = vpop.f32.mrf.mxu0 }
 0x373   : > { %v13152_v26 = vadd.f32 %v5900_v4, %v13011_v13 }
 0x374   : > { %v9727_v48 = vpop.f32.mrf.mxu1  ;;  %v13154_v20 = vpop.f32.mrf.mxu0 }
 0x375   : > { %v13157_v24 = vadd.f32 %v9727_v48, %v13016_v58 }
 0x376   : > { %v5910_v42 = vpop.f32.mrf.mxu1  ;;  %v13159_v59 = vpop.f32.mrf.mxu0 }
 0x377   : > { %v13162_v14 = vadd.f32 %v5910_v42, %v13020_v46 }
 0x378   : > { %v9730_v40 = vpop.f32.mrf.mxu1  ;;  %v13164_v22 = vpop.f32.mrf.mxu0 }
 0x379   : > { %13984 = vst [vmem:[#allocation33_spill] sm:$0xff] %v13164_v22  ;;  %v13167_v9 = vadd.f32 %v9730_v40, %v13024_v30 }
 0x37a   : > { %v5920_v13 = vpop.f32.mrf.mxu1  ;;  %v13169_v44 = vpop.f32.mrf.mxu0 }
 0x37b   : > { %13985 = vst [vmem:[#allocation32_spill] sm:$0xff] %v13169_v44  ;;  %v13172_v34 = vadd.f32 %v5920_v13, %v13028_v53 }
 0x37c   : > { %v9733_v58 = vpop.f32.mrf.mxu1  ;;  %v13174_v41 = vpop.f32.mrf.mxu0 }
 0x37d   : > { %13986 = vst [vmem:[#allocation34_spill] sm:$0xff] %v13172_v34  ;;  %13987 = vst [vmem:[#allocation36_spill] sm:$0xff] %v13174_v41  ;;  %v13177_v2 = vadd.f32 %v9733_v58, %v13032_v16 }
 0x37e   : > { %v5930_v46 = vpop.f32.mrf.mxu1  ;;  %v13179_v23 = vpop.f32.mrf.mxu0 }
 0x37f   : > { %13988 = vst [vmem:[#allocation35_spill] sm:$0xff] %v13177_v2  ;;  %13989 = vst [vmem:[#allocation37_spill] sm:$0xff] %v13179_v23  ;;  %v13182_v63 = vadd.f32 %v5930_v46, %v13036_v6 }
 0x380   : > { %v9736_v30 = vpop.f32.mrf.mxu1  ;;  %v13184_v54 = vpop.f32.mrf.mxu0 }
 0x381   : > { %13990 = vst [vmem:[#allocation39_spill] sm:$0xff] %v13182_v63  ;;  %13991 = vst [vmem:[#allocation38_spill] sm:$0xff] %v13184_v54  ;;  %v13187_v38 = vadd.f32 %v9736_v30, %v13040_v17 }
 0x382   : > { %v5940_v53 = vpop.f32.mrf.mxu1  ;;  %v13189_v39 = vpop.f32.mrf.mxu0 }
 0x383   : > { %13992 = vst [vmem:[#allocation40_spill] sm:$0xff] %v13187_v38  ;;  %13993 = vst [vmem:[#allocation42_spill] sm:$0xff] %v13189_v39  ;;  %v13192_v4 = vadd.f32 %v5940_v53, %v13044_v61 }
 0x384   : > { %v9739_v16 = vpop.f32.mrf.mxu1  ;;  %v13194_v48 = vpop.f32.mrf.mxu0 }
 0x385   : > { %13994 = vst [vmem:[#allocation41_spill] sm:$0xff] %v13192_v4  ;;  %13995 = vst [vmem:[#allocation43_spill] sm:$0xff] %v13194_v48  ;;  %v13197_v42 = vadd.f32 %v9739_v16, %v13048_v32 }
 0x386   : > { %v5950_v6 = vpop.f32.mrf.mxu1  ;;  %v13199_v40 = vpop.f32.mrf.mxu0 }
 0x387   : > { %13996 = vst [vmem:[#allocation45_spill] sm:$0xff] %v13197_v42  ;;  %13997 = vst [vmem:[#allocation44_spill] sm:$0xff] %v13199_v40  ;;  %v13202_v13 = vadd.f32 %v5950_v6, %v13052_v47 }
 0x388   : > { %v9742_v17 = vpop.f32.mrf.mxu1  ;;  %v13204_v58 = vpop.f32.mrf.mxu0 }
 0x389   : > { %13998 = vst [vmem:[#allocation46_spill] sm:$0xff] %v13202_v13  ;;  %13999 = vst [vmem:[#allocation48_spill] sm:$0xff] %v13204_v58  ;;  %v13207_v46 = vadd.f32 %v9742_v17, %v13056_v7 }
 0x38a   : > { %v5960_v61 = vpop.f32.mrf.mxu1  ;;  %v13209_v30 = vpop.f32.mrf.mxu0 }
 0x38b   : > { %14000 = vst [vmem:[#allocation47_spill] sm:$0xff] %v13207_v46  ;;  %14001 = vst [vmem:[#allocation49_spill] sm:$0xff] %v13209_v30  ;;  %v13212_v53 = vadd.f32 %v5960_v61, %v13060_v18 }
 0x38c   : > { %v9745_v32 = vpop.f32.mrf.mxu1  ;;  %v13214_v16 = vpop.f32.mrf.mxu0 }
 0x38d   : > { %14002 = vst [vmem:[#allocation51_spill] sm:$0xff] %v13212_v53  ;;  %14003 = vst [vmem:[#allocation50_spill] sm:$0xff] %v13214_v16  ;;  %v13217_v40 = vadd.f32 %v9745_v32, %v13064_v60 }
 0x38e   : > { %v5970_v47 = vpop.f32.mrf.mxu1  ;;  %v13219_v6 = vpop.f32.mrf.mxu0 }
 0x38f   : > { %14004 = vst [vmem:[#allocation52_spill] sm:$0xff] %v13217_v40  ;;  %14005 = vst [vmem:[#allocation54_spill] sm:$0xff] %v13219_v6  ;;  %v13222_v58 = vadd.f32 %v5970_v47, %v13068_v3 }
 0x390   : > { %v9748_v7 = vpop.f32.mrf.mxu1  ;;  %v13224_v17 = vpop.f32.mrf.mxu0 }
 0x391   : > { %14006 = vst [vmem:[#allocation53_spill] sm:$0xff] %v13222_v58  ;;  %14007 = vst [vmem:[#allocation55_spill] sm:$0xff] %v13224_v17  ;;  %v13227_v30 = vadd.f32 %v9748_v7, %v13073_v55 }
 0x392   : > { %v5980_v18 = vpop.f32.mrf.mxu1  ;;  %v13229_v61 = vpop.f32.mrf.mxu0 }
 0x393   : > { %14008 = vst [vmem:[#allocation57_spill] sm:$0xff] %v13227_v30  ;;  %14009 = vst [vmem:[#allocation56_spill] sm:$0xff] %v13229_v61  ;;  %v13232_v16 = vadd.f32 %v5980_v18, %v13078_v1 }
 0x394   : > { %v9751_v60 = vpop.f32.mrf.mxu1  ;;  %v13234_v32 = vpop.f32.mrf.mxu0 }
 0x395   : > { %14010 = vst [vmem:[#allocation61_spill] sm:$0xff] %v13232_v16  ;;  %14011 = vst [vmem:[#allocation63_spill] sm:$0xff] %v13234_v32  ;;  %v13237_v6 = vadd.f32 %v9751_v60, %v13082_v12 }
 0x396   : > { %v5990_v3 = vpop.f32.mrf.mxu1  ;;  %v13239_v47 = vpop.f32.mrf.mxu0 }
 0x397   : > { %14012 = vst [vmem:[#allocation65_spill] sm:$0xff] %v13237_v6  ;;  %14013 = vst [vmem:[#allocation67_spill] sm:$0xff] %v13239_v47  ;;  %v13242_v17 = vadd.f32 %v5990_v3, %v13086_v33 }
 0x398   : > { %v9754_v55 = vpop.f32.mrf.mxu1  ;;  %v13244_v7 = vpop.f32.mrf.mxu0 }
 0x399   : > { %14014 = vst [vmem:[#allocation68_spill] sm:$0xff] %v13242_v17  ;;  %14015 = vst [vmem:[#allocation70_spill] sm:$0xff] %v13244_v7  ;;  %v13247_v61 = vadd.f32 %v9754_v55, %v13089_v29 }
 0x39a   : > { %v6000_v1 = vpop.f32.mrf.mxu1  ;;  %v13249_v18 = vpop.f32.mrf.mxu0 }
 0x39b   : > { %14016 = vst [vmem:[#allocation71_spill] sm:$0xff] %v13247_v61  ;;  %14017 = vst [vmem:[#allocation58_spill] sm:$0xff] %v13249_v18  ;;  %v13252_v32 = vadd.f32 %v6000_v1, %v13094_v31 }
 0x39c   : > { %v9813_v12 = vpop.f32.mrf.mxu1  ;;  %v9865_v60 = vpop.f32.mrf.mxu0 }
 0x39d   : > { %14018 = vst [vmem:[#allocation64_spill] sm:$0xff] %v13252_v32 }
 0x39e   : > { %v6627_v6 = vpop.f32.mrf.mxu1  ;;  %v7015_v16 = vpop.f32.mrf.mxu0 }
 0x3a0   : > { %v9816_v47 = vpop.f32.mrf.mxu1  ;;  %v9868_v33 = vpop.f32.mrf.mxu0 }
 0x3a2   : > { %v6637_v30 = vpop.f32.mrf.mxu1  ;;  %v13256_v7 = vpop.f32.mrf.mxu0 }
 0x3a4   : > { %v9819_v3 = vpop.f32.mrf.mxu1  ;;  %v13262_v18 = vpop.f32.mrf.mxu0 }
 0x3a6   : > { %v13254_v17 = vpop.f32.mrf.mxu1  ;;  %v13268_v32 = vpop.f32.mrf.mxu0 }
 0x3a8   : > { %v13258_v29 = vpop.f32.mrf.mxu1  ;;  %v13274_v40 = vpop.f32.mrf.mxu0 }
 0x3aa   : > { %v13260_v55 = vpop.f32.mrf.mxu1  ;;  %v13280_v13 = vpop.f32.mrf.mxu0 }
 0x3ac   : > { %v13264_v31 = vpop.f32.mrf.mxu1  ;;  %v13286_v39 = vpop.f32.mrf.mxu0 }
 0x3ae   : > { %v13266_v1 = vpop.f32.mrf.mxu1  ;;  %v13292_v38 = vpop.f32.mrf.mxu0 }
 0x3b0   : > { %v13270_v61 = vpop.f32.mrf.mxu1  ;;  %v13298_v41 = vpop.f32.mrf.mxu0 }
 0x3b2   : > { %v13272_v58 = vpop.f32.mrf.mxu1 }
 0x3b4   : > { %v13276_v53 = vpop.f32.mrf.mxu1 }
 0x3b6   : > { %v13278_v46 = vpop.f32.mrf.mxu1 }
 0x3b7   : > { %14019 = vst [vmem:[#allocation73_spill] sm:$0xff] %v13278_v46 }
 0x3b8   : > { %v13282_v48 = vpop.f32.mrf.mxu1 }
 0x3b9   : > { %14020 = vst [vmem:[#allocation60_spill] sm:$0xff] %v13282_v48  ;;  %v13304_v48 = vpop.f32.mrf.mxu0 }
 0x3ba   : > { %v13284_v42 = vpop.f32.mrf.mxu1 }
 0x3bb   : > { %14021 = vst [vmem:[#allocation59_spill] sm:$0xff] %v13284_v42 }
 0x3bc   : > { %v13288_v4 = vpop.f32.mrf.mxu1 }
 0x3bd   : > { %14022 = vst [vmem:[#allocation74_spill] sm:$0xff] %v13288_v4  ;;  %v13310_v4 = vpop.f32.mrf.mxu0 }
 0x3be   : > { %v13290_v54 = vpop.f32.mrf.mxu1  ;;  %14030 = vst [vmem:[#allocation78_spill] sm:$0xff] %v13310_v4 }
 0x3bf   : > { %14023 = vst [vmem:[#allocation76_spill] sm:$0xff] %v13290_v54 }
 0x3c0   : > { %v13294_v23 = vpop.f32.mrf.mxu1 }
 0x3c1   : > { %14024 = vst [vmem:[#allocation77_spill] sm:$0xff] %v13294_v23  ;;  %v13316_v23 = vpop.f32.mrf.mxu0 }
 0x3c2   : > { %v13296_v63 = vpop.f32.mrf.mxu1  ;;  %14033 = vst [vmem:[#allocation80_spill] sm:$0xff] %v13316_v23 }
 0x3c3   : > { %14025 = vst [vmem:[#allocation62_spill] sm:$0xff] %v13296_v63 }
 0x3c4   : > { %v13300_v2 = vpop.f32.mrf.mxu1 }
 0x3c5   : > { %14026 = vst [vmem:[#allocation66_spill] sm:$0xff] %v13300_v2  ;;  %v13322_v2 = vpop.f32.mrf.mxu0 }
 0x3c6   : > { %v13302_v44 = vpop.f32.mrf.mxu1  ;;  %14036 = vst [vmem:[#allocation84_spill] sm:$0xff] %v13322_v2 }
 0x3c7   : > { %14027 = vst [vmem:[#allocation69_spill] sm:$0xff] %v13302_v44 }
 0x3c8   : > { %v13306_v42 = vpop.f32.mrf.mxu1 }
 0x3c9   : > { %14028 = vst [vmem:[#allocation72_spill] sm:$0xff] %v13306_v42  ;;  %v6398_v42 = vadd.f32 %v13092_v36, %v13097_v15 }
 0x3ca   : > { %v13308_v34 = vpop.f32.mrf.mxu1 }
 0x3cb   : > { %14029 = vst [vmem:[#allocation75_spill] sm:$0xff] %v13308_v34  ;;  %v6787_v4 = vadd.f32 %v9813_v12, %v6398_v42  ;;  %v13349_v42 = vld [vmem:[%s13654_s6] ss:$0 sm:$0xff] }
 0x3cc   : > { %v13312_v54 = vpop.f32.mrf.mxu1 }
 0x3cd   : > { %14031 = vst [vmem:[#allocation81_spill] sm:$0xff] %v13312_v54  ;;  %v6397_v54 = vadd.f32 %v13099_v35, %v13102_v62  ;;  %v7175_v36 = vadd.f32 %v9865_v60, %v6787_v4  ;;  %v6402_v35 = vadd.f32 %v13114_v27, %v13117_v11  ;;  %v6403_v60 = vadd.f32 %v13129_v56, %v13132_v57 }
 0x3ce   : > { %v13314_v46 = vpop.f32.mrf.mxu1 }
 0x3cf   : > { %14032 = vst [vmem:[#allocation79_spill] sm:$0xff] %v13314_v46  ;;  %v13332_v46 = vpop.f32.mrf.mxu0 }
 0x3d0   : > { %v13318_v63 = vpop.f32.mrf.mxu1 }
 0x3d1   : > { %14034 = vst [vmem:[#allocation82_spill] sm:$0xff] %v13318_v63  ;;  %v6786_v63 = vadd.f32 %v6627_v6, %v6397_v54  ;;  %v6401_v6 = vadd.f32 %v13119_v51, %v13122_v8 }
 0x3d2   : > { %v13320_v22 = vpop.f32.mrf.mxu1 }
 0x3d3   : > { %14035 = vst [vmem:[#allocation83_spill] sm:$0xff] %v13320_v22  ;;  %v6400_v22 = vadd.f32 %v13104_v49, %v13107_v10  ;;  %v7174_v49 = vadd.f32 %v7015_v16, %v6786_v63  ;;  %v6790_v51 = vadd.f32 %v13254_v17, %v6401_v6  ;;  %v9973_v17 = vld [vmem:[%s10332_s20 + $0x8] sm:$0xff] }
 0x3d4   : > { %v13324_v44 = vpop.f32.mrf.mxu1 }
 0x3d5   : > { %14037 = vst [vmem:[#allocation85_spill] sm:$0xff] %v13324_v44  ;;  %v6399_v44 = vadd.f32 %v13109_v50, %v13112_v37  ;;  %v6789_v15 = vadd.f32 %v9816_v47, %v6400_v22  ;;  %v6791_v50 = vadd.f32 %v9819_v3, %v6402_v35  ;;  %v13356_v37 = vld [vmem:[%s13654_s6 + $0x1] ss:$0 sm:$0xff] }
 0x3d6   : > { %v13328_v34 = vpop.f32.mrf.mxu1 }
 0x3d7   : > { %14038 = vst [vmem:[#allocation86_spill] sm:$0xff] %v13328_v34  ;;  %v13342_v34 = vpop.f32.mrf.mxu0  ;;  %v6788_v10 = vadd.f32 %v6637_v30, %v6399_v44  ;;  %v7177_v11 = vadd.f32 %v9868_v33, %v6789_v15  ;;  %v6404_v44 = vadd.f32 %v13124_v21, %v13127_v52  ;;  %v7179_v33 = vadd.f32 %v13262_v18, %v6791_v50 }
 0x3d8   : > { %v13334_v23 = vpop.f32.mrf.mxu1  ;;  %v6406_v18 = vadd.f32 %v13134_v5, %v13137_v43  ;;  %v6792_v15 = vadd.f32 %v13260_v55, %v6403_v60  ;;  %v6405_v50 = vadd.f32 %v13139_v0, %v13142_v45  ;;  %v6408_v0 = vadd.f32 %v13144_v19, %v13147_v28  ;;  %v9977_v60 = vld [vmem:[%s10332_s20 + $0x28] sm:$0xff] }
 0x3d9   : > { %v13358_v22 = vpop.f32.mrf.mxu0  ;;  %v7176_v30 = vadd.f32 %v13256_v7, %v6788_v10  ;;  %v6793_v3 = vadd.f32 %v13258_v29, %v6404_v44  ;;  %v7178_v29 = vadd.f32 %v13268_v32, %v6790_v51  ;;  %v9976_v51 = vld [vmem:[%s10332_s20 + $0x10] sm:$0xff] }
 0x3da   : > { %v13338_v2 = vpop.f32.mrf.mxu1  ;;  %v6795_v43 = vadd.f32 %v13264_v31, %v6406_v18  ;;  %v7180_v45 = vadd.f32 %v13280_v13, %v6792_v15  ;;  %v6797_v28 = vadd.f32 %v13270_v61, %v6408_v0  ;;  %v9979_v15 = vld [vmem:[%s10332_s20 + $0x38] sm:$0xff] }
 0x3db   : > { %v13378_v52 = vpop.f32.mrf.mxu0  ;;  %v7181_v5 = vadd.f32 %v13274_v40, %v6793_v3  ;;  %v6794_v40 = vadd.f32 %v13266_v1, %v6405_v50  ;;  %v9980_v50 = vld [vmem:[%s10332_s20 + $0x30] sm:$0xff] }
 0x3dc   : > { %v9917_v62 = vpop.f32.mrf.mxu1  ;;  %v7183_v19 = vadd.f32 %v13286_v39, %v6795_v43 }
 0x3dd   : > { %v7563_v54 = vadd.f32 %v9917_v62, %v7175_v36  ;;  %v9974_v62 = vld [vmem:[%s10332_s20] sm:$0xff]  ;;  %v13396_v55 = vpop.f32.mrf.mxu0 }
 0x3de   : > { %v7403_v27 = vpop.f32.mrf.mxu1 }
 0x3df   : > { %v7600_v4 = vmul.f32 %v13349_v42, %v7563_v54  ;;  %v7562_v63 = vadd.f32 %v7403_v27, %v7174_v49  ;;  %v9975_v27 = vld [vmem:[%s10332_s20 + $0x18] sm:$0xff]  ;;  %v13416_v1 = vpop.f32.mrf.mxu0 }
 0x3e0   : > { %v9920_v8 = vpop.f32.mrf.mxu1 }
 0x3e1   : > { %v7637_v16 = vadd.f32 %v13356_v37, %v7600_v4  ;;  %v7599_v47 = vmul.f32 %v13349_v42, %v7562_v63  ;;  %v7565_v12 = vadd.f32 %v9920_v8, %v7177_v11 }
 0x3e2   : > { %v7413_v21 = vpop.f32.mrf.mxu1 }
 0x3e3   : > { %v7669_v7 = vadd.f32 %v9973_v17, %v7637_v16  ;;  %v7636_v36 = vadd.f32 %v13356_v37, %v7599_v47  ;;  %v7602_v56 = vmul.f32 %v13349_v42, %v7565_v12  ;;  %v7564_v57 = vadd.f32 %v7413_v21, %v7176_v30 }
 0x3e4   : > { %v9923_v35 = vpop.f32.mrf.mxu1  ;;  %v6407_v12 = vadd.f32 %v13149_v25, %v13152_v26  ;;  %v6410_v25 = vadd.f32 %v13154_v20, %v13157_v24  ;;  %v7182_v26 = vadd.f32 %v13292_v38, %v6794_v40  ;;  %v7185_v20 = vadd.f32 %v13298_v41, %v6797_v28  ;;  %v14040_v41 = vld [vmem:[#allocation73_spill] sm:$0xff]  ;;  %v14047_v28 = vld [vmem:[#allocation80_spill] sm:$0xff] }
 0x3e5   : > { %7701 = vst.msk [vmem:[%s13376_s21 + $0x8] sm:$0xff] %vm385_vm0, %v7669_v7  ;;  %v7668_v49 = vadd.f32 %v9974_v62, %v7636_v36  ;;  %v7639_v10 = vadd.f32 %v13356_v37, %v7602_v56  ;;  %v7601_v54 = vmul.f32 %v13349_v42, %v7564_v57  ;;  %v7567_v6 = vadd.f32 %v9923_v35, %v7179_v33  ;;  %v9978_v7 = vld [vmem:[%s10332_s20 + $0x20] sm:$0xff] }
 0x3e6   : > { %v7423_v32 = vpop.f32.mrf.mxu1  ;;  %v6796_v39 = vadd.f32 %v13272_v58, %v6407_v12  ;;  %v6799_v24 = vadd.f32 %v13276_v53, %v6410_v25  ;;  %v13436_v58 = vpop.f32.mrf.mxu0  ;;  %v14046_v12 = vld [vmem:[#allocation36_spill] sm:$0xff] }
 0x3e7   : > { %7700 = vst.msk [vmem:[%s13376_s21] sm:$0xff] %vm385_vm0, %v7668_v49  ;;  %v7671_v11 = vadd.f32 %v9975_v27, %v7639_v10  ;;  %v7638_v4 = vadd.f32 %v13356_v37, %v7601_v54  ;;  %v7604_v63 = vmul.f32 %v13349_v42, %v7567_v6  ;;  %v7566_v44 = vadd.f32 %v7423_v32, %v7178_v29  ;;  %v14039_v54 = vld [vmem:[#allocation33_spill] sm:$0xff] }
 0x3e8   : > { %v9926_v31 = vpop.f32.mrf.mxu1  ;;  %v6409_v29 = vadd.f32 %v13159_v59, %v13162_v14  ;;  %v6412_v59 = vadd.f32 %v14039_v54, %v13167_v9  ;;  %v7184_v14 = vadd.f32 %v13304_v48, %v6796_v39  ;;  %v14043_v9 = vld [vmem:[#allocation78_spill] sm:$0xff]  ;;  %v14044_v48 = vld [vmem:[#allocation60_spill] sm:$0xff]  ;;  %v13456_v40 = vpop.f32.mrf.mxu0 }
 0x3e9   : > { %7703 = vst.msk [vmem:[%s13376_s21 + $0x18] sm:$0xff] %vm385_vm0, %v7671_v11  ;;  %v7670_v8 = vadd.f32 %v9976_v51, %v7638_v4  ;;  %v7641_v30 = vadd.f32 %v13356_v37, %v7604_v63  ;;  %v7603_v16 = vmul.f32 %v13349_v42, %v7566_v44  ;;  %v7569_v47 = vadd.f32 %v9926_v31, %v7181_v5  ;;  %v14041_v11 = vld [vmem:[#allocation34_spill] sm:$0xff]  ;;  %v14042_v4 = vld [vmem:[#allocation32_spill] sm:$0xff]  ;;  %v9981_v31 = vld [vmem:[%s10332_s20 + $0x48] sm:$0xff] }
 0x3ea   : > { %v7433_v13 = vpop.f32.mrf.mxu1  ;;  %v6798_v53 = vadd.f32 %v14040_v41, %v6409_v29  ;;  %v6411_v63 = vadd.f32 %v14042_v4, %v14041_v11  ;;  %v7187_v44 = vadd.f32 %v14043_v9, %v6799_v24  ;;  %v6801_v0 = vadd.f32 %v14044_v48, %v6412_v59  ;;  %v13476_v24 = vpop.f32.mrf.mxu0  ;;  %v14054_v54 = vld [vmem:[#allocation38_spill] sm:$0xff]  ;;  %v14055_v41 = vld [vmem:[#allocation76_spill] sm:$0xff]  ;;  %v14056_v11 = vld [vmem:[#allocation41_spill] sm:$0xff] }
 0x3eb   : > { %7702 = vst.msk [vmem:[%s13376_s21 + $0x10] sm:$0xff] %vm385_vm0, %v7670_v8  ;;  %v7673_v33 = vadd.f32 %v9977_v60, %v7641_v30  ;;  %v7640_v3 = vadd.f32 %v13356_v37, %v7603_v16  ;;  %v7606_v21 = vmul.f32 %v13349_v42, %v7569_v47  ;;  %v7568_v17 = vadd.f32 %v7433_v13, %v7180_v45  ;;  %v14045_v47 = vld [vmem:[#allocation35_spill] sm:$0xff]  ;;  %v14057_v4 = vld [vmem:[#allocation42_spill] sm:$0xff] }
 0x3ec   : > { %v9929_v61 = vpop.f32.mrf.mxu1  ;;  %v7186_v13 = vadd.f32 %v14047_v28, %v6798_v53  ;;  %v14048_v60 = vld [vmem:[#allocation59_spill] sm:$0xff] }
 0x3ed   : > { %7705 = vst.msk [vmem:[%s13376_s21 + $0x28] sm:$0xff] %vm385_vm0, %v7673_v33  ;;  %v7672_v36 = vadd.f32 %v9978_v7, %v7640_v3  ;;  %v7643_v56 = vadd.f32 %v13356_v37, %v7606_v21  ;;  %v7605_v57 = vmul.f32 %v13349_v42, %v7568_v17  ;;  %v7571_v18 = vadd.f32 %v9929_v61, %v7183_v19  ;;  %v9982_v21 = vld [vmem:[%s10332_s20 + $0x40] sm:$0xff]  ;;  %v14049_v61 = vld [vmem:[#allocation39_spill] sm:$0xff]  ;;  %v14050_v7 = vld [vmem:[#allocation37_spill] sm:$0xff] }
 0x3ee   : > { %v7443_v38 = vpop.f32.mrf.mxu1  ;;  %v6414_v19 = vadd.f32 %v14046_v12, %v14045_v47  ;;  %v6800_v33 = vadd.f32 %v14048_v60, %v6411_v63  ;;  %v6415_v63 = vadd.f32 %v14057_v4, %v14056_v11  ;;  %v14060_v47 = vld [vmem:[#allocation43_spill] sm:$0xff]  ;;  %v9986_v60 = vld [vmem:[%s10332_s20 + $0x60] sm:$0xff] }
 0x3ef   : > { %7704 = vst.msk [vmem:[%s13376_s21 + $0x20] sm:$0xff] %vm385_vm0, %v7672_v36  ;;  %v7675_v35 = vadd.f32 %v9979_v15, %v7643_v56  ;;  %v7642_v62 = vadd.f32 %v13356_v37, %v7605_v57  ;;  %v7608_v49 = vmul.f32 %v13349_v42, %v7571_v18  ;;  %v7570_v10 = vadd.f32 %v7443_v38, %v7182_v26  ;;  %v14051_v56 = vld [vmem:[#allocation84_spill] sm:$0xff]  ;;  %v14052_v18 = vld [vmem:[#allocation74_spill] sm:$0xff]  ;;  %v9983_v38 = vld [vmem:[%s10332_s20 + $0x58] sm:$0xff] }
 0x3f0   : > { %v9932_v6 = vpop.f32.mrf.mxu1  ;;  %v6413_v36 = vadd.f32 %v14050_v7, %v14049_v61  ;;  %v7189_v57 = vadd.f32 %v14051_v56, %v6801_v0  ;;  %v6803_v29 = vadd.f32 %v14052_v18, %v6414_v19  ;;  %v13496_v0 = vpop.f32.mrf.mxu0  ;;  %v14061_v19 = vld [vmem:[#allocation62_spill] sm:$0xff] }
 0x3f1   : > { %7707 = vst.msk [vmem:[%s13376_s21 + $0x38] sm:$0xff] %vm385_vm0, %v7675_v35  ;;  %v7674_v5 = vadd.f32 %v9980_v50, %v7642_v62  ;;  %v7645_v43 = vadd.f32 %v13356_v37, %v7608_v49  ;;  %v7607_v32 = vmul.f32 %v13349_v42, %v7570_v10  ;;  %v7573_v27 = vadd.f32 %v9932_v6, %v7185_v20  ;;  %v14053_v10 = vld [vmem:[#allocation40_spill] sm:$0xff]  ;;  %v9984_v50 = vld [vmem:[%s10332_s20 + $0x50] sm:$0xff] }
 0x3f2   : > { %v7453_v45 = vpop.f32.mrf.mxu1  ;;  %v6416_v59 = vadd.f32 %v14054_v54, %v14053_v10  ;;  %v6802_v53 = vadd.f32 %v14055_v41, %v6413_v36  ;;  %v7191_v9 = vadd.f32 %v13342_v34, %v6803_v29  ;;  %v6804_v28 = vadd.f32 %v14061_v19, %v6415_v63  ;;  %v13516_v56 = vpop.f32.mrf.mxu0  ;;  %v9989_v63 = vld [vmem:[%s10332_s20 + $0x88] sm:$0xff] }
 0x3f3   : > { %7706 = vst.msk [vmem:[%s13376_s21 + $0x30] sm:$0xff] %vm385_vm0, %v7674_v5  ;;  %v7677_v51 = vadd.f32 %v9981_v31, %v7645_v43  ;;  %v7644_v8 = vadd.f32 %v13356_v37, %v7607_v32  ;;  %v7610_v30 = vmul.f32 %v13349_v42, %v7573_v27  ;;  %v7572_v16 = vadd.f32 %v7453_v45, %v7184_v14  ;;  %v9985_v45 = vld [vmem:[%s10332_s20 + $0x68] sm:$0xff] }
 0x3f4   : > { %v9935_v3 = vpop.f32.mrf.mxu1  ;;  %v7188_v14 = vadd.f32 %v13332_v46, %v6800_v33  ;;  %v14058_v46 = vld [vmem:[#allocation77_spill] sm:$0xff]  ;;  %v7190_v34 = vadd.f32 %v13358_v22, %v6802_v53  ;;  %v14064_v22 = vld [vmem:[#allocation66_spill] sm:$0xff]  ;;  %v9904_v4 = vpop.f32.mrf.mxu0 }
 0x3f5   : > { %7709 = vst.msk [vmem:[%s13376_s21 + $0x48] sm:$0xff] %vm385_vm0, %v7677_v51  ;;  %v7676_v17 = vadd.f32 %v9982_v21, %v7644_v8  ;;  %v7647_v25 = vadd.f32 %v13356_v37, %v7610_v30  ;;  %v7609_v26 = vmul.f32 %v13349_v42, %v7572_v16  ;;  %v7575_v39 = vadd.f32 %v9935_v3, %v7187_v44  ;;  %v14059_v16 = vld [vmem:[#allocation45_spill] sm:$0xff] }
 0x3f6   : > { %v7463_v20 = vpop.f32.mrf.mxu1  ;;  %v6805_v44 = vadd.f32 %v14058_v46, %v6416_v59  ;;  %v6418_v12 = vadd.f32 %v14060_v47, %v14059_v16  ;;  %v9988_v59 = vld [vmem:[%s10332_s20 + $0x70] sm:$0xff]  ;;  %v9990_v47 = vld [vmem:[%s10332_s20 + $0x80] sm:$0xff] }
 0x3f7   : > { %7708 = vst.msk [vmem:[%s13376_s21 + $0x40] sm:$0xff] %vm385_vm0, %v7676_v17  ;;  %v7679_v15 = vadd.f32 %v9983_v38, %v7647_v25  ;;  %v7646_v35 = vadd.f32 %v13356_v37, %v7609_v26  ;;  %v7612_v62 = vmul.f32 %v13349_v42, %v7575_v39  ;;  %v7574_v49 = vadd.f32 %v7463_v20, %v7186_v13  ;;  %v14062_v25 = vld [vmem:[#allocation46_spill] sm:$0xff]  ;;  %v14063_v26 = vld [vmem:[#allocation44_spill] sm:$0xff] }
 0x3f8   : > { %v9938_v6 = vpop.f32.mrf.mxu1  ;;  %v6417_v39 = vadd.f32 %v14063_v26, %v14062_v25  ;;  %v7193_v61 = vadd.f32 %v13378_v52, %v6805_v44  ;;  %v6807_v7 = vadd.f32 %v14064_v22, %v6418_v12  ;;  %v7192_v52 = vadd.f32 %v13396_v55, %v6804_v28  ;;  %v14070_v55 = vld [vmem:[#allocation72_spill] sm:$0xff]  ;;  %v7145_v25 = vpop.f32.mrf.mxu0  ;;  %v9991_v26 = vld [vmem:[%s10332_s20 + $0x98] sm:$0xff] }
 0x3f9   : > { %7711 = vst.msk [vmem:[%s13376_s21 + $0x58] sm:$0xff] %vm385_vm0, %v7679_v15  ;;  %v7678_v5 = vadd.f32 %v9984_v50, %v7646_v35  ;;  %v7649_v43 = vadd.f32 %v13356_v37, %v7612_v62  ;;  %v7611_v32 = vmul.f32 %v13349_v42, %v7574_v49  ;;  %v7577_v27 = vadd.f32 %v9938_v6, %v7189_v57  ;;  %v9987_v57 = vld [vmem:[%s10332_s20 + $0x78] sm:$0xff]  ;;  %v14066_v35 = vld [vmem:[#allocation48_spill] sm:$0xff]  ;;  %v14067_v49 = vld [vmem:[#allocation69_spill] sm:$0xff] }
 0x3fa   : > { %v7473_v48 = vpop.f32.mrf.mxu1  ;;  %v14065_v15 = vld [vmem:[#allocation47_spill] sm:$0xff]  ;;  %v6806_v10 = vadd.f32 %v14067_v49, %v6417_v39 }
 0x3fb   : > { %7710 = vst.msk [vmem:[%s13376_s21 + $0x50] sm:$0xff] %vm385_vm0, %v7678_v5  ;;  %v7681_v31 = vadd.f32 %v9985_v45, %v7649_v43  ;;  %v7648_v51 = vadd.f32 %v13356_v37, %v7611_v32  ;;  %v7614_v8 = vmul.f32 %v13349_v42, %v7577_v27  ;;  %v7576_v30 = vadd.f32 %v7473_v48, %v7188_v14  ;;  %v14068_v50 = vld [vmem:[#allocation51_spill] sm:$0xff]  ;;  %v14069_v5 = vld [vmem:[#allocation49_spill] sm:$0xff]  ;;  %v14071_v45 = vld [vmem:[#allocation52_spill] sm:$0xff] }
 0x3fc   : > { %v9941_v13 = vpop.f32.mrf.mxu1  ;;  %v6420_v62 = vadd.f32 %v14066_v35, %v14065_v15  ;;  %v6419_v43 = vadd.f32 %v14069_v5, %v14068_v50  ;;  %v7195_v32 = vadd.f32 %v13416_v1, %v6807_v7  ;;  %v7194_v1 = vadd.f32 %v13436_v58, %v6806_v10  ;;  %v14076_v58 = vld [vmem:[#allocation81_spill] sm:$0xff]  ;;  %v9992_v15 = vld [vmem:[%s10332_s20 + $0x90] sm:$0xff] }
 0x3fd   : > { %7713 = vst.msk [vmem:[%s13376_s21 + $0x68] sm:$0xff] %vm385_vm0, %v7681_v31  ;;  %v7680_v33 = vadd.f32 %v9986_v60, %v7648_v51  ;;  %v7651_v3 = vadd.f32 %v13356_v37, %v7614_v8  ;;  %v7613_v21 = vmul.f32 %v13349_v42, %v7576_v30  ;;  %v7579_v17 = vadd.f32 %v9941_v13, %v7191_v9  ;;  %v14072_v31 = vld [vmem:[#allocation50_spill] sm:$0xff]  ;;  %v14073_v8 = vld [vmem:[#allocation75_spill] sm:$0xff]  ;;  %v14074_v13 = vld [vmem:[#allocation53_spill] sm:$0xff] }
 0x3fe   : > { %v7483_v36 = vpop.f32.mrf.mxu1  ;;  %v6809_v27 = vadd.f32 %v14070_v55, %v6420_v62  ;;  %v6422_v51 = vadd.f32 %v14072_v31, %v14071_v45  ;;  %v6808_v30 = vadd.f32 %v14073_v8, %v6419_v43  ;;  %v14075_v60 = vld [vmem:[#allocation54_spill] sm:$0xff]  ;;  %v14080_v10 = vld [vmem:[#allocation61_spill] sm:$0xff]  ;;  %v14086_v8 = vld [vmem:[#allocation68_spill] sm:$0xff] }
 0x3ff   : > { %7712 = vst.msk [vmem:[%s13376_s21 + $0x60] sm:$0xff] %vm385_vm0, %v7680_v33  ;;  %v7683_v18 = vadd.f32 %v9987_v57, %v7651_v3  ;;  %v7650_v29 = vadd.f32 %v13356_v37, %v7613_v21  ;;  %v7616_v20 = vmul.f32 %v13349_v42, %v7579_v17  ;;  %v7578_v38 = vadd.f32 %v7483_v36, %v7190_v34  ;;  %v14077_v36 = vld [vmem:[#allocation57_spill] sm:$0xff]  ;;  %v14078_v57 = vld [vmem:[#allocation55_spill] sm:$0xff] }
 0x400   : > { %v9944_v54 = vpop.f32.mrf.mxu1  ;;  %v6421_v33 = vadd.f32 %v14075_v60, %v14074_v13  ;;  %v7197_v3 = vadd.f32 %v13456_v40, %v6809_v27  ;;  %v6811_v21 = vadd.f32 %v14076_v58, %v6422_v51  ;;  %v7196_v40 = vadd.f32 %v13476_v24, %v6808_v30  ;;  %v14082_v24 = vld [vmem:[#allocation82_spill] sm:$0xff]  ;;  %v9993_v50 = vld [vmem:[%s10332_s20 + $0xa8] sm:$0xff]  ;;  %v14087_v30 = vld [vmem:[#allocation67_spill] sm:$0xff] }
 0x401   : > { %7715 = vst.msk [vmem:[%s13376_s21 + $0x78] sm:$0xff] %vm385_vm0, %v7683_v18  ;;  %v7682_v14 = vadd.f32 %v9988_v59, %v7650_v29  ;;  %v7653_v41 = vadd.f32 %v13356_v37, %v7616_v20  ;;  %v7615_v53 = vmul.f32 %v13349_v42, %v7578_v38  ;;  %v7581_v6 = vadd.f32 %v9944_v54, %v7193_v61  ;;  %v14079_v29 = vld [vmem:[#allocation79_spill] sm:$0xff]  ;;  %v14081_v54 = vld [vmem:[#allocation56_spill] sm:$0xff]  ;;  %v14083_v27 = vld [vmem:[#allocation65_spill] sm:$0xff] }
 0x402   : > { %v7493_v11 = vpop.f32.mrf.mxu1  ;;  %v6424_v18 = vadd.f32 %v14078_v57, %v14077_v36  ;;  %v6810_v20 = vadd.f32 %v14079_v29, %v6421_v33  ;;  %v6423_v59 = vadd.f32 %v14081_v54, %v14080_v10  ;;  %v14089_v58 = vld [vmem:[#allocation71_spill] sm:$0xff]  ;;  %v14092_v29 = vld [vmem:[#allocation64_spill] sm:$0xff] }
 0x403   : > { %7714 = vst.msk [vmem:[%s13376_s21 + $0x70] sm:$0xff] %vm385_vm0, %v7682_v14  ;;  %v7685_v9 = vadd.f32 %v9989_v63, %v7653_v41  ;;  %v7652_v46 = vadd.f32 %v13356_v37, %v7615_v53  ;;  %v7618_v44 = vmul.f32 %v13349_v42, %v7581_v6  ;;  %v7580_v48 = vadd.f32 %v7493_v11, %v7192_v52  ;;  %v9907_v6 = vpop.f32.mrf.mxu0  ;;  %v14084_v11 = vld [vmem:[#allocation63_spill] sm:$0xff] }
 0x404   : > { %v9947_v16 = vpop.f32.mrf.mxu1  ;;  %v7199_v14 = vadd.f32 %v13496_v0, %v6811_v21  ;;  %v6813_v41 = vadd.f32 %v14082_v24, %v6424_v18  ;;  %v6426_v63 = vadd.f32 %v14084_v11, %v14083_v27  ;;  %v7198_v0 = vadd.f32 %v13516_v56, %v6810_v20  ;;  %v14090_v21 = vld [vmem:[#allocation70_spill] sm:$0xff] }
 0x405   : > { %7717 = vst.msk [vmem:[%s13376_s21 + $0x88] sm:$0xff] %vm385_vm0, %v7685_v9  ;;  %v7684_v12 = vadd.f32 %v9990_v47, %v7652_v46  ;;  %v7655_v34 = vadd.f32 %v13356_v37, %v7618_v44  ;;  %v7617_v19 = vmul.f32 %v13349_v42, %v7580_v48  ;;  %v7583_v28 = vadd.f32 %v9947_v16, %v7195_v32  ;;  %v14085_v9 = vld [vmem:[#allocation83_spill] sm:$0xff]  ;;  %v9994_v48 = vld [vmem:[%s10332_s20 + $0xa0] sm:$0xff]  ;;  %v14093_v20 = vld [vmem:[#allocation58_spill] sm:$0xff] }
 0x406   : > { %v7503_v17 = vpop.f32.mrf.mxu1  ;;  %v6812_v46 = vadd.f32 %v14085_v9, %v6423_v59  ;;  %v6425_v16 = vadd.f32 %v14087_v30, %v14086_v8  ;;  %v7201_v47 = vadd.f32 %v9904_v4, %v6813_v41 }
 0x407   : > { %7716 = vst.msk [vmem:[%s13376_s21 + $0x80] sm:$0xff] %vm385_vm0, %v7684_v12  ;;  %v7687_v39 = vadd.f32 %v9991_v26, %v7655_v34  ;;  %v7654_v61 = vadd.f32 %v13356_v37, %v7617_v19  ;;  %v7620_v22 = vmul.f32 %v13349_v42, %v7583_v28  ;;  %v7582_v7 = vadd.f32 %v7503_v17, %v7194_v1  ;;  %v14088_v12 = vld [vmem:[#allocation85_spill] sm:$0xff]  ;;  %v7155_v19 = vpop.f32.mrf.mxu0  ;;  %v9995_v28 = vld [vmem:[%s10332_s20 + $0xb8] sm:$0xff]  ;;  %v14091_v26 = vld [vmem:[#allocation86_spill] sm:$0xff] }
 0x408   : > { %v9950_v38 = vpop.f32.mrf.mxu1  ;;  %v6815_v56 = vadd.f32 %v14088_v12, %v6426_v63  ;;  %v6428_v17 = vadd.f32 %v14090_v21, %v14089_v58  ;;  %v7200_v4 = vadd.f32 %v7145_v25, %v6812_v46  ;;  %v10000_v46 = vld [vmem:[%s10332_s20 + $0xd0] sm:$0xff]  ;;  %v10002_v12 = vld [vmem:[%s10332_s20 + $0xe0] sm:$0xff] }
 0x409   : > { %7719 = vst.msk [vmem:[%s13376_s21 + $0x98] sm:$0xff] %vm385_vm0, %v7687_v39  ;;  %v7686_v35 = vadd.f32 %v9992_v15, %v7654_v61  ;;  %v7657_v62 = vadd.f32 %v13356_v37, %v7620_v22  ;;  %v7619_v52 = vmul.f32 %v13349_v42, %v7582_v7  ;;  %v7585_v49 = vadd.f32 %v9950_v38, %v7197_v3  ;;  %v9910_v22 = vpop.f32.mrf.mxu0  ;;  %v9996_v7 = vld [vmem:[%s10332_s20 + $0xb0] sm:$0xff] }
 0x40a   : > { %v7513_v53 = vpop.f32.mrf.mxu1  ;;  %v6814_v39 = vadd.f32 %v14091_v26, %v6425_v16  ;;  %v6427_v38 = vadd.f32 %v14093_v20, %v14092_v29  ;;  %v7203_v15 = vadd.f32 %v9907_v6, %v6815_v56  ;;  %v6817_v25 = vadd.f32 %v13334_v23, %v6428_v17  ;;  %v9998_v23 = vld [vmem:[%s10332_s20 + $0xc0] sm:$0xff] }
 0x40b   : > { %7718 = vst.msk [vmem:[%s13376_s21 + $0x90] sm:$0xff] %vm385_vm0, %v7686_v35  ;;  %v7689_v5 = vadd.f32 %v9993_v50, %v7657_v62  ;;  %v7656_v43 = vadd.f32 %v13356_v37, %v7619_v52  ;;  %v7622_v32 = vmul.f32 %v13349_v42, %v7585_v49  ;;  %v7584_v55 = vadd.f32 %v7513_v53, %v7196_v40  ;;  %v9997_v62 = vld [vmem:[%s10332_s20 + $0xc8] sm:$0xff]  ;;  %v7165_v41 = vpop.f32.mrf.mxu0 }
 0x40c   : > { %v9953_v44 = vpop.f32.mrf.mxu1  ;;  %v7202_v59 = vadd.f32 %v7155_v19, %v6814_v39 }
 0x40d   : > { %7721 = vst.msk [vmem:[%s13376_s21 + $0xa8] sm:$0xff] %vm385_vm0, %v7689_v5  ;;  %v7688_v45 = vadd.f32 %v9994_v48, %v7656_v43  ;;  %v7659_v31 = vadd.f32 %v13356_v37, %v7622_v32  ;;  %v7621_v51 = vmul.f32 %v13349_v42, %v7584_v55  ;;  %v7587_v1 = vadd.f32 %v9953_v44, %v7199_v14 }
 0x40e   : > { %v7523_v34 = vpop.f32.mrf.mxu1  ;;  %v6816_v14 = vadd.f32 %v13338_v2, %v6427_v38  ;;  %v7205_v43 = vadd.f32 %v9910_v22, %v6817_v25  ;;  %v9999_v2 = vld [vmem:[%s10332_s20 + $0xd8] sm:$0xff] }
 0x40f   : > { %7720 = vst.msk [vmem:[%s13376_s21 + $0xa0] sm:$0xff] %vm385_vm0, %v7688_v45  ;;  %v7691_v13 = vadd.f32 %v9995_v28, %v7659_v31  ;;  %v7658_v60 = vadd.f32 %v13356_v37, %v7621_v51  ;;  %v7624_v33 = vmul.f32 %v13349_v42, %v7587_v1  ;;  %v7586_v3 = vadd.f32 %v7523_v34, %v7198_v0  ;;  %v10001_v1 = vld [vmem:[%s10332_s20 + $0xe8] sm:$0xff]  ;;  %v10003_v28 = vld [vmem:[%s10332_s20 + $0xf8] sm:$0xff] }
 0x410   : > { %v9956_v61 = vpop.f32.mrf.mxu1  ;;  %v7204_v0 = vadd.f32 %v7165_v41, %v6816_v14 }
 0x411   : > { %7723 = vst.msk [vmem:[%s13376_s21 + $0xb8] sm:$0xff] %vm385_vm0, %v7691_v13  ;;  %v7690_v36 = vadd.f32 %v9996_v7, %v7658_v60  ;;  %v7661_v57 = vadd.f32 %v13356_v37, %v7624_v33  ;;  %v7623_v18 = vmul.f32 %v13349_v42, %v7586_v3  ;;  %v7589_v40 = vadd.f32 %v9956_v61, %v7201_v47  ;;  %v10004_v33 = vld [vmem:[%s10332_s20 + $0xf0] sm:$0xff] }
 0x412   : > { %v7533_v35 = vpop.f32.mrf.mxu1 }
 0x413   : > { %7722 = vst.msk [vmem:[%s13376_s21 + $0xb0] sm:$0xff] %vm385_vm0, %v7690_v36  ;;  %v7693_v52 = vadd.f32 %v9997_v62, %v7661_v57  ;;  %v7660_v49 = vadd.f32 %v13356_v37, %v7623_v18  ;;  %v7626_v10 = vmul.f32 %v13349_v42, %v7589_v40  ;;  %v7588_v54 = vadd.f32 %v7533_v35, %v7200_v4 }
 0x414   : > { %v9959_v24 = vpop.f32.mrf.mxu1 }
 0x415   : > { %7725 = vst.msk [vmem:[%s13376_s21 + $0xc8] sm:$0xff] %vm385_vm0, %v7693_v52  ;;  %v7692_v53 = vadd.f32 %v9998_v23, %v7660_v49  ;;  %v7663_v6 = vadd.f32 %v13356_v37, %v7626_v10  ;;  %v7625_v50 = vmul.f32 %v13349_v42, %v7588_v54  ;;  %v7591_v5 = vadd.f32 %v9959_v24, %v7203_v15 }
 0x416   : > { %v7543_v32 = vpop.f32.mrf.mxu1 }
 0x417   : > { %7724 = vst.msk [vmem:[%s13376_s21 + $0xc0] sm:$0xff] %vm385_vm0, %v7692_v53  ;;  %v7695_v55 = vadd.f32 %v9999_v2, %v7663_v6  ;;  %v7662_v27 = vadd.f32 %v13356_v37, %v7625_v50  ;;  %v7628_v11 = vmul.f32 %v13349_v42, %v7591_v5  ;;  %v7590_v63 = vadd.f32 %v7543_v32, %v7202_v59 }
 0x418   : > { %v9962_v9 = vpop.f32.mrf.mxu1 }
 0x419   : > { %7727 = vst.msk [vmem:[%s13376_s21 + $0xd8] sm:$0xff] %vm385_vm0, %v7695_v55  ;;  %v7694_v44 = vadd.f32 %v10000_v46, %v7662_v27  ;;  %v7665_v48 = vadd.f32 %v13356_v37, %v7628_v11  ;;  %v7627_v45 = vmul.f32 %v13349_v42, %v7590_v63  ;;  %v7593_v31 = vadd.f32 %v9962_v9, %v7205_v43 }
 0x41a   : > { %v7553_v51 = vpop.f32.mrf.mxu1 }
 0x41b   : > { %7726 = vst.msk [vmem:[%s13376_s21 + $0xd0] sm:$0xff] %vm385_vm0, %v7694_v44  ;;  %v7697_v8 = vadd.f32 %v10001_v1, %v7665_v48  ;;  %v7664_v30 = vadd.f32 %v13356_v37, %v7627_v45  ;;  %v7630_v16 = vmul.f32 %v13349_v42, %v7593_v31  ;;  %v7592_v47 = vadd.f32 %v7553_v51, %v7204_v0 }
 0x41d   : > { %7729 = vst.msk [vmem:[%s13376_s21 + $0xe8] sm:$0xff] %vm385_vm0, %v7697_v8  ;;  %v7696_v56 = vadd.f32 %v10002_v12, %v7664_v30  ;;  %v7667_v34 = vadd.f32 %v13356_v37, %v7630_v16  ;;  %v7629_v19 = vmul.f32 %v13349_v42, %v7592_v47 }
 0x41f   : > { %7728 = vst.msk [vmem:[%s13376_s21 + $0xe0] sm:$0xff] %vm385_vm0, %v7696_v56  ;;  %v7699_v13 = vadd.f32 %v10003_v28, %v7667_v34  ;;  %v7666_v60 = vadd.f32 %v13356_v37, %v7629_v19 }
 0x421   : > { %7731 = vst.msk [vmem:[%s13376_s21 + $0xf8] sm:$0xff] %vm385_vm0, %v7699_v13  ;;  %v7698_v3 = vadd.f32 %v10004_v33, %v7666_v60 }
 0x423   : > { %7730 = vst.msk [vmem:[%s13376_s21 + $0xf0] sm:$0xff] %vm385_vm0, %v7698_v3 }
 0x424 PF: > { %s17_s24 = sadd.s32 1, %s10011_s24  }
 0x425   : > { %p14_p4 = scmp.ge.s32.totalorder %s17_s24, 4  }
 0x427   :  { %16 = sbr.rel (!%p14_p4) target bundleno = 1 (0x1), region = 98 }

</bundles_post_ra>
